<compile_context>
chip_gen: v7x
topology: tpu7x:2x2x1
jax: 0.10.0
libtpu: 0.0.40
codegen_flags: <defaults>
</compile_context>

<pallas_src>
import functools

import jax
import jax.numpy as jnp
from jax.experimental import pallas as pl
from jax.experimental.pallas import tpu as pltpu

BN_EPS = 1e-5
LAYER_DIMS = [4000, 500, 250, 100, 10]      # widths fixed by the module
PADDED_DIMS = [4096, 512, 256, 128, 128]    # lane(128)-aligned widths


def _default_chunk_k():
    """Per-generation K-chunk for streaming w1/w2 (see header comment)."""
    try:
        kind = jax.devices()[0].device_kind.lower()
    except Exception:
        kind = ""
    if "v5" in kind:        # v5e (~0.82 TB/s HBM): keep 4 chunks of 1024
        return 1024
    return 2048             # v6e / v7x: 2 chunks of 2048


def _bn_relu_twins(h, gamma, beta, batch):
    """Training-mode BatchNorm1d + ReLU with per-twin statistics.

    h: (2*batch, d) f32.  One reshape to (2, batch, d), one axis-1 reduction
    pass (two-pass variance for robustness), scale/shift/ReLU on the whole
    block, reshape back.  Padded feature columns stay exactly zero.
    """
    rows, d = h.shape
    h3 = h.reshape(rows // batch, batch, d)
    mean = jnp.mean(h3, axis=1, keepdims=True)
    cent = h3 - mean
    var = jnp.mean(cent * cent, axis=1, keepdims=True)
    hn = cent * jax.lax.rsqrt(var + BN_EPS)
    out = jnp.maximum(hn * gamma.reshape(1, 1, d) + beta.reshape(1, 1, d), 0.0)
    return out.reshape(rows, d)


def _twin_nn_kernel(x_ref, w1_ref, g1_ref, be1_ref,
                    w2_ref, g2_ref, be2_ref,
                    w3_ref, g3_ref, be3_ref,
                    w4_ref, g4_ref, be4_ref,
                    w5_ref, b5_ref,
                    o_ref,
                    acc2_ref,
                    *, batch):
    k = pl.program_id(0)

    @pl.when(k == 0)
    def _():
        acc2_ref[...] = jnp.zeros_like(acc2_ref)

    # Fused per-chunk work: layer-1 (bias b1 dropped -- exactly cancelled by
    # training-mode BN mean subtraction) + BN1 + ReLU + layer-2 partial
    # product.  w1/g1/be1/w2 chunks are streamed via BlockSpec so their HBM
    # DMA overlaps this compute across grid steps.
    h1c = jnp.dot(x_ref[...], w1_ref[...], preferred_element_type=jnp.float32)
    h1c = _bn_relu_twins(h1c, g1_ref[...], be1_ref[...], batch)
    acc2_ref[...] += jnp.dot(h1c.astype(jnp.bfloat16), w2_ref[...],
                             preferred_element_type=jnp.float32)

    @pl.when(k == pl.num_programs(0) - 1)
    def _():
        # Epilogue: layers 2..5 on the tiny (2B, <=512) activations.
        h = _bn_relu_twins(acc2_ref[...], g2_ref[...], be2_ref[...], batch)
        h = jnp.dot(h.astype(jnp.bfloat16), w3_ref[...],
                    preferred_element_type=jnp.float32)
        h = _bn_relu_twins(h, g3_ref[...], be3_ref[...], batch)
        h = jnp.dot(h.astype(jnp.bfloat16), w4_ref[...],
                    preferred_element_type=jnp.float32)
        h = _bn_relu_twins(h, g4_ref[...], be4_ref[...], batch)
        h = jnp.dot(h.astype(jnp.bfloat16), w5_ref[...],
                    preferred_element_type=jnp.float32) + b5_ref[...]
        o_ref[...] = h


def _pad2d(a, rows, cols):
    return jnp.pad(a, ((0, rows - a.shape[0]), (0, cols - a.shape[1])))


def twin_nn_forward(x1, x2, layers, *, chunk_k=None):
    """layers: list of dicts with PyTorch-shaped f32 params (w: (out,in))."""
    batch, feat = x1.shape
    assert x2.shape == (batch, feat)
    # f32 sublane tile is 8 rows; per-twin BN slices must be tile-aligned.
    assert batch % 8 == 0, "batch must be a multiple of 8"
    d1, d2, d3, d4, d5 = PADDED_DIMS
    if chunk_k is None:
        chunk_k = _default_chunk_k()
    assert d1 % chunk_k == 0 and chunk_k % 128 == 0
    nk = d1 // chunk_k
    rows = 2 * batch
    feat_pad = max(8, ((feat + 7) // 8) * 8)

    # Stack the twins: every matmul / weight fetch runs once for both inputs.
    xs = _pad2d(jnp.concatenate([x1, x2], axis=0), rows, feat_pad
                ).astype(jnp.bfloat16)

    def prep_w(i, in_pad, out_pad):
        # PyTorch (out, in) -> (in, out), zero-pad to lane-aligned widths, bf16.
        return _pad2d(layers[i]["w"].T, in_pad, out_pad).astype(jnp.bfloat16)

    def prep_bn(i, out_pad):
        g = jnp.pad(layers[i]["gamma"],
                    (0, out_pad - layers[i]["gamma"].shape[0]),
                    constant_values=1.0).reshape(1, out_pad).astype(jnp.float32)
        be = jnp.pad(layers[i]["beta"],
                     (0, out_pad - layers[i]["beta"].shape[0])
                     ).reshape(1, out_pad).astype(jnp.float32)
        return g, be

    w1 = prep_w(0, feat_pad, d1)
    g1, be1 = prep_bn(0, d1)
    w2 = prep_w(1, d1, d2)
    g2, be2 = prep_bn(1, d2)
    w3 = prep_w(2, d2, d3)
    g3, be3 = prep_bn(2, d3)
    w4 = prep_w(3, d3, d4)
    g4, be4 = prep_bn(3, d4)
    w5 = prep_w(4, d4, d5)
    b5 = jnp.pad(layers[4]["b"], (0, d5 - layers[4]["b"].shape[0])
                 ).reshape(1, d5).astype(jnp.float32)
    # Linear biases b1..b4 are intentionally not passed: training-mode BN
    # removes any per-feature constant shift exactly.  (Would NOT hold for
    # eval-mode / running-stats BN.)

    def resident(shape):
        # NOTE: resident blocks are still double-buffered by the default
        # pipeline even though their block index never changes; <1 MiB total.
        return pl.BlockSpec(shape, lambda k: (0, 0))

    grid_spec = pltpu.PrefetchScalarGridSpec(
        num_scalar_prefetch=0,
        grid=(nk,),
        in_specs=[
            resident((rows, feat_pad)),                           # xs (twins)
            pl.BlockSpec((feat_pad, chunk_k), lambda k: (0, k)),  # w1 (streamed)
            pl.BlockSpec((1, chunk_k), lambda k: (0, k)),         # gamma1
            pl.BlockSpec((1, chunk_k), lambda k: (0, k)),         # beta1
            pl.BlockSpec((chunk_k, d2), lambda k: (k, 0)),        # w2 (streamed)
            resident((1, d2)), resident((1, d2)),                 # gamma2, beta2
            resident((d2, d3)),                                   # w3
            resident((1, d3)), resident((1, d3)),                 # gamma3, beta3
            resident((d3, d4)),                                   # w4
            resident((1, d4)), resident((1, d4)),                 # gamma4, beta4
            resident((d4, d5)),                                   # w5
            resident((1, d5)),                                    # b5
        ],
        out_specs=pl.BlockSpec((rows, d5), lambda k: (0, 0)),
        scratch_shapes=[
            pltpu.VMEM((rows, d2), jnp.float32),   # layer-2 accumulator
        ],
    )

    kernel = functools.partial(_twin_nn_kernel, batch=batch)
    out = pl.pallas_call(
        kernel,
        out_shape=jax.ShapeDtypeStruct((rows, d5), jnp.float32),
        grid_spec=grid_spec,
        compiler_params=pltpu.CompilerParams(
            dimension_semantics=("arbitrary",),   # K-reduction axis (resident out)
            vmem_limit_bytes=32 << 20,            # fits v7x's 64 MiB VMEM
        ),
    )(xs, w1, g1, be1, w2, g2, be2, w3, g3, be3, w4, g4, be4, w5, b5)

    out = out[:, :LAYER_DIMS[-1]]
    return out[:batch], out[batch:]


def init_params(key, feat_length):
    """Deterministic synthetic parameters matching TwinNN.__init__ shapes
    (PyTorch layout: Linear weight (out, in), bias (out,))."""
    dims = [feat_length] + LAYER_DIMS
    layers = []
    for i in range(len(LAYER_DIMS)):
        fan_in, fan_out = dims[i], dims[i + 1]
        key, kw, kb = jax.random.split(key, 3)
        layer = {
            "w": jax.random.normal(kw, (fan_out, fan_in), jnp.float32)
                 / jnp.sqrt(fan_in),
            "b": 0.01 * jax.random.normal(kb, (fan_out,), jnp.float32),
        }
        if i < len(LAYER_DIMS) - 1:
            key, kg, kbe = jax.random.split(key, 3)
            layer["gamma"] = 1.0 + 0.1 * jax.random.normal(kg, (fan_out,),
                                                           jnp.float32)
            layer["beta"] = 0.1 * jax.random.normal(kbe, (fan_out,), jnp.float32)
        layers.append(layer)
    return layers


def twin_nn_reference(x1, x2, layers):
    """Pure-JAX reference mirroring the PyTorch forward (training-mode BN,
    biases included), with the same bf16 weight/activation quantization policy
    as the kernel so comparisons isolate structural errors."""
    def bn_relu(h, gamma, beta):
        mean = jnp.mean(h, axis=0, keepdims=True)
        var = jnp.mean((h - mean) ** 2, axis=0, keepdims=True)
        hn = (h - mean) * jax.lax.rsqrt(var + BN_EPS)
        return jnp.maximum(hn * gamma + beta, 0.0)

    def forward_once(x):
        h = x
        for i, layer in enumerate(layers):
            w = layer["w"].T.astype(jnp.bfloat16)
            h = jnp.dot(h.astype(jnp.bfloat16), w,
                        preferred_element_type=jnp.float32) + layer["b"]
            if i < len(layers) - 1:
                h = bn_relu(h, layer["gamma"], layer["beta"])
        return h

    return forward_once(x1), forward_once(x2)


if __name__ == "__main__":
    feat_length = 32
    batch = 8

    key = jax.random.PRNGKey(0)
    k_p, k_x1, k_x2 = jax.random.split(key, 3)
    layers = init_params(k_p, feat_length)
    x1 = jax.random.normal(k_x1, (batch, feat_length), jnp.float32)
    x2 = jax.random.normal(k_x2, (batch, feat_length), jnp.float32)

    out1, out2 = twin_nn_forward(x1, x2, layers)
    jax.block_until_ready((out1, out2))

    ref1, ref2 = twin_nn_reference(x1, x2, layers)
    assert out1.shape == (batch, 10) and out2.shape == (batch, 10)
    assert jnp.allclose(out1, ref1, atol=1e-2, rtol=1e-2), \
        float(jnp.max(jnp.abs(out1 - ref1)))
    assert jnp.allclose(out2, ref2, atol=1e-2, rtol=1e-2), \
        float(jnp.max(jnp.abs(out2 - ref2)))

    print("KERNEL_OK")
</pallas_src>

<mosaic_0001>
module attributes {stable_mosaic.version = 11 : i64} {
  func.func @_twin_nn_kernel(%arg0: i32, %arg1: memref<16x32xbf16, #tpu.memory_space<vmem>>, %arg2: memref<32x2048xbf16, #tpu.memory_space<vmem>>, %arg3: memref<1x2048xf32, #tpu.memory_space<vmem>>, %arg4: memref<1x2048xf32, #tpu.memory_space<vmem>>, %arg5: memref<2048x512xbf16, #tpu.memory_space<vmem>>, %arg6: memref<1x512xf32, #tpu.memory_space<vmem>>, %arg7: memref<1x512xf32, #tpu.memory_space<vmem>>, %arg8: memref<512x256xbf16, #tpu.memory_space<vmem>>, %arg9: memref<1x256xf32, #tpu.memory_space<vmem>>, %arg10: memref<1x256xf32, #tpu.memory_space<vmem>>, %arg11: memref<256x128xbf16, #tpu.memory_space<vmem>>, %arg12: memref<1x128xf32, #tpu.memory_space<vmem>>, %arg13: memref<1x128xf32, #tpu.memory_space<vmem>>, %arg14: memref<128x128xbf16, #tpu.memory_space<vmem>>, %arg15: memref<1x128xf32, #tpu.memory_space<vmem>>, %arg16: memref<16x128xf32, #tpu.memory_space<vmem>>, %arg17: memref<16x512xf32, #tpu.memory_space<vmem>>) attributes {dimension_semantics = [#tpu.dimension_semantics<arbitrary>], iteration_bounds = array<i64: 2>, scalar_prefetch = 0 : i64, scratch_operands = 1 : i64, tpu.core_type = #tpu.core_type<tc>, window_params = [{pipeline_mode = #tpu.pipeline_mode<synchronous>, transform_indices = @transform_0, window_bounds = array<i64: 16, 32>}, {transform_indices = @transform_1, window_bounds = array<i64: 32, 2048>}, {transform_indices = @transform_2, window_bounds = array<i64: 1, 2048>}, {transform_indices = @transform_3, window_bounds = array<i64: 1, 2048>}, {transform_indices = @transform_4, window_bounds = array<i64: 2048, 512>}, {pipeline_mode = #tpu.pipeline_mode<synchronous>, transform_indices = @transform_5, window_bounds = array<i64: 1, 512>}, {pipeline_mode = #tpu.pipeline_mode<synchronous>, transform_indices = @transform_6, window_bounds = array<i64: 1, 512>}, {pipeline_mode = #tpu.pipeline_mode<synchronous>, transform_indices = @transform_7, window_bounds = array<i64: 512, 256>}, {pipeline_mode = #tpu.pipeline_mode<synchronous>, transform_indices = @transform_8, window_bounds = array<i64: 1, 256>}, {pipeline_mode = #tpu.pipeline_mode<synchronous>, transform_indices = @transform_9, window_bounds = array<i64: 1, 256>}, {pipeline_mode = #tpu.pipeline_mode<synchronous>, transform_indices = @transform_10, window_bounds = array<i64: 256, 128>}, {pipeline_mode = #tpu.pipeline_mode<synchronous>, transform_indices = @transform_11, window_bounds = array<i64: 1, 128>}, {pipeline_mode = #tpu.pipeline_mode<synchronous>, transform_indices = @transform_12, window_bounds = array<i64: 1, 128>}, {pipeline_mode = #tpu.pipeline_mode<synchronous>, transform_indices = @transform_13, window_bounds = array<i64: 128, 128>}, {pipeline_mode = #tpu.pipeline_mode<synchronous>, transform_indices = @transform_14, window_bounds = array<i64: 1, 128>}, {pipeline_mode = #tpu.pipeline_mode<synchronous>, transform_indices = @transform_15, window_bounds = array<i64: 16, 128>}]} {
    %c0_i32 = arith.constant 0 : i32
    %0 = arith.cmpi eq, %arg0, %c0_i32 : i32
    %1 = arith.extui %0 : i1 to i32
    %c0_i32_0 = arith.constant 0 : i32
    %2 = arith.cmpi ne, %1, %c0_i32_0 : i32
    scf.if %2 {
      %cst_22 = arith.constant 0.000000e+00 : f32
      %43 = vector.broadcast %cst_22 : f32 to vector<16x512xf32>
      %c0_23 = arith.constant 0 : index
      %c0_24 = arith.constant 0 : index
      %44 = vector.load %arg17[%c0_23, %c0_24] : memref<16x512xf32, #tpu.memory_space<vmem>>, vector<16x512xf32>
      tpu.vector_store %arg17[%c0_23, %c0_24], %43 {strides = array<i32>} : memref<16x512xf32, #tpu.memory_space<vmem>>, vector<16x512xf32>,
    } else {
    }
    %c0 = arith.constant 0 : index
    %c0_1 = arith.constant 0 : index
    %3 = vector.load %arg1[%c0, %c0_1] : memref<16x32xbf16, #tpu.memory_space<vmem>>, vector<16x32xbf16>
    %c0_2 = arith.constant 0 : index
    %c0_3 = arith.constant 0 : index
    %4 = vector.load %arg2[%c0_2, %c0_3] : memref<32x2048xbf16, #tpu.memory_space<vmem>>, vector<32x2048xbf16>
    %cst = arith.constant dense<0.000000e+00> : vector<16x2048xf32>
    %5 = tpu.matmul %3, %4, %cst {dimension_numbers = #tpu.dot_dimension_numbers<[1], [0], [0], [1], [0, 0, 1, 1], [], []>} : vector<16x32xbf16>, vector<32x2048xbf16>, vector<16x2048xf32> -> vector<16x2048xf32>
    %c0_4 = arith.constant 0 : index
    %c0_5 = arith.constant 0 : index
    %6 = vector.load %arg3[%c0_4, %c0_5] : memref<1x2048xf32, #tpu.memory_space<vmem>>, vector<1x2048xf32>
    %c0_6 = arith.constant 0 : index
    %c0_7 = arith.constant 0 : index
    %7 = vector.load %arg4[%c0_6, %c0_7] : memref<1x2048xf32, #tpu.memory_space<vmem>>, vector<1x2048xf32>
    %8 = vector.shape_cast %5 : vector<16x2048xf32> to vector<2x8x2048xf32>
    %cst_8 = arith.constant dense<0.000000e+00> : vector<2x2048xf32>
    %9 = vector.multi_reduction <add>, %8, %cst_8 [1] : vector<2x8x2048xf32> to vector<2x2048xf32>
    %10 = vector.shape_cast %9 : vector<2x2048xf32> to vector<2x1x2048xf32>
    %cst_9 = arith.constant 8.000000e+00 : f32
    %11 = vector.broadcast %cst_9 : f32 to vector<2x1x2048xf32>
    %12 = arith.divf %10, %11 : vector<2x1x2048xf32>
    %13 = vector.broadcast %12 : vector<2x1x2048xf32> to vector<2x8x2048xf32>
    %14 = arith.subf %8, %13 : vector<2x8x2048xf32>
    %15 = arith.mulf %14, %14 : vector<2x8x2048xf32>
    %cst_10 = arith.constant dense<0.000000e+00> : vector<2x2048xf32>
    %16 = vector.multi_reduction <add>, %15, %cst_10 [1] : vector<2x8x2048xf32> to vector<2x2048xf32>
    %17 = vector.shape_cast %16 : vector<2x2048xf32> to vector<2x1x2048xf32>
    %cst_11 = arith.constant 8.000000e+00 : f32
    %18 = vector.broadcast %cst_11 : f32 to vector<2x1x2048xf32>
    %19 = arith.divf %17, %18 : vector<2x1x2048xf32>
    %cst_12 = arith.constant 9.99999974E-6 : f32
    %20 = vector.broadcast %cst_12 : f32 to vector<2x1x2048xf32>
    %21 = arith.addf %19, %20 : vector<2x1x2048xf32>
    %22 = math.rsqrt %21 : vector<2x1x2048xf32>
    %23 = vector.broadcast %22 : vector<2x1x2048xf32> to vector<2x8x2048xf32>
    %24 = arith.mulf %14, %23 : vector<2x8x2048xf32>
    %25 = vector.shape_cast %6 : vector<1x2048xf32> to vector<1x1x2048xf32>
    %26 = vector.broadcast %25 : vector<1x1x2048xf32> to vector<2x8x2048xf32>
    %27 = arith.mulf %24, %26 : vector<2x8x2048xf32>
    %28 = vector.shape_cast %7 : vector<1x2048xf32> to vector<1x1x2048xf32>
    %29 = vector.broadcast %28 : vector<1x1x2048xf32> to vector<2x8x2048xf32>
    %30 = arith.addf %27, %29 : vector<2x8x2048xf32>
    %cst_13 = arith.constant 0.000000e+00 : f32
    %31 = vector.broadcast %cst_13 : f32 to vector<2x8x2048xf32>
    %32 = arith.maximumf %30, %31 : vector<2x8x2048xf32>
    %33 = vector.shape_cast %32 : vector<2x8x2048xf32> to vector<16x2048xf32>
    %c0_14 = arith.constant 0 : index
    %c0_15 = arith.constant 0 : index
    %34 = vector.load %arg17[%c0_14, %c0_15] : memref<16x512xf32, #tpu.memory_space<vmem>>, vector<16x512xf32>
    %35 = arith.truncf %33 : vector<16x2048xf32> to vector<16x2048xbf16>
    %c0_16 = arith.constant 0 : index
    %c0_17 = arith.constant 0 : index
    %36 = vector.load %arg5[%c0_16, %c0_17] : memref<2048x512xbf16, #tpu.memory_space<vmem>>, vector<2048x512xbf16>
    %cst_18 = arith.constant dense<0.000000e+00> : vector<16x512xf32>
    %37 = tpu.matmul %35, %36, %cst_18 {dimension_numbers = #tpu.dot_dimension_numbers<[1], [0], [0], [1], [0, 0, 1, 1], [], []>} : vector<16x2048xbf16>, vector<2048x512xbf16>, vector<16x512xf32> -> vector<16x512xf32>
    %38 = arith.addf %34, %37 : vector<16x512xf32>
    %c0_19 = arith.constant 0 : index
    %c0_20 = arith.constant 0 : index
    %39 = vector.load %arg17[%c0_19, %c0_20] : memref<16x512xf32, #tpu.memory_space<vmem>>, vector<16x512xf32>
    tpu.vector_store %arg17[%c0_19, %c0_20], %38 {strides = array<i32>} : memref<16x512xf32, #tpu.memory_space<vmem>>, vector<16x512xf32>,
    %c1_i32 = arith.constant 1 : i32
    %40 = arith.cmpi eq, %arg0, %c1_i32 : i32
    %41 = arith.extui %40 : i1 to i32
    %c0_i32_21 = arith.constant 0 : i32
    %42 = arith.cmpi ne, %41, %c0_i32_21 : i32
    scf.if %42 {
      %c0_22 = arith.constant 0 : index
      %c0_23 = arith.constant 0 : index
      %43 = vector.load %arg17[%c0_22, %c0_23] : memref<16x512xf32, #tpu.memory_space<vmem>>, vector<16x512xf32>
      %c0_24 = arith.constant 0 : index
      %c0_25 = arith.constant 0 : index
      %44 = vector.load %arg6[%c0_24, %c0_25] : memref<1x512xf32, #tpu.memory_space<vmem>>, vector<1x512xf32>
      %c0_26 = arith.constant 0 : index
      %c0_27 = arith.constant 0 : index
      %45 = vector.load %arg7[%c0_26, %c0_27] : memref<1x512xf32, #tpu.memory_space<vmem>>, vector<1x512xf32>
      %46 = vector.shape_cast %43 : vector<16x512xf32> to vector<2x8x512xf32>
      %cst_28 = arith.constant dense<0.000000e+00> : vector<2x512xf32>
      %47 = vector.multi_reduction <add>, %46, %cst_28 [1] : vector<2x8x512xf32> to vector<2x512xf32>
      %48 = vector.shape_cast %47 : vector<2x512xf32> to vector<2x1x512xf32>
      %cst_29 = arith.constant 8.000000e+00 : f32
      %49 = vector.broadcast %cst_29 : f32 to vector<2x1x512xf32>
      %50 = arith.divf %48, %49 : vector<2x1x512xf32>
      %51 = vector.broadcast %50 : vector<2x1x512xf32> to vector<2x8x512xf32>
      %52 = arith.subf %46, %51 : vector<2x8x512xf32>
      %53 = arith.mulf %52, %52 : vector<2x8x512xf32>
      %cst_30 = arith.constant dense<0.000000e+00> : vector<2x512xf32>
      %54 = vector.multi_reduction <add>, %53, %cst_30 [1] : vector<2x8x512xf32> to vector<2x512xf32>
      %55 = vector.shape_cast %54 : vector<2x512xf32> to vector<2x1x512xf32>
      %cst_31 = arith.constant 8.000000e+00 : f32
      %56 = vector.broadcast %cst_31 : f32 to vector<2x1x512xf32>
      %57 = arith.divf %55, %56 : vector<2x1x512xf32>
      %cst_32 = arith.constant 9.99999974E-6 : f32
      %58 = vector.broadcast %cst_32 : f32 to vector<2x1x512xf32>
      %59 = arith.addf %57, %58 : vector<2x1x512xf32>
      %60 = math.rsqrt %59 : vector<2x1x512xf32>
      %61 = vector.broadcast %60 : vector<2x1x512xf32> to vector<2x8x512xf32>
      %62 = arith.mulf %52, %61 : vector<2x8x512xf32>
      %63 = vector.shape_cast %44 : vector<1x512xf32> to vector<1x1x512xf32>
      %64 = vector.broadcast %63 : vector<1x1x512xf32> to vector<2x8x512xf32>
      %65 = arith.mulf %62, %64 : vector<2x8x512xf32>
      %66 = vector.shape_cast %45 : vector<1x512xf32> to vector<1x1x512xf32>
      %67 = vector.broadcast %66 : vector<1x1x512xf32> to vector<2x8x512xf32>
      %68 = arith.addf %65, %67 : vector<2x8x512xf32>
      %cst_33 = arith.constant 0.000000e+00 : f32
      %69 = vector.broadcast %cst_33 : f32 to vector<2x8x512xf32>
      %70 = arith.maximumf %68, %69 : vector<2x8x512xf32>
      %71 = vector.shape_cast %70 : vector<2x8x512xf32> to vector<16x512xf32>
      %72 = arith.truncf %71 : vector<16x512xf32> to vector<16x512xbf16>
      %c0_34 = arith.constant 0 : index
      %c0_35 = arith.constant 0 : index
      %73 = vector.load %arg8[%c0_34, %c0_35] : memref<512x256xbf16, #tpu.memory_space<vmem>>, vector<512x256xbf16>
      %cst_36 = arith.constant dense<0.000000e+00> : vector<16x256xf32>
      %74 = tpu.matmul %72, %73, %cst_36 {dimension_numbers = #tpu.dot_dimension_numbers<[1], [0], [0], [1], [0, 0, 1, 1], [], []>} : vector<16x512xbf16>, vector<512x256xbf16>, vector<16x256xf32> -> vector<16x256xf32>
      %c0_37 = arith.constant 0 : index
      %c0_38 = arith.constant 0 : index
      %75 = vector.load %arg9[%c0_37, %c0_38] : memref<1x256xf32, #tpu.memory_space<vmem>>, vector<1x256xf32>
      %c0_39 = arith.constant 0 : index
      %c0_40 = arith.constant 0 : index
      %76 = vector.load %arg10[%c0_39, %c0_40] : memref<1x256xf32, #tpu.memory_space<vmem>>, vector<1x256xf32>
      %77 = vector.shape_cast %74 : vector<16x256xf32> to vector<2x8x256xf32>
      %cst_41 = arith.constant dense<0.000000e+00> : vector<2x256xf32>
      %78 = vector.multi_reduction <add>, %77, %cst_41 [1] : vector<2x8x256xf32> to vector<2x256xf32>
      %79 = vector.shape_cast %78 : vector<2x256xf32> to vector<2x1x256xf32>
      %cst_42 = arith.constant 8.000000e+00 : f32
      %80 = vector.broadcast %cst_42 : f32 to vector<2x1x256xf32>
      %81 = arith.divf %79, %80 : vector<2x1x256xf32>
      %82 = vector.broadcast %81 : vector<2x1x256xf32> to vector<2x8x256xf32>
      %83 = arith.subf %77, %82 : vector<2x8x256xf32>
      %84 = arith.mulf %83, %83 : vector<2x8x256xf32>
      %cst_43 = arith.constant dense<0.000000e+00> : vector<2x256xf32>
      %85 = vector.multi_reduction <add>, %84, %cst_43 [1] : vector<2x8x256xf32> to vector<2x256xf32>
      %86 = vector.shape_cast %85 : vector<2x256xf32> to vector<2x1x256xf32>
      %cst_44 = arith.constant 8.000000e+00 : f32
      %87 = vector.broadcast %cst_44 : f32 to vector<2x1x256xf32>
      %88 = arith.divf %86, %87 : vector<2x1x256xf32>
      %cst_45 = arith.constant 9.99999974E-6 : f32
      %89 = vector.broadcast %cst_45 : f32 to vector<2x1x256xf32>
      %90 = arith.addf %88, %89 : vector<2x1x256xf32>
      %91 = math.rsqrt %90 : vector<2x1x256xf32>
      %92 = vector.broadcast %91 : vector<2x1x256xf32> to vector<2x8x256xf32>
      %93 = arith.mulf %83, %92 : vector<2x8x256xf32>
      %94 = vector.shape_cast %75 : vector<1x256xf32> to vector<1x1x256xf32>
      %95 = vector.broadcast %94 : vector<1x1x256xf32> to vector<2x8x256xf32>
      %96 = arith.mulf %93, %95 : vector<2x8x256xf32>
      %97 = vector.shape_cast %76 : vector<1x256xf32> to vector<1x1x256xf32>
      %98 = vector.broadcast %97 : vector<1x1x256xf32> to vector<2x8x256xf32>
      %99 = arith.addf %96, %98 : vector<2x8x256xf32>
      %cst_46 = arith.constant 0.000000e+00 : f32
      %100 = vector.broadcast %cst_46 : f32 to vector<2x8x256xf32>
      %101 = arith.maximumf %99, %100 : vector<2x8x256xf32>
      %102 = vector.shape_cast %101 : vector<2x8x256xf32> to vector<16x256xf32>
      %103 = arith.truncf %102 : vector<16x256xf32> to vector<16x256xbf16>
      %c0_47 = arith.constant 0 : index
      %c0_48 = arith.constant 0 : index
      %104 = vector.load %arg11[%c0_47, %c0_48] : memref<256x128xbf16, #tpu.memory_space<vmem>>, vector<256x128xbf16>
      %cst_49 = arith.constant dense<0.000000e+00> : vector<16x128xf32>
      %105 = tpu.matmul %103, %104, %cst_49 {dimension_numbers = #tpu.dot_dimension_numbers<[1], [0], [0], [1], [0, 0, 1, 1], [], []>} : vector<16x256xbf16>, vector<256x128xbf16>, vector<16x128xf32> -> vector<16x128xf32>
      %c0_50 = arith.constant 0 : index
      %c0_51 = arith.constant 0 : index
      %106 = vector.load %arg12[%c0_50, %c0_51] : memref<1x128xf32, #tpu.memory_space<vmem>>, vector<1x128xf32>
      %c0_52 = arith.constant 0 : index
      %c0_53 = arith.constant 0 : index
      %107 = vector.load %arg13[%c0_52, %c0_53] : memref<1x128xf32, #tpu.memory_space<vmem>>, vector<1x128xf32>
      %108 = vector.shape_cast %105 : vector<16x128xf32> to vector<2x8x128xf32>
      %cst_54 = arith.constant dense<0.000000e+00> : vector<2x128xf32>
      %109 = vector.multi_reduction <add>, %108, %cst_54 [1] : vector<2x8x128xf32> to vector<2x128xf32>
      %110 = vector.shape_cast %109 : vector<2x128xf32> to vector<2x1x128xf32>
      %cst_55 = arith.constant 8.000000e+00 : f32
      %111 = vector.broadcast %cst_55 : f32 to vector<2x1x128xf32>
      %112 = arith.divf %110, %111 : vector<2x1x128xf32>
      %113 = vector.broadcast %112 : vector<2x1x128xf32> to vector<2x8x128xf32>
      %114 = arith.subf %108, %113 : vector<2x8x128xf32>
      %115 = arith.mulf %114, %114 : vector<2x8x128xf32>
      %cst_56 = arith.constant dense<0.000000e+00> : vector<2x128xf32>
      %116 = vector.multi_reduction <add>, %115, %cst_56 [1] : vector<2x8x128xf32> to vector<2x128xf32>
      %117 = vector.shape_cast %116 : vector<2x128xf32> to vector<2x1x128xf32>
      %cst_57 = arith.constant 8.000000e+00 : f32
      %118 = vector.broadcast %cst_57 : f32 to vector<2x1x128xf32>
      %119 = arith.divf %117, %118 : vector<2x1x128xf32>
      %cst_58 = arith.constant 9.99999974E-6 : f32
      %120 = vector.broadcast %cst_58 : f32 to vector<2x1x128xf32>
      %121 = arith.addf %119, %120 : vector<2x1x128xf32>
      %122 = math.rsqrt %121 : vector<2x1x128xf32>
      %123 = vector.broadcast %122 : vector<2x1x128xf32> to vector<2x8x128xf32>
      %124 = arith.mulf %114, %123 : vector<2x8x128xf32>
      %125 = vector.shape_cast %106 : vector<1x128xf32> to vector<1x1x128xf32>
      %126 = vector.broadcast %125 : vector<1x1x128xf32> to vector<2x8x128xf32>
      %127 = arith.mulf %124, %126 : vector<2x8x128xf32>
      %128 = vector.shape_cast %107 : vector<1x128xf32> to vector<1x1x128xf32>
      %129 = vector.broadcast %128 : vector<1x1x128xf32> to vector<2x8x128xf32>
      %130 = arith.addf %127, %129 : vector<2x8x128xf32>
      %cst_59 = arith.constant 0.000000e+00 : f32
      %131 = vector.broadcast %cst_59 : f32 to vector<2x8x128xf32>
      %132 = arith.maximumf %130, %131 : vector<2x8x128xf32>
      %133 = vector.shape_cast %132 : vector<2x8x128xf32> to vector<16x128xf32>
      %134 = arith.truncf %133 : vector<16x128xf32> to vector<16x128xbf16>
      %c0_60 = arith.constant 0 : index
      %c0_61 = arith.constant 0 : index
      %135 = vector.load %arg14[%c0_60, %c0_61] : memref<128x128xbf16, #tpu.memory_space<vmem>>, vector<128x128xbf16>
      %cst_62 = arith.constant dense<0.000000e+00> : vector<16x128xf32>
      %136 = tpu.matmul %134, %135, %cst_62 {dimension_numbers = #tpu.dot_dimension_numbers<[1], [0], [0], [1], [0, 0, 1, 1], [], []>} : vector<16x128xbf16>, vector<128x128xbf16>, vector<16x128xf32> -> vector<16x128xf32>
      %c0_63 = arith.constant 0 : index
      %c0_64 = arith.constant 0 : index
      %137 = vector.load %arg15[%c0_63, %c0_64] : memref<1x128xf32, #tpu.memory_space<vmem>>, vector<1x128xf32>
      %138 = vector.broadcast %137 : vector<1x128xf32> to vector<16x128xf32>
      %139 = arith.addf %136, %138 : vector<16x128xf32>
      %c0_65 = arith.constant 0 : index
      %c0_66 = arith.constant 0 : index
      %140 = vector.load %arg16[%c0_65, %c0_66] : memref<16x128xf32, #tpu.memory_space<vmem>>, vector<16x128xf32>
      tpu.vector_store %arg16[%c0_65, %c0_66], %139 {strides = array<i32>} : memref<16x128xf32, #tpu.memory_space<vmem>>, vector<16x128xf32>,
    } else {
    }
    return
  }
  func.func @transform_0(%arg0: i32) -> (i32, i32) {
    %c0_i32 = arith.constant 0 : i32
    %c0_i32_0 = arith.constant 0 : i32
    %c0_i32_1 = arith.constant 0 : i32
    return %c0_i32, %c0_i32_0 : i32, i32
  }
  func.func @transform_1(%arg0: i32) -> (i32, i32) {
    %c0_i32 = arith.constant 0 : i32
    %c0_i32_0 = arith.constant 0 : i32
    return %c0_i32, %arg0 : i32, i32
  }
  func.func @transform_2(%arg0: i32) -> (i32, i32) {
    %c0_i32 = arith.constant 0 : i32
    %c0_i32_0 = arith.constant 0 : i32
    return %c0_i32, %arg0 : i32, i32
  }
  func.func @transform_3(%arg0: i32) -> (i32, i32) {
    %c0_i32 = arith.constant 0 : i32
    %c0_i32_0 = arith.constant 0 : i32
    return %c0_i32, %arg0 : i32, i32
  }
  func.func @transform_4(%arg0: i32) -> (i32, i32) {
    %c0_i32 = arith.constant 0 : i32
    %c0_i32_0 = arith.constant 0 : i32
    return %arg0, %c0_i32 : i32, i32
  }
  func.func @transform_5(%arg0: i32) -> (i32, i32) {
    %c0_i32 = arith.constant 0 : i32
    %c0_i32_0 = arith.constant 0 : i32
    %c0_i32_1 = arith.constant 0 : i32
    return %c0_i32, %c0_i32_0 : i32, i32
  }
  func.func @transform_6(%arg0: i32) -> (i32, i32) {
    %c0_i32 = arith.constant 0 : i32
    %c0_i32_0 = arith.constant 0 : i32
    %c0_i32_1 = arith.constant 0 : i32
    return %c0_i32, %c0_i32_0 : i32, i32
  }
  func.func @transform_7(%arg0: i32) -> (i32, i32) {
    %c0_i32 = arith.constant 0 : i32
    %c0_i32_0 = arith.constant 0 : i32
    %c0_i32_1 = arith.constant 0 : i32
    return %c0_i32, %c0_i32_0 : i32, i32
  }
  func.func @transform_8(%arg0: i32) -> (i32, i32) {
    %c0_i32 = arith.constant 0 : i32
    %c0_i32_0 = arith.constant 0 : i32
    %c0_i32_1 = arith.constant 0 : i32
    return %c0_i32, %c0_i32_0 : i32, i32
  }
  func.func @transform_9(%arg0: i32) -> (i32, i32) {
    %c0_i32 = arith.constant 0 : i32
    %c0_i32_0 = arith.constant 0 : i32
    %c0_i32_1 = arith.constant 0 : i32
    return %c0_i32, %c0_i32_0 : i32, i32
  }
  func.func @transform_10(%arg0: i32) -> (i32, i32) {
    %c0_i32 = arith.constant 0 : i32
    %c0_i32_0 = arith.constant 0 : i32
    %c0_i32_1 = arith.constant 0 : i32
    return %c0_i32, %c0_i32_0 : i32, i32
  }
  func.func @transform_11(%arg0: i32) -> (i32, i32) {
    %c0_i32 = arith.constant 0 : i32
    %c0_i32_0 = arith.constant 0 : i32
    %c0_i32_1 = arith.constant 0 : i32
    return %c0_i32, %c0_i32_0 : i32, i32
  }
  func.func @transform_12(%arg0: i32) -> (i32, i32) {
    %c0_i32 = arith.constant 0 : i32
    %c0_i32_0 = arith.constant 0 : i32
    %c0_i32_1 = arith.constant 0 : i32
    return %c0_i32, %c0_i32_0 : i32, i32
  }
  func.func @transform_13(%arg0: i32) -> (i32, i32) {
    %c0_i32 = arith.constant 0 : i32
    %c0_i32_0 = arith.constant 0 : i32
    %c0_i32_1 = arith.constant 0 : i32
    return %c0_i32, %c0_i32_0 : i32, i32
  }
  func.func @transform_14(%arg0: i32) -> (i32, i32) {
    %c0_i32 = arith.constant 0 : i32
    %c0_i32_0 = arith.constant 0 : i32
    %c0_i32_1 = arith.constant 0 : i32
    return %c0_i32, %c0_i32_0 : i32, i32
  }
  func.func @transform_15(%arg0: i32) -> (i32, i32) {
    %c0_i32 = arith.constant 0 : i32
    %c0_i32_0 = arith.constant 0 : i32
    %c0_i32_1 = arith.constant 0 : i32
    return %c0_i32, %c0_i32_0 : i32, i32
  }
}

</mosaic_0001>

<bundles_post_ra>
// kernel: tpu_custom_call.1
= control target key start
LH: loop header
LB: loop body
LE: loop exit
PB: predicated region body
PF: predicated region fallthrough
CT: control target
= control target key end

     0   :  { %s11799_s0 = inlined_call_operand.hbm [shape: bf16[16,32], index: 0, kind: input, shape index: {}]   ;;  %s11800_s1 = inlined_call_operand.hbm [shape: bf16[32,4096], index: 1, kind: input, shape index: {}]   ;;  %s11801_s2 = inlined_call_operand.hbm [shape: f32[1,4096], index: 2, kind: input, shape index: {}]   ;;  %s11802_s3 = inlined_call_operand.hbm [shape: f32[1,4096], index: 3, kind: input, shape index: {}]   ;;  %s11803_s4 = inlined_call_operand.hbm [shape: bf16[4096,512], index: 4, kind: input, shape index: {}]   ;;  %s11804_s5 = inlined_call_operand.hbm [shape: f32[1,512], index: 5, kind: input, shape index: {}]   ;;  %s11805_s6 = inlined_call_operand.hbm [shape: f32[1,512], index: 6, kind: input, shape index: {}]   ;;  %s11806_s7 = inlined_call_operand.hbm [shape: bf16[512,256], index: 7, kind: input, shape index: {}]   ;;  %s11807_s8 = inlined_call_operand.hbm [shape: f32[1,256], index: 8, kind: input, shape index: {}]   ;;  %s11808_s9 = inlined_call_operand.hbm [shape: f32[1,256], index: 9, kind: input, shape index: {}]   ;;  %s11809_s10 = inlined_call_operand.hbm [shape: bf16[256,128], index: 10, kind: input, shape index: {}]   ;;  %s11810_s11 = inlined_call_operand.hbm [shape: f32[1,128], index: 11, kind: input, shape index: {}]   ;;  %s11811_s12 = inlined_call_operand.hbm [shape: f32[1,128], index: 12, kind: input, shape index: {}]   ;;  %s11812_s13 = inlined_call_operand.hbm [shape: bf16[128,128], index: 13, kind: input, shape index: {}]   ;;  %s11813_s14 = inlined_call_operand.hbm [shape: f32[1,128], index: 14, kind: input, shape index: {}]   ;;  %s11814_s15 = inlined_call_operand.hbm [shape: f32[16,128], index: 15, kind: output, shape index: {}]  }
   0x1   :  { %11864 = sst [smem:[#allocation57_spill]] %s11799_s0 }
   0x2   :  { %11865 = sst [smem:[#allocation58_spill]] %s11800_s1 }
   0x3   :  { %11866 = sst [smem:[#allocation59_spill]] %s11802_s3 }
   0x4   :  { %11867 = sst [smem:[#allocation60_spill]] %s11803_s4 }
   0x5   :  { %11868 = sst [smem:[#allocation61_spill]] %s11804_s5 }
   0x6   :  { %11869 = sst [smem:[#allocation62_spill]] %s11805_s6 }
   0x7   :  { %11870 = sst [smem:[#allocation63_spill]] %s11806_s7 }
   0x8   :  { %11871 = sst [smem:[#allocation64_spill]] %s11807_s8 }
   0x9   :  { %11872 = sst [smem:[#allocation65_spill]] %s11808_s9 }
   0xa   :  { %11873 = sst [smem:[#allocation66_spill]] %s11810_s11 }
   0xb   :  { %11874 = sst [smem:[#allocation67_spill]] %s11811_s12 }
   0xc   :  { %11875 = sst [smem:[#allocation68_spill]] %s11812_s13 }
   0xd   :  { %11876 = sst [smem:[#allocation69_spill]] %s11813_s14 }
   0xe   :  { %11877 = sst [smem:[#allocation70_spill]] %s11814_s15 }
   0xf   :  { %20 = vsyncpa [#allocation4], 0 }
  0x10   :  { %21 = vsyncpa [#allocation7], 0 }
  0x11   :  { %23 = vsyncpa [#allocation7 + $0x1], 0 }
  0x12   :  { %24 = vsyncpa [#allocation10], 0 }
  0x13   :  { %26 = vsyncpa [#allocation10 + $0x1], 0 }
  0x14   :  { %27 = vsyncpa [#allocation13], 0 }
  0x15   :  { %28 = vsyncpa [#allocation16], 0 }
  0x16   :  { %29 = vsyncpa [#allocation19], 0 }
  0x17   :  { %30 = vsyncpa [#allocation22], 0 }
  0x18   :  { %31 = vsyncpa [#allocation25], 0 }
  0x19   :  { %32 = vsyncpa [#allocation5], 0  ;;  %s9997_s18 = smov 0   ;;  %s9999_s19 = smov 0  }
  0x1a   :  { %s10001_s20 = smov 0   ;;  %s10003_s21 = smov 0  }
  0x1b LB: > { %11878 = sst [smem:[#allocation37_spill]] %s9881_s20  ;;  %s9887_s22 = smov [#allocation12]   ;;  %s9885_s21 = sphi %s10003_s21, %s11965_s21   ;;  %s9881_s20 = sphi %s10001_s20, %s11967_s20   ;;  %s9877_s19 = sphi %s9999_s19, %s11969_s19   ;;  %s9873_s18 = sphi %s9997_s18, %s11968_s18  }
  0x1c   : > { %s425_s23 = sshll.u32 %s9887_s22, 4  ;;  %s10018_s24 = sadd.s32 4294967295, %s9885_s21   ;;  %s426_s23 = int_to_ptr.vmem [resolvable:$true] %s425_s23 }
  0x1d   : > { %p7387_p0 = scmp.ge.s32.totalorder %s9885_s21, 1  ;;  %p11818_p1 = scmp.eq.s32.totalorder %s10018_s24, 0 }
  0x1e   : > { %p399_p2 = scmp.lt.s32.totalorder %s9885_s21, 3  ;;  %s9888_s26 = smov [#allocation15]  }
  0x1f   : > { %s446_s27 = sshll.u32 %s9888_s26, 4  ;;  %s9889_s29 = smov [#allocation18]   ;;  %s10030_s27 = int_to_ptr.vmem [resolvable:$true] %s446_s27 }
  0x20   : > { %p10024_p4 = pnand %p7387_p0, %p399_p2  ;;  %s471_s30 = sshll.u32 %s9889_s29, 4  ;;  %s10038_s30 = int_to_ptr.vmem [resolvable:$true] %s471_s30 }
  0x21   : > { %s11882_s5 = sld [smem:[#allocation61_spill]] }
  0x22   : > { %s11879_s25 = scalar_select %p10024_p4, 1, 0 }
  0x23   : > { %p8251_p5 = pneg %p10024_p4 }
  0x24   : > { %11880 = sst [smem:[#allocation38_spill]] %s11879_s25 }
  0x25   : > { %p10034_p6 = pnand %p8251_p5, %p11818_p1 }
  0x27   : > { %s11881_s28 = scalar_select %p10034_p6, 1, 0 }
  0x28   : > { %s9365_s22 = scalar_lea.hbm %s11882_s5, 64  ;;  %p10048_p8 = pneg %p10034_p6 }
  0x29   : > { %p9366_p7 = scmp.ne.s32.totalorder %s11882_s5, %s9365_s22  ;;  %p9372_p11 = scmp.lt.u32.totalorder %s9365_s22, %s11882_s5 }
  0x2a   : > { %s11883_s26 = scalar_select %p10048_p8, 1, 0 }
  0x2b   : > { %p9368_p9 = pnand %p10048_p8, %p9366_p7 }
  0x2d   : > { %p9369_p10 = pneg %p9368_p9 }
  0x2f   : > { %p9374_p12 = pnand %p9372_p11, %p9369_p10 }
  0x31   : > { %9377 = shalt.err (!%p9374_p12)
}
  0x32   : > { %s9378_s16 = scalar_lea.vmem %s426_s23, 64  ;;  %p9386_p5 = scmp.lt.s32.totalorder %s426_s23, %s426_s23 }
  0x33   : > { %p9379_p13 = scmp.ne.s32.totalorder %s426_s23, %s9378_s16  ;;  %p9387_p3 = scmp.lt.s32.totalorder %s9378_s16, %s9378_s16 }
  0x35   : > { %p9381_p0 = pnand %p9379_p13, %p10048_p8  ;;  %p9388_p1 = por %p9387_p3, %p9386_p5 }
  0x37   : > { %p9382_p2 = pneg %p9381_p0 }
  0x39   : > { %p9389_p4 = pnand %p9388_p1, %p9382_p2 }
  0x3b   : > { %9392 = shalt.err (!%p9389_p4)
}
  0x3c   : > { %8257 = dma.hbm_to_vmem [thread:$0]  (!%p10034_p6), %s11882_s5, 64, %s426_s23, [#allocation13]  }
  0x3d   : > { %s11884_s7 = sld [smem:[#allocation63_spill]] }
  0x43   : > { %s9393_s22 = scalar_lea.hbm %s11884_s7, 8192 }
  0x44   : > { %p9394_p7 = scmp.ne.s32.totalorder %s11884_s7, %s9393_s22  ;;  %p9400_p1 = scmp.lt.u32.totalorder %s9393_s22, %s11884_s7 }
  0x46   : > { %p9396_p9 = pnand %p9394_p7, %p10048_p8 }
  0x48   : > { %p9397_p3 = pneg %p9396_p9 }
  0x4a   : > { %p9402_p4 = pnand %p9400_p1, %p9397_p3 }
  0x4c   : > { %9405 = shalt.err (!%p9402_p4)
}
  0x4d   : > { %s9406_s23 = scalar_lea.vmem %s10030_s27, 8192  ;;  %p9414_p13 = scmp.lt.s32.totalorder %s10030_s27, %s10030_s27 }
  0x4e   : > { %p9407_p10 = scmp.ne.s32.totalorder %s10030_s27, %s9406_s23  ;;  %p9415_p0 = scmp.lt.s32.totalorder %s9406_s23, %s9406_s23 }
  0x50   : > { %p9409_p11 = pnand %p9407_p10, %p10048_p8  ;;  %p9416_p2 = por %p9415_p0, %p9414_p13 }
  0x52   : > { %p9410_p12 = pneg %p9409_p11 }
  0x54   : > { %p9417_p5 = pnand %p9416_p2, %p9410_p12 }
  0x56   : > { %9420 = shalt.err (!%p9417_p5)
}
  0x57   : > { %s9890_s14 = smov 128   ;;  %s9891_s12 = smov 8  }
  0x58   : > { %8263 = dma.hbm_to_vmem [thread:$0]  (!%p10034_p6), %s11884_s7, 8192, %s10030_s27, [#allocation16], %s9890_s14, %s9890_s14, %s9891_s12  }
  0x59   : > { %s11885_s9 = sld [smem:[#allocation65_spill]] }
  0x5f   : > { %s9421_s22 = scalar_lea.hbm %s11885_s9, 32 }
  0x60   : > { %p9422_p7 = scmp.ne.s32.totalorder %s11885_s9, %s9421_s22  ;;  %p9428_p1 = scmp.lt.u32.totalorder %s9421_s22, %s11885_s9 }
  0x62   : > { %p9424_p9 = pnand %p9422_p7, %p10048_p8 }
  0x64   : > { %p9425_p3 = pneg %p9424_p9 }
  0x66   : > { %p9430_p4 = pnand %p9428_p1, %p9425_p3 }
  0x68   : > { %9433 = shalt.err (!%p9430_p4)
}
  0x69   : > { %s9434_s27 = scalar_lea.vmem %s10038_s30, 32  ;;  %p9442_p13 = scmp.lt.s32.totalorder %s10038_s30, %s10038_s30 }
  0x6a   : > { %p9435_p10 = scmp.ne.s32.totalorder %s10038_s30, %s9434_s27  ;;  %p9443_p0 = scmp.lt.s32.totalorder %s9434_s27, %s9434_s27 }
  0x6c   : > { %p9437_p11 = pnand %p9435_p10, %p10048_p8  ;;  %p9444_p2 = por %p9443_p0, %p9442_p13 }
  0x6e   : > { %p9438_p12 = pneg %p9437_p11 }
  0x70   : > { %p9445_p5 = pnand %p9444_p2, %p9438_p12 }
  0x72   : > { %9448 = shalt.err (!%p9445_p5)
}
  0x73   : > { %8269 = dma.hbm_to_vmem [thread:$0]  (!%p10034_p6), %s11885_s9, 32, %s10038_s30, [#allocation19]  }
  0x74   : > { %s9892_s12 = smov [#allocation21]   ;;  %s11886_s11 = sld [smem:[#allocation66_spill]] }
  0x75   : > { %s495_s15 = sshll.u32 %s9892_s12, 4  ;;  %s496_s15 = int_to_ptr.vmem [resolvable:$true] %s495_s15 }
  0x7a   : > { %s9449_s17 = scalar_lea.hbm %s11886_s11, 16 }
  0x7b   : > { %p9450_p7 = scmp.ne.s32.totalorder %s11886_s11, %s9449_s17  ;;  %p9456_p1 = scmp.lt.u32.totalorder %s9449_s17, %s11886_s11 }
  0x7d   : > { %p9452_p9 = pnand %p9450_p7, %p10048_p8 }
  0x7f   : > { %p9453_p3 = pneg %p9452_p9 }
  0x81   : > { %p9458_p4 = pnand %p9456_p1, %p9453_p3 }
  0x83   : > { %9461 = shalt.err (!%p9458_p4)
}
  0x84   : > { %s9462_s30 = scalar_lea.vmem %s496_s15, 16  ;;  %s9469_s27 = scalar_lea.vmem %s496_s15, 32 }
  0x85   : > { %p9463_p10 = scmp.ne.s32.totalorder %s496_s15, %s9462_s30  ;;  %p9470_p13 = scmp.lt.s32.totalorder %s496_s15, %s496_s15 }
  0x86   : > { %p9471_p0 = scmp.lt.s32.totalorder %s9469_s27, %s9462_s30 }
  0x87   : > { %p9465_p11 = pnand %p9463_p10, %p10048_p8 }
  0x88   : > { %p9472_p2 = por %p9471_p0, %p9470_p13 }
  0x89   : > { %p9466_p12 = pneg %p9465_p11 }
  0x8b   : > { %p9473_p5 = pnand %p9472_p2, %p9466_p12 }
  0x8d   : > { %9476 = shalt.err (!%p9473_p5)
}
  0x8e   : > { %8275 = dma.hbm_to_vmem [thread:$0]  (!%p10034_p6), %s11886_s11, 16, %s496_s15, [#allocation22]  }
  0x8f   : > { %s9893_s12 = smov [#allocation24]   ;;  %s11887_s13 = sld [smem:[#allocation68_spill]] }
  0x90   : > { %s516_s25 = sshll.u32 %s9893_s12, 4  ;;  %s517_s25 = int_to_ptr.vmem [resolvable:$true] %s516_s25 }
  0x95   : > { %s9477_s22 = scalar_lea.hbm %s11887_s13, 1024 }
  0x96   : > { %p9478_p7 = scmp.ne.s32.totalorder %s11887_s13, %s9477_s22  ;;  %p9484_p1 = scmp.lt.u32.totalorder %s9477_s22, %s11887_s13 }
  0x98   : > { %p9480_p9 = pnand %p9478_p7, %p10048_p8 }
  0x9a   : > { %p9481_p3 = pneg %p9480_p9 }
  0x9c   : > { %p9486_p4 = pnand %p9484_p1, %p9481_p3 }
  0x9e   : > { %9489 = shalt.err (!%p9486_p4)
}
  0x9f   : > { %s9490_s15 = scalar_lea.vmem %s517_s25, 1024  ;;  %p9498_p13 = scmp.lt.s32.totalorder %s517_s25, %s517_s25 }
  0xa0   : > { %p9491_p10 = scmp.ne.s32.totalorder %s517_s25, %s9490_s15  ;;  %p9499_p0 = scmp.lt.s32.totalorder %s9490_s15, %s9490_s15 }
  0xa2   : > { %p9493_p11 = pnand %p9491_p10, %p10048_p8  ;;  %p9500_p2 = por %p9499_p0, %p9498_p13 }
  0xa4   : > { %p9494_p12 = pneg %p9493_p11 }
  0xa6   : > { %p9501_p5 = pnand %p9500_p2, %p9494_p12 }
  0xa8   : > { %9504 = shalt.err (!%p9501_p5)
}
  0xa9   : > { %s11824_s27 = smov 64   ;;  %s11822_s5 = smov 4  }
  0xaa   : > { %8281 = dma.hbm_to_vmem [thread:$0]  (!%p10034_p6), %s11887_s13, 1024, %s517_s25, [#allocation25], %s11824_s27, %s11824_s27, %s11822_s5  }
  0xab   : > { %s10150_s4 = sadd.s32 1, %s9885_s21   ;;  %s66_s22 = sadd.s32 1, %s9881_s20 }
  0xac   : > { %11888 = sst [smem:[#allocation39_spill]] %s10150_s4  ;;  %s63_s17 = ssub.s32 %s9885_s21, %s10150_s4 }
  0xad   : > { %p64_p7 = scmp.eq.s32.totalorder %s63_s17, 0  ;;  %p73_p9 = scmp.ne.s32.totalorder %s9881_s20, %s9877_s19 }
  0xae   : > { %p74_p3 = scmp.eq.s32.totalorder %s9885_s21, 0  ;;  %p79_p1 = scmp.ne.s32.totalorder %s9877_s19, %s9873_s18 }
  0xaf   : > { %s10161_s29 = scalar_select %p64_p7, %s9881_s20, %s66_s22  }
  0xb0   : > { %p75_p4 = por %p74_p3, %p73_p9  ;;  %p11890_p10 = scmp.eq.s32.totalorder %s10018_s24, 0 }
  0xb1   : > { %11889 = sst [smem:[#allocation40_spill]] %s10161_s29  ;;  %p8309_p12 = scmp.lt.s32.totalorder %s9885_s21, 2 }
  0xb2   : > { %p10165_p11 = por %p11890_p10, %p79_p1  ;;  %s11826_s25 = sand.u32 1, %s9885_s21  }
  0xb3   : > { %s10172_s23 = sand.u32 1, %s9881_s20   ;;  %s8079_s15 = sshll.u32 %s9885_s21, 10 }
  0xb4   : > { %s11891_s16 = scalar_select %p10165_p11, 1, 0 }
  0xb5   : > { %s7400_s30 = sshll.u32 %s10172_s23, 8  ;;  %s11892_s1 = sld [smem:[#allocation58_spill]] }
  0xb6   : > { %s545_s18 = scalar_lea.vmem [#allocation6], %s7400_s30  ;;  %p10181_p13 = pnand %p8309_p12, %p75_p4 }
  0xb7   : > { %s552_s22 = sshll.u32 %s545_s18, 4  ;;  %s10189_s27 = scalar_lea.sflag [#allocation7], %s11826_s25  ;;  %s10185_s22 = int_to_ptr.vmem [resolvable:$true] %s552_s22 }
  0xb8   : > { %s11893_s5 = scalar_select %p10181_p13, 1, 0 }
  0xb9   : > { %p10195_p2 = pneg %p10181_p13 }
  0xbb   : > { %s10179_s17 = scalar_lea.hbm %s11892_s1, %s8079_s15  ;;  %s9510_s12 = scalar_lea.hbm %s11892_s1, 8192 }
  0xbc   : > { %s9505_s7 = scalar_lea.hbm %s10179_s17, 4096  ;;  %p9511_p9 = scmp.lt.u32.totalorder %s10179_s17, %s11892_s1 }
  0xbd   : > { %p9506_p0 = scmp.ne.s32.totalorder %s10179_s17, %s9505_s7  ;;  %p9512_p3 = scmp.lt.u32.totalorder %s9510_s12, %s9505_s7 }
  0xbe   : > { %s11894_s15 = scalar_select %p10195_p2, 1, 0 }
  0xbf   : > { %p9508_p5 = pnand %p10195_p2, %p9506_p0  ;;  %p9513_p1 = por %p9512_p3, %p9511_p9 }
  0xc0   : > { %p9514_p4 = scmp.lt.u32.totalorder %s9505_s7, %s10179_s17 }
  0xc1   : > { %p9509_p7 = pneg %p9508_p5 }
  0xc2   : > { %p9515_p10 = por %p9514_p4, %p9513_p1 }
  0xc4   : > { %p9516_p12 = pnand %p9515_p10, %p9509_p7 }
  0xc6   : > { %9519 = shalt.err (!%p9516_p12)
}
  0xc7   : > { %s9520_s25 = scalar_lea.vmem %s10185_s22, 4096  ;;  %s9896_s30 = smov [#allocation6]  }
  0xc8   : > { %p9521_p0 = scmp.ne.s32.totalorder %s10185_s22, %s9520_s25  ;;  %s9525_s14 = sshll.u32 %s9896_s30, 4  ;;  %s9526_s14 = int_to_ptr.vmem [resolvable:$false] %s9525_s14 }
  0xc9   : > { %s9527_s9 = scalar_lea.vmem %s9526_s14, 8192  ;;  %p9528_p6 = scmp.lt.s32.totalorder %s10185_s22, %s9526_s14 }
  0xca   : > { %p9523_p5 = pnand %p9521_p0, %p10195_p2  ;;  %p9529_p8 = scmp.lt.s32.totalorder %s9527_s9, %s9520_s25 }
  0xcc   : > { %p9524_p11 = pneg %p9523_p5  ;;  %p9530_p9 = por %p9529_p8, %p9528_p6 }
  0xce   : > { %p9531_p3 = pnand %p9530_p9, %p9524_p11 }
  0xd0   : > { %9534 = shalt.err (!%p9531_p3)
}
  0xd1   : > { %s9897_s7 = smov 2048   ;;  %s9898_s12 = smov 1024  }
  0xd2   : > { %s11895_s18 = smov 64   ;;  %s11837_s30 = sshll.u32 %s10172_s23, 4 }
  0xd3   : > { %8288 = dma.hbm_to_vmem [thread:$0]  (!%p10181_p13), %s10179_s17, 4096, %s10185_s22, %s10189_s27, %s9897_s7, %s9898_s12, %s11895_s18  }
  0xd4   : > { %s8080_s14 = sshll.u32 %s9885_s21, 8  ;;  %s11896_s3 = sld [smem:[#allocation59_spill]] }
  0xd5   : > { %s10225_s1 = scalar_lea.hbm %s11801_s2, %s8080_s14  ;;  %s585_s20 = scalar_lea.vmem [#allocation9], %s11837_s30 }
  0xd6   : > { %s593_s4 = sshll.u32 %s585_s20, 4  ;;  %s11897_s17 = sand.u32 1, %s9885_s21   ;;  %s594_s4 = int_to_ptr.vmem [resolvable:$true] %s593_s4 }
  0xd7   : > { %s10236_s22 = scalar_lea.sflag [#allocation10], %s11897_s17 }
  0xda   : > { %s10230_s29 = scalar_lea.hbm %s11896_s3, %s8080_s14  ;;  %s9540_s13 = scalar_lea.hbm %s11896_s3, 512 }
  0xdb   : > { %s9535_s7 = scalar_lea.hbm %s10230_s29, 256  ;;  %p9541_p7 = scmp.lt.u32.totalorder %s10230_s29, %s11896_s3 }
  0xdc   : > { %p9536_p6 = scmp.ne.s32.totalorder %s10230_s29, %s9535_s7  ;;  %p9542_p1 = scmp.lt.u32.totalorder %s9540_s13, %s9535_s7 }
  0xdd   : > { %p9544_p10 = scmp.lt.u32.totalorder %s9535_s7, %s10230_s29 }
  0xde   : > { %p9538_p8 = pnand %p9536_p6, %p10195_p2  ;;  %p9543_p4 = por %p9542_p1, %p9541_p7 }
  0xe0   : > { %p9539_p11 = pneg %p9538_p8  ;;  %p9545_p12 = por %p9544_p10, %p9543_p4 }
  0xe2   : > { %p9546_p0 = pnand %p9545_p12, %p9539_p11 }
  0xe4   : > { %9549 = shalt.err (!%p9546_p0)
}
  0xe5   : > { %s9550_s20 = scalar_lea.vmem %s594_s4, 256  ;;  %s9899_s9 = smov [#allocation9]  }
  0xe6   : > { %p9551_p5 = scmp.ne.s32.totalorder %s594_s4, %s9550_s20  ;;  %s9555_s17 = sshll.u32 %s9899_s9, 4  ;;  %s9556_s17 = int_to_ptr.vmem [resolvable:$false] %s9555_s17 }
  0xe7   : > { %s9557_s12 = scalar_lea.vmem %s9556_s17, 512  ;;  %p9558_p6 = scmp.lt.s32.totalorder %s594_s4, %s9556_s17 }
  0xe8   : > { %p9553_p9 = pnand %p9551_p5, %p10195_p2  ;;  %p9559_p8 = scmp.lt.s32.totalorder %s9557_s12, %s9550_s20 }
  0xea   : > { %p9554_p3 = pneg %p9553_p9  ;;  %p9560_p13 = por %p9559_p8, %p9558_p6 }
  0xec   : > { %p9561_p1 = pnand %p9560_p13, %p9554_p3 }
  0xee   : > { %9564 = shalt.err (!%p9561_p1)
}
  0xef   : > { %p11898_p7 = scmp.ne.s32.totalorder %s11893_s5, 0  ;;  %s9900_s7 = smov [#allocation3]  }
  0xf0   : > { %s411_s11 = sshll.u32 %s9900_s7, 4  ;;  %s9901_s13 = smov [#allocation14]   ;;  %s412_s11 = int_to_ptr.vmem [resolvable:$true] %s411_s11 }
  0xf1   : > { %8294 = dma.hbm_to_vmem [thread:$0]  (!%p11898_p7), %s10230_s29, 256, %s594_s4, %s10236_s22  }
  0xf2   : > { %s436_s14 = sshll.u32 %s9901_s13, 4  ;;  %s11899_s0 = sld [smem:[#allocation57_spill]]  ;;  %s437_s14 = int_to_ptr.vmem [resolvable:$true] %s436_s14 }
  0xf3   : > { %p11900_p11 = scmp.ne.s32.totalorder %s11883_s26, 0 }
  0xf8   : > { %s9565_s30 = scalar_lea.hbm %s11899_s0, 128 }
  0xf9   : > { %p9566_p13 = scmp.ne.s32.totalorder %s11899_s0, %s9565_s30  ;;  %p9572_p12 = scmp.lt.u32.totalorder %s9565_s30, %s11899_s0 }
  0xfb   : > { %p9568_p4 = pnand %p9566_p13, %p11900_p11 }
  0xfd   : > { %p9569_p10 = pneg %p9568_p4 }
  0xff   : > { %p9574_p0 = pnand %p9572_p12, %p9569_p10 }
 0x101   : > { %9577 = shalt.err (!%p9574_p0)
}
 0x102   : > { %s9578_s4 = scalar_lea.vmem %s412_s11, 128  ;;  %p9586_p6 = scmp.lt.s32.totalorder %s412_s11, %s412_s11 }
 0x103   : > { %p9579_p5 = scmp.ne.s32.totalorder %s412_s11, %s9578_s4  ;;  %p9587_p8 = scmp.lt.s32.totalorder %s9578_s4, %s9578_s4 }
 0x105   : > { %p9581_p9 = pnand %p9579_p5, %p11900_p11  ;;  %p9588_p1 = por %p9587_p8, %p9586_p6 }
 0x107   : > { %p9582_p3 = pneg %p9581_p9 }
 0x109   : > { %p9589_p7 = pnand %p9588_p1, %p9582_p3 }
 0x10b   : > { %9592 = shalt.err (!%p9589_p7)
}
 0x10c   : > { %p11901_p13 = scmp.ne.s32.totalorder %s11881_s28, 0  ;;  %s11902_s29 = smov 4  }
 0x10d   : > { %s11903_s6 = sld [smem:[#allocation62_spill]] }
 0x10e   : > { %8254 = dma.hbm_to_vmem [thread:$0]  (!%p11901_p13), %s11899_s0, 128, %s412_s11, [#allocation4], %s11895_s18, %s11895_s18, %s11902_s29  }
 0x113   : > { %s9593_s25 = scalar_lea.hbm %s11903_s6, 64 }
 0x114   : > { %p9594_p4 = scmp.ne.s32.totalorder %s11903_s6, %s9593_s25  ;;  %p9600_p12 = scmp.lt.u32.totalorder %s9593_s25, %s11903_s6 }
 0x116   : > { %p9596_p7 = pnand %p9594_p4, %p11900_p11 }
 0x118   : > { %p9597_p10 = pneg %p9596_p7 }
 0x11a   : > { %p9602_p0 = pnand %p9600_p12, %p9597_p10 }
 0x11c   : > { %9605 = shalt.err (!%p9602_p0)
}
 0x11d   : > { %s9606_s4 = scalar_lea.vmem %s437_s14, 64  ;;  %p9614_p6 = scmp.lt.s32.totalorder %s437_s14, %s437_s14 }
 0x11e   : > { %p9607_p5 = scmp.ne.s32.totalorder %s437_s14, %s9606_s4  ;;  %p9615_p8 = scmp.lt.s32.totalorder %s9606_s4, %s9606_s4 }
 0x120   : > { %p9609_p9 = pnand %p9607_p5, %p11900_p11  ;;  %p9616_p1 = por %p9615_p8, %p9614_p6 }
 0x122   : > { %p9610_p3 = pneg %p9609_p9 }
 0x124   : > { %p9617_p2 = pnand %p9616_p1, %p9610_p3 }
 0x126   : > { %9620 = shalt.err (!%p9617_p2)
}
 0x127   : > { %8260 = dma.hbm_to_vmem [thread:$0]  (!%p11901_p13), %s11903_s6, 64, %s437_s14, [#allocation13]  }
 0x128   : > { %s9902_s30 = smov [#allocation17]   ;;  %s9903_s13 = smov [#allocation20]  }
 0x129   : > { %s460_s7 = sshll.u32 %s9902_s30, 4  ;;  %s481_s25 = sshll.u32 %s9903_s13, 4  ;;  %s461_s7 = int_to_ptr.vmem [resolvable:$true] %s460_s7  ;;  %s482_s25 = int_to_ptr.vmem [resolvable:$true] %s481_s25 }
 0x12a   : > { %s11904_s8 = sld [smem:[#allocation64_spill]] }
 0x130   : > { %s9621_s20 = scalar_lea.hbm %s11904_s8, 32 }
 0x131   : > { %p9622_p2 = scmp.ne.s32.totalorder %s11904_s8, %s9621_s20  ;;  %p9628_p10 = scmp.lt.u32.totalorder %s9621_s20, %s11904_s8 }
 0x133   : > { %p9624_p4 = pnand %p9622_p2, %p11900_p11 }
 0x135   : > { %p9625_p7 = pneg %p9624_p4 }
 0x137   : > { %p9630_p12 = pnand %p9628_p10, %p9625_p7 }
 0x139   : > { %9633 = shalt.err (!%p9630_p12)
}
 0x13a   : > { %s9634_s14 = scalar_lea.vmem %s461_s7, 32  ;;  %p9642_p3 = scmp.lt.s32.totalorder %s461_s7, %s461_s7 }
 0x13b   : > { %p9635_p0 = scmp.ne.s32.totalorder %s461_s7, %s9634_s14  ;;  %p9643_p6 = scmp.lt.s32.totalorder %s9634_s14, %s9634_s14 }
 0x13d   : > { %p9637_p5 = pnand %p9635_p0, %p11900_p11  ;;  %p9644_p8 = por %p9643_p6, %p9642_p3 }
 0x13f   : > { %p9638_p9 = pneg %p9637_p5 }
 0x141   : > { %p9645_p1 = pnand %p9644_p8, %p9638_p9 }
 0x143   : > { %9648 = shalt.err (!%p9645_p1)
}
 0x144   : > { %8266 = dma.hbm_to_vmem [thread:$0]  (!%p11901_p13), %s11904_s8, 32, %s461_s7, [#allocation16]  }
 0x145   : > { %s9649_s9 = scalar_lea.hbm %s11809_s10, 2048 }
 0x146   : > { %p9650_p2 = scmp.ne.s32.totalorder %s11809_s10, %s9649_s9  ;;  %p9656_p10 = scmp.lt.u32.totalorder %s9649_s9, %s11809_s10 }
 0x148   : > { %p9652_p4 = pnand %p9650_p2, %p11900_p11 }
 0x14a   : > { %p9653_p7 = pneg %p9652_p4 }
 0x14c   : > { %p9658_p12 = pnand %p9656_p10, %p9653_p7 }
 0x14e   : > { %9661 = shalt.err (!%p9658_p12)
}
 0x14f   : > { %s9662_s11 = scalar_lea.vmem %s482_s25, 2048  ;;  %p9670_p3 = scmp.lt.s32.totalorder %s482_s25, %s482_s25 }
 0x150   : > { %p9663_p0 = scmp.ne.s32.totalorder %s482_s25, %s9662_s11  ;;  %p9671_p6 = scmp.lt.s32.totalorder %s9662_s11, %s9662_s11 }
 0x152   : > { %p9665_p5 = pnand %p9663_p0, %p11900_p11  ;;  %p9672_p8 = por %p9671_p6, %p9670_p3 }
 0x154   : > { %p9666_p9 = pneg %p9665_p5 }
 0x156   : > { %p9673_p1 = pnand %p9672_p8, %p9666_p9 }
 0x158   : > { %9676 = shalt.err (!%p9673_p1)
}
 0x159   : > { %8272 = dma.hbm_to_vmem [thread:$0]  (!%p11901_p13), %s11809_s10, 2048, %s482_s25, [#allocation19], %s11895_s18, %s11895_s18, %s11902_s29  }
 0x15a   : > { %s9904_s3 = smov [#allocation23]   ;;  %s9905_s0 = smov [#allocation26]  }
 0x15b   : > { %s506_s30 = sshll.u32 %s9904_s3, 4  ;;  %s530_s13 = sshll.u32 %s9905_s0, 4  ;;  %s507_s30 = int_to_ptr.vmem [resolvable:$true] %s506_s30  ;;  %s531_s13 = int_to_ptr.vmem [resolvable:$true] %s530_s13 }
 0x15c   : > { %s11905_s20 = sld [smem:[#allocation67_spill]] }
 0x162   : > { %s11906_s12 = smov %s11905_s20  ;;  %s9677_s4 = scalar_lea.hbm %s11905_s20, 16 }
 0x163   : > { %p9678_p2 = scmp.ne.s32.totalorder %s11906_s12, %s9677_s4  ;;  %p9684_p10 = scmp.lt.u32.totalorder %s9677_s4, %s11906_s12 }
 0x165   : > { %p9680_p4 = pnand %p9678_p2, %p11900_p11 }
 0x167   : > { %p9681_p7 = pneg %p9680_p4 }
 0x169   : > { %p9686_p12 = pnand %p9684_p10, %p9681_p7 }
 0x16b   : > { %9689 = shalt.err (!%p9686_p12)
}
 0x16c   : > { %s9690_s18 = scalar_lea.vmem %s507_s30, 16  ;;  %s9697_s29 = scalar_lea.vmem %s507_s30, 32 }
 0x16d   : > { %p9691_p0 = scmp.ne.s32.totalorder %s507_s30, %s9690_s18  ;;  %p9698_p3 = scmp.lt.s32.totalorder %s507_s30, %s507_s30 }
 0x16e   : > { %p9699_p6 = scmp.lt.s32.totalorder %s9697_s29, %s9690_s18 }
 0x16f   : > { %p9693_p5 = pnand %p9691_p0, %p11900_p11 }
 0x170   : > { %p9700_p8 = por %p9699_p6, %p9698_p3 }
 0x171   : > { %p9694_p9 = pneg %p9693_p5 }
 0x173   : > { %p9701_p1 = pnand %p9700_p8, %p9694_p9 }
 0x175   : > { %9704 = shalt.err (!%p9701_p1)
}
 0x176   : > { %8278 = dma.hbm_to_vmem [thread:$0]  (!%p11901_p13), %s11906_s12, 16, %s507_s30, [#allocation22]  }
 0x177   : > { %s11907_s8 = sshll.u32 %s10172_s23, 4  ;;  %s11908_s17 = sld [smem:[#allocation69_spill]] }
 0x178   : > { %s566_s14 = scalar_lea.vmem [#allocation8], %s11907_s8 }
 0x179   : > { %s574_s3 = sshll.u32 %s566_s14, 4  ;;  %s575_s3 = int_to_ptr.vmem [resolvable:$true] %s574_s3 }
 0x17d   : > { %s9705_s20 = scalar_lea.hbm %s11908_s17, 16 }
 0x17e   : > { %p9706_p2 = scmp.ne.s32.totalorder %s11908_s17, %s9705_s20  ;;  %p9712_p10 = scmp.lt.u32.totalorder %s9705_s20, %s11908_s17 }
 0x180   : > { %p9708_p4 = pnand %p9706_p2, %p11900_p11 }
 0x182   : > { %p9709_p7 = pneg %p9708_p4 }
 0x184   : > { %p9714_p12 = pnand %p9712_p10, %p9709_p7 }
 0x186   : > { %9717 = shalt.err (!%p9714_p12)
}
 0x187   : > { %s9718_s30 = scalar_lea.vmem %s531_s13, 16  ;;  %s9725_s29 = scalar_lea.vmem %s531_s13, 32 }
 0x188   : > { %p9719_p0 = scmp.ne.s32.totalorder %s531_s13, %s9718_s30  ;;  %p9726_p3 = scmp.lt.s32.totalorder %s531_s13, %s531_s13 }
 0x189   : > { %p9727_p6 = scmp.lt.s32.totalorder %s9725_s29, %s9718_s30 }
 0x18a   : > { %p9721_p5 = pnand %p9719_p0, %p11900_p11 }
 0x18b   : > { %p9728_p8 = por %p9727_p6, %p9726_p3 }
 0x18c   : > { %p9722_p9 = pneg %p9721_p5 }
 0x18e   : > { %p9729_p1 = pnand %p9728_p8, %p9722_p9 }
 0x190   : > { %9732 = shalt.err (!%p9729_p1)
}
 0x191   : > { %8284 = dma.hbm_to_vmem [thread:$0]  (!%p11901_p13), %s11908_s17, 16, %s531_s13, [#allocation25]  }
 0x192   : > { %s7409_s26 = sshll.u32 %s10172_s23, 12  ;;  %s9733_s8 = scalar_lea.hbm %s10225_s1, 256 }
 0x193   : > { %p9734_p11 = scmp.ne.s32.totalorder %s10225_s1, %s9733_s8  ;;  %p11909_p2 = scmp.ne.s32.totalorder %s11894_s15, 0 }
 0x194   : > { %s9738_s28 = scalar_lea.hbm %s11801_s2, 512  ;;  %p9739_p10 = scmp.lt.u32.totalorder %s10225_s1, %s11801_s2 }
 0x195   : > { %p9736_p4 = pnand %p9734_p11, %p11909_p2  ;;  %p9740_p12 = scmp.lt.u32.totalorder %s9738_s28, %s9733_s8 }
 0x196   : > { %p9742_p5 = scmp.lt.u32.totalorder %s9733_s8, %s10225_s1 }
 0x197   : > { %p9737_p7 = pneg %p9736_p4  ;;  %p9741_p0 = por %p9740_p12, %p9739_p10 }
 0x199   : > { %p9743_p9 = por %p9742_p5, %p9741_p0 }
 0x19b   : > { %p9744_p13 = pnand %p9743_p9, %p9737_p7 }
 0x19d   : > { %9747 = shalt.err (!%p9744_p13)
}
 0x19e   : > { %s9748_s13 = scalar_lea.vmem %s575_s3, 256  ;;  %s9906_s4 = smov [#allocation8]  }
 0x19f   : > { %p9749_p3 = scmp.ne.s32.totalorder %s575_s3, %s9748_s13  ;;  %s9753_s11 = sshll.u32 %s9906_s4, 4  ;;  %s9754_s11 = int_to_ptr.vmem [resolvable:$false] %s9753_s11 }
 0x1a0   : > { %s9755_s7 = scalar_lea.vmem %s9754_s11, 512  ;;  %p9756_p1 = scmp.lt.s32.totalorder %s575_s3, %s9754_s11 }
 0x1a1   : > { %p9751_p6 = pnand %p9749_p3, %p11909_p2  ;;  %p9757_p11 = scmp.lt.s32.totalorder %s9755_s7, %s9748_s13 }
 0x1a3   : > { %p9752_p8 = pneg %p9751_p6  ;;  %p9758_p4 = por %p9757_p11, %p9756_p1 }
 0x1a5   : > { %p9759_p10 = pnand %p9758_p4, %p9752_p8 }
 0x1a7   : > { %9762 = shalt.err (!%p9759_p10)
}
 0x1a8   : > { %p11910_p12 = scmp.ne.s32.totalorder %s11893_s5, 0  ;;  %s8083_s18 = sshll.u32 %s9885_s21, 16 }
 0x1a9   : > { %s11911_s6 = sld [smem:[#allocation60_spill]]  ;;  %s604_s8 = scalar_lea.vmem [#allocation11], %s7409_s26 }
 0x1aa   : > { %8291 = dma.hbm_to_vmem [thread:$0]  (!%p11910_p12), %s10225_s1, 256, %s575_s3, %s10189_s27  }
 0x1ab   : > { %s612_s14 = sshll.u32 %s604_s8, 4  ;;  %s10399_s14 = int_to_ptr.vmem [resolvable:$true] %s612_s14 }
 0x1af   : > { %s10395_s25 = scalar_lea.hbm %s11911_s6, %s8083_s18  ;;  %s9768_s27 = scalar_lea.hbm %s11911_s6, 131072 }
 0x1b0   : > { %s9763_s0 = scalar_lea.hbm %s10395_s25, 65536  ;;  %p9769_p9 = scmp.lt.u32.totalorder %s10395_s25, %s11911_s6 }
 0x1b1   : > { %p9764_p7 = scmp.ne.s32.totalorder %s10395_s25, %s9763_s0  ;;  %p9770_p13 = scmp.lt.u32.totalorder %s9768_s27, %s9763_s0 }
 0x1b2   : > { %p9772_p6 = scmp.lt.u32.totalorder %s9763_s0, %s10395_s25 }
 0x1b3   : > { %p9766_p0 = pnand %p9764_p7, %p11909_p2  ;;  %p9771_p3 = por %p9770_p13, %p9769_p9 }
 0x1b5   : > { %p9767_p5 = pneg %p9766_p0  ;;  %p9773_p8 = por %p9772_p6, %p9771_p3 }
 0x1b7   : > { %p9774_p1 = pnand %p9773_p8, %p9767_p5 }
 0x1b9   : > { %9777 = shalt.err (!%p9774_p1)
}
 0x1ba   : > { %s9778_s23 = scalar_lea.vmem %s10399_s14, 65536  ;;  %s9907_s26 = smov [#allocation11]  }
 0x1bb   : > { %p9779_p11 = scmp.ne.s32.totalorder %s10399_s14, %s9778_s23  ;;  %s9783_s9 = sshll.u32 %s9907_s26, 4  ;;  %s9784_s9 = int_to_ptr.vmem [resolvable:$false] %s9783_s9 }
 0x1bc   : > { %s9785_s20 = scalar_lea.vmem %s9784_s9, 131072  ;;  %p9786_p7 = scmp.lt.s32.totalorder %s10399_s14, %s9784_s9 }
 0x1bd   : > { %p9781_p4 = pnand %p9779_p11, %p11909_p2  ;;  %p9787_p0 = scmp.lt.s32.totalorder %s9785_s20, %s9778_s23 }
 0x1bf   : > { %p9782_p10 = pneg %p9781_p4  ;;  %p9788_p9 = por %p9787_p0, %p9786_p7 }
 0x1c1   : > { %p9789_p13 = pnand %p9788_p9, %p9782_p10 }
 0x1c3   : > { %9792 = shalt.err (!%p9789_p13)
}
 0x1c4   : > { %s9908_s13 = smov 256   ;;  %s9909_s4 = smov 16  }
 0x1c5   : > { %8297 = dma.hbm_to_vmem [thread:$0]  (!%p11910_p12), %s10395_s25, 65536, %s10399_s14, %s10236_s22, %s9908_s13, %s9908_s13, %s9909_s4  }
 0x1c6   : > { %s11912_s15 = sld [smem:[#allocation38_spill]] }
 0x1cc   : > { %p11913_p2 = scmp.ne.s32.totalorder %s11912_s15, 0 }
 0x1ce   : > { %624 = sbr.rel (%p11913_p2) target bundleno = 2374 (0x946), region = 80 }
 0x1d5   : > { %p11914_p5 = scmp.eq.s32.totalorder %s10018_s24, 0 }
 0x1d7   : > { %9836 = dma.done.wait (%p11914_p5), [#allocation4], 128   ;;  %p11915_p3 = pmov %p11914_p5 }
 0x1d8   : > { %s630_s11 = sand.u32 1, %s10018_s24   ;;  %s632_s7 = sand.u32 1, %s9877_s19  }
 0x1d9   : > { %9838 = vsyncadd (%p11915_p3), [#allocation4], 4294967168  ;;  %s7415_s18 = sshll.u32 %s632_s7, 8  ;;  %s631_s30 = scalar_lea.sflag [#allocation7], %s630_s11 }
 0x1da   : > { %s10431_s29 = scalar_lea.vmem [#allocation6], %s7415_s18  ;;  %p11916_p6 = scmp.ne.s32.totalorder %s11891_s16, 0 }
 0x1dc   : > { %9840 = dma.done.wait (%p11916_p6), %s631_s30, 4352  }
 0x1dd   : > { %9842 = vsyncadd (%p11916_p6), %s631_s30, 4294962944  ;;  %s7416_s5 = sshll.u32 %s632_s7, 4  ;;  %s649_s25 = scalar_lea.sflag [#allocation10], %s630_s11 }
 0x1de   : > { %s10437_s22 = scalar_lea.vmem [#allocation8], %s7416_s5  ;;  %s10439_s8 = scalar_lea.vmem [#allocation9], %s7416_s5 }
 0x1df   : > { %9844 = dma.done.wait (%p11916_p6), %s649_s25, 65792  }
 0x1e0   : > { %9846 = vsyncadd (%p11916_p6), %s649_s25, 4294901504  ;;  %s7418_s14 = sshll.u32 %s632_s7, 12  ;;  %p11917_p12 = pmov %p11915_p3 }
 0x1e1   : > { %s10445_s0 = scalar_lea.vmem [#allocation11], %s7418_s14 }
 0x1e2   : > { %9848 = dma.done.wait (%p11917_p12), [#allocation13], 128   ;;  %p11918_p8 = pmov %p11915_p3 }
 0x1e3   : > { %p11919_p1 = pmov %p11915_p3 }
 0x1e4   : > { %9850 = vsyncadd (%p11918_p8), [#allocation13], 4294967168 }
 0x1e5   : > { %9852 = dma.done.wait (%p11919_p1), [#allocation16], 8224   ;;  %p11920_p11 = pmov %p11919_p1 }
 0x1e6   : > { %p11921_p4 = pmov %p11919_p1 }
 0x1e7   : > { %9854 = vsyncadd (%p11920_p11), [#allocation16], 4294959072 }
 0x1e8   : > { %9856 = dma.done.wait (%p11921_p4), [#allocation19], 2080   ;;  %p11922_p10 = pmov %p11919_p1 }
 0x1e9   : > { %p11923_p7 = pmov %p11919_p1 }
 0x1ea   : > { %9858 = vsyncadd (%p11922_p10), [#allocation19], 4294965216 }
 0x1eb   : > { %9860 = dma.done.wait (%p11923_p7), [#allocation22], 32   ;;  %p11924_p0 = pmov %p11919_p1 }
 0x1ed   : > { %9862 = vsyncadd (%p11924_p0), [#allocation22], 4294967264  ;;  %p11925_p9 = pmov %p11924_p0 }
 0x1ee   : > { %p11926_p13 = pmov %p11924_p0 }
 0x1ef   : > { %9864 = dma.done.wait (%p11925_p9), [#allocation25], 1040  }
 0x1f0   : > { %9866 = vsyncadd (%p11926_p13), [#allocation25], 4294966256  ;;  %p11927_p2 = scmp.ne.s32.totalorder %s10018_s24, 0 }
 0x1f1   : > { %v9910_v0 = vmov (!%p11927_p2), 0.0  }
 0x1f2   : > { %766 = sbr.rel (%p11927_p2) target bundleno = 505 (0x1f9), region = 144  ;;  %767 = vst [vmem:[#allocation2] sm:$0xff] (!%p11927_p2), %v9910_v0  ;;  %768 = vst [vmem:[#allocation2 + $0x8] sm:$0xff] (!%p11927_p2), %v9910_v0 }
 0x1f3   : > { %769 = vst [vmem:[#allocation2 + $0x10] sm:$0xff] (!%p11927_p2), %v9910_v0  ;;  %770 = vst [vmem:[#allocation2 + $0x18] sm:$0xff] (!%p11927_p2), %v9910_v0 }
 0x1f4   : > { %771 = vst [vmem:[#allocation2 + $0x20] sm:$0xff] (!%p11927_p2), %v9910_v0  ;;  %772 = vst [vmem:[#allocation2 + $0x28] sm:$0xff] (!%p11927_p2), %v9910_v0 }
 0x1f5   : > { %773 = vst [vmem:[#allocation2 + $0x30] sm:$0xff] (!%p11927_p2), %v9910_v0  ;;  %774 = vst [vmem:[#allocation2 + $0x38] sm:$0xff] (!%p11927_p2), %v9910_v0 }
 0x1f9 PF: > { %v777_v1 = vld [vmem:[%s10431_s29] sm:$0xff]  ;;  %v9911_v7 = vmov 0   ;;  %v778_v9 = vld [vmem:[%s10431_s29 + $0x8] sm:$0xff]  ;;  %v779_v15 = vld [vmem:[%s10431_s29 + $0x10] sm:$0xff]  ;;  %vm974_vm0 = vcmask 261120   ;;  %p7983_p5 = scmp.ne.s32.totalorder %s10018_s24, 1 }
 0x1fa   : > { %v785_v2 = vld [vmem:[%s10431_s29 + $0x40] sm:$0xff]  ;;  %1010 = vmatprep.mubr.bf16.mxu0 %v9911_v7  ;;  %1053 = vmatprep.mubr.bf16.mxu1 %v9911_v7  ;;  %v786_v10 = vld [vmem:[%s10431_s29 + $0x48] sm:$0xff]  ;;  %v787_v18 = vld [vmem:[%s10431_s29 + $0x50] sm:$0xff]  ;;  %vm9913_vm1 = vmmov (!%p7983_p5), 0  }
 0x1fb   : > { %v793_v3 = vld [vmem:[%s10431_s29 + $0x80] sm:$0xff]  ;;  %v7432_v4 = vcombine.high %v777_v1, %v785_v2  ;;  %v7431_v5 = vcombine.low %v777_v1, %v785_v2  ;;  %v7434_v11 = vcombine.high %v778_v9, %v786_v10  ;;  %v7433_v12 = vcombine.low %v778_v9, %v786_v10  ;;  %v794_v13 = vld [vmem:[%s10431_s29 + $0x88] sm:$0xff]  ;;  %v780_v20 = vld [vmem:[%s10431_s29 + $0x18] sm:$0xff] }
 0x1fc   : > { %v801_v6 = vld [vmem:[%s10431_s29 + $0xc0] sm:$0xff]  ;;  %v802_v14 = vld [vmem:[%s10431_s29 + $0xc8] sm:$0xff]  ;;  %v7436_v19 = vcombine.high %v779_v15, %v787_v18  ;;  %v788_v21 = vld [vmem:[%s10431_s29 + $0x58] sm:$0xff]  ;;  %v7435_v27 = vcombine.low %v779_v15, %v787_v18 }
 0x1fd   : > { %v7448_v8 = vcombine.high %v793_v3, %v801_v6  ;;  %978 = vmatprep.subr.bf16.mxu0 %v7432_v4  ;;  %v7447_v16 = vcombine.low %v793_v3, %v801_v6  ;;  %v7450_v17 = vcombine.high %v794_v13, %v802_v14  ;;  %1021 = vmatprep.subr.bf16.mxu1 %v7434_v11  ;;  %v795_v23 = vld [vmem:[%s10431_s29 + $0x90] sm:$0xff]  ;;  %v10485_v25 = vld [vmem:[#allocation3] sm:$0xff]   ;;  %v781_v32 = vld [vmem:[%s10431_s29 + $0x20] sm:$0xff] }
 0x1fe   : > { %979 = vmatpush1.bf16.msra.mxu0 %v7431_v5  ;;  %1022 = vmatpush1.bf16.msra.mxu1 %v7433_v12  ;;  %v7449_v22 = vcombine.low %v794_v13, %v802_v14  ;;  %v803_v24 = vld [vmem:[%s10431_s29 + $0xd0] sm:$0xff]  ;;  %v7438_v26 = vcombine.high %v780_v20, %v788_v21  ;;  %v796_v28 = vld [vmem:[%s10431_s29 + $0x98] sm:$0xff]  ;;  %v7437_v31 = vcombine.low %v780_v20, %v788_v21  ;;  %v789_v33 = vld [vmem:[%s10431_s29 + $0x60] sm:$0xff] }
 0x1ff   : > { %980 = vmatprep.subr.bf16.mxu0 %v7448_v8  ;;  %1023 = vmatprep.subr.bf16.mxu1 %v7450_v17  ;;  %v804_v29 = vld [vmem:[%s10431_s29 + $0xd8] sm:$0xff]  ;;  %v7452_v30 = vcombine.high %v795_v23, %v803_v24  ;;  %v7451_v35 = vcombine.low %v795_v23, %v803_v24  ;;  %v782_v36 = vld [vmem:[%s10431_s29 + $0x28] sm:$0xff]  ;;  %v7440_v38 = vcombine.high %v781_v32, %v789_v33  ;;  %v797_v39 = vld [vmem:[%s10431_s29 + $0xa0] sm:$0xff] }
 0x200   : > { %v7454_v34 = vcombine.high %v796_v28, %v804_v29  ;;  %v790_v37 = vld [vmem:[%s10431_s29 + $0x68] sm:$0xff]  ;;  %v7453_v40 = vcombine.low %v796_v28, %v804_v29  ;;  %v805_v41 = vld [vmem:[%s10431_s29 + $0xe0] sm:$0xff]  ;;  %v7439_v45 = vcombine.low %v781_v32, %v789_v33  ;;  %v783_v46 = vld [vmem:[%s10431_s29 + $0x30] sm:$0xff] }
 0x201   : > { %v7442_v42 = vcombine.high %v782_v36, %v790_v37  ;;  %v798_v43 = vld [vmem:[%s10431_s29 + $0xa8] sm:$0xff]  ;;  %v791_v47 = vld [vmem:[%s10431_s29 + $0x70] sm:$0xff]  ;;  %v7456_v48 = vcombine.high %v797_v39, %v805_v41  ;;  %v7441_v49 = vcombine.low %v782_v36, %v790_v37  ;;  %v784_v50 = vld [vmem:[%s10431_s29 + $0x38] sm:$0xff]  ;;  %v7455_v53 = vcombine.low %v797_v39, %v805_v41 }
 0x202   : > { %981 = vmatpush1.bf16.msra.mxu0 %v7447_v16  ;;  %1024 = vmatpush1.bf16.msra.mxu1 %v7449_v22  ;;  %v806_v44 = vld [vmem:[%s10431_s29 + $0xe8] sm:$0xff]  ;;  %v792_v51 = vld [vmem:[%s10431_s29 + $0x78] sm:$0xff]  ;;  %v799_v54 = vld [vmem:[%s10431_s29 + $0xb0] sm:$0xff]  ;;  %v7444_v56 = vcombine.high %v783_v46, %v791_v47  ;;  %v7443_v61 = vcombine.low %v783_v46, %v791_v47 }
 0x203   : > { %1064 = vmatprep.subr.bf16.mxu0 %v7436_v19  ;;  %1107 = vmatprep.subr.bf16.mxu1 %v7438_v26  ;;  %v7458_v52 = vcombine.high %v798_v43, %v806_v44  ;;  %v807_v55 = vld [vmem:[%s10431_s29 + $0xf0] sm:$0xff]  ;;  %v7457_v57 = vcombine.low %v798_v43, %v806_v44  ;;  %v800_v58 = vld [vmem:[%s10431_s29 + $0xb8] sm:$0xff]  ;;  %v7446_v60 = vcombine.high %v784_v50, %v792_v51 }
 0x204   : > { %v808_v59 = vld [vmem:[%s10431_s29 + $0xf8] sm:$0xff]  ;;  %v7460_v62 = vcombine.high %v799_v54, %v807_v55  ;;  %v7445_v63 = vcombine.low %v784_v50, %v792_v51  ;;  %v8384_v1 = vld [vmem:[%s10445_s0 + $0x4] ss:$16 sps:$4 sm:$0xff]   ;;  %v7459_v2 = vcombine.low %v799_v54, %v807_v55  ;;  %v8382_v5 = vld [vmem:[%s10445_s0] ss:$16 sps:$4 sm:$0xff]  }
 0x205   : > { %7463 = vmatmul.mubr.msk.bf16.vlgmr.msra.gmra.mrb[0].mxu0 %vm974_vm0, %v10485_v25  ;;  %7464 = vmatmul.mubr.msk.bf16.vlgmr.msra.gmra.mrb[0].mxu1 %vm974_vm0, %v10485_v25  ;;  %v7462_v0 = vcombine.high %v800_v58, %v808_v59  ;;  %v8387_v3 = vld [vmem:[%s10445_s0 + $0xc] ss:$16 sps:$4 sm:$0xff]   ;;  %v7461_v4 = vcombine.low %v800_v58, %v808_v59  ;;  %v8390_v6 = vld [vmem:[%s10445_s0 + $0x24] ss:$16 sps:$4 sm:$0xff]   ;;  %v8385_v8 = vld [vmem:[%s10445_s0 + $0x8] ss:$16 sps:$4 sm:$0xff]  }
 0x206   : > { %1065 = vmatpush1.bf16.msra.mxu0 %v7435_v27  ;;  %1096 = vmatprep.mubr.bf16.mxu0 %v9911_v7  ;;  %v8393_v9 = vld [vmem:[%s10445_s0 + $0x2c] ss:$16 sps:$4 sm:$0xff]   ;;  %v8388_v10 = vld [vmem:[%s10445_s0 + $0x20] ss:$16 sps:$4 sm:$0xff]   ;;  %v8396_v11 = vld [vmem:[%s10445_s0 + $0x44] ss:$16 sps:$4 sm:$0xff]  }
 0x207   : > { %1066 = vmatprep.subr.bf16.mxu0 %v7452_v30  ;;  %1108 = vmatpush1.bf16.msra.mxu1 %v7437_v31  ;;  %v8399_v12 = vld [vmem:[%s10445_s0 + $0x4c] ss:$16 sps:$4 sm:$0xff]   ;;  %v8394_v13 = vld [vmem:[%s10445_s0 + $0x40] ss:$16 sps:$4 sm:$0xff]   ;;  %v8397_v14 = vld [vmem:[%s10445_s0 + $0x48] ss:$16 sps:$4 sm:$0xff]  }
 0x208   : > { %1139 = vmatprep.mubr.bf16.mxu1 %v9911_v7  ;;  %1109 = vmatprep.subr.bf16.mxu1 %v7454_v34  ;;  %v8402_v15 = vld [vmem:[%s10445_s0 + $0x64] ss:$16 sps:$4 sm:$0xff]   ;;  %v8405_v16 = vld [vmem:[%s10445_s0 + $0x6c] ss:$16 sps:$4 sm:$0xff]   ;;  %v8400_v17 = vld [vmem:[%s10445_s0 + $0x60] ss:$16 sps:$4 sm:$0xff]  }
 0x209   : > { %v8403_v18 = vld [vmem:[%s10445_s0 + $0x68] ss:$16 sps:$4 sm:$0xff]   ;;  %v8408_v19 = vld [vmem:[%s10445_s0 + $0x84] ss:$16 sps:$4 sm:$0xff]   ;;  %v8411_v20 = vld [vmem:[%s10445_s0 + $0x8c] ss:$16 sps:$4 sm:$0xff]  }
 0x20a   : > { %1067 = vmatpush1.bf16.msra.mxu0 %v7451_v35  ;;  %v8406_v21 = vld [vmem:[%s10445_s0 + $0x80] ss:$16 sps:$4 sm:$0xff]   ;;  %v8409_v22 = vld [vmem:[%s10445_s0 + $0x88] ss:$16 sps:$4 sm:$0xff]   ;;  %v8414_v23 = vld [vmem:[%s10445_s0 + $0xa4] ss:$16 sps:$4 sm:$0xff]  }
 0x20b   : > { %1150 = vmatprep.subr.bf16.mxu0 %v7440_v38  ;;  %1110 = vmatpush1.bf16.msra.mxu1 %v7453_v40  ;;  %v8417_v24 = vld [vmem:[%s10445_s0 + $0xac] ss:$16 sps:$4 sm:$0xff]   ;;  %v8415_v26 = vld [vmem:[%s10445_s0 + $0xa8] ss:$16 sps:$4 sm:$0xff]   ;;  %v8420_v27 = vld [vmem:[%s10445_s0 + $0xc4] ss:$16 sps:$4 sm:$0xff]  }
 0x20c   : > { %1193 = vmatprep.subr.bf16.mxu1 %v7442_v42  ;;  %v8423_v28 = vld [vmem:[%s10445_s0 + $0xcc] ss:$16 sps:$4 sm:$0xff]   ;;  %v8418_v29 = vld [vmem:[%s10445_s0 + $0xc0] ss:$16 sps:$4 sm:$0xff]   ;;  %v8421_v30 = vld [vmem:[%s10445_s0 + $0xc8] ss:$16 sps:$4 sm:$0xff]  }
 0x20d   : > { %7465 = vmatmul.mubr.msk.bf16.vlgmr.msra.gmra.mrb[4].mxu0 %vm974_vm0, %v10485_v25  ;;  %v8426_v31 = vld [vmem:[%s10445_s0 + $0xe4] ss:$16 sps:$4 sm:$0xff]   ;;  %v8429_v32 = vld [vmem:[%s10445_s0 + $0xec] ss:$16 sps:$4 sm:$0xff]   ;;  %v8424_v33 = vld [vmem:[%s10445_s0 + $0xe0] ss:$16 sps:$4 sm:$0xff]  }
 0x20e   : > { %1151 = vmatpush1.bf16.msra.mxu0 %v7439_v45  ;;  %1182 = vmatprep.mubr.bf16.mxu0 %v9911_v7  ;;  %v8427_v34 = vld [vmem:[%s10445_s0 + $0xe8] ss:$16 sps:$4 sm:$0xff]   ;;  %v8432_v35 = vld [vmem:[%s10445_s0 + $0x104] ss:$16 sps:$4 sm:$0xff]   ;;  %v8435_v36 = vld [vmem:[%s10445_s0 + $0x10c] ss:$16 sps:$4 sm:$0xff]  }
 0x20f   : > { %7466 = vmatmul.mubr.msk.bf16.vlgmr.msra.gmra.mrb[4].mxu1 %vm974_vm0, %v10485_v25  ;;  %1152 = vmatprep.subr.bf16.mxu0 %v7456_v48  ;;  %v8430_v37 = vld [vmem:[%s10445_s0 + $0x100] ss:$16 sps:$4 sm:$0xff]   ;;  %v8433_v38 = vld [vmem:[%s10445_s0 + $0x108] ss:$16 sps:$4 sm:$0xff]   ;;  %v8438_v39 = vld [vmem:[%s10445_s0 + $0x124] ss:$16 sps:$4 sm:$0xff]  }
 0x210   : > { %1194 = vmatpush1.bf16.msra.mxu1 %v7441_v49  ;;  %1225 = vmatprep.mubr.bf16.mxu1 %v9911_v7  ;;  %v8441_v40 = vld [vmem:[%s10445_s0 + $0x12c] ss:$16 sps:$4 sm:$0xff]   ;;  %v8436_v41 = vld [vmem:[%s10445_s0 + $0x120] ss:$16 sps:$4 sm:$0xff]   ;;  %v8439_v42 = vld [vmem:[%s10445_s0 + $0x128] ss:$16 sps:$4 sm:$0xff]  }
 0x211   : > { %1195 = vmatprep.subr.bf16.mxu1 %v7458_v52  ;;  %v8444_v43 = vld [vmem:[%s10445_s0 + $0x144] ss:$16 sps:$4 sm:$0xff]   ;;  %v8447_v44 = vld [vmem:[%s10445_s0 + $0x14c] ss:$16 sps:$4 sm:$0xff]   ;;  %v8442_v45 = vld [vmem:[%s10445_s0 + $0x140] ss:$16 sps:$4 sm:$0xff]  }
 0x212   : > { %1153 = vmatpush1.bf16.msra.mxu0 %v7455_v53  ;;  %v8445_v46 = vld [vmem:[%s10445_s0 + $0x148] ss:$16 sps:$4 sm:$0xff]   ;;  %v8450_v47 = vld [vmem:[%s10445_s0 + $0x164] ss:$16 sps:$4 sm:$0xff]   ;;  %v8453_v48 = vld [vmem:[%s10445_s0 + $0x16c] ss:$16 sps:$4 sm:$0xff]  }
 0x213   : > { %1236 = vmatprep.subr.bf16.mxu0 %v7444_v56  ;;  %v8448_v49 = vld [vmem:[%s10445_s0 + $0x160] ss:$16 sps:$4 sm:$0xff]   ;;  %v8451_v50 = vld [vmem:[%s10445_s0 + $0x168] ss:$16 sps:$4 sm:$0xff]   ;;  %v8456_v51 = vld [vmem:[%s10445_s0 + $0x184] ss:$16 sps:$4 sm:$0xff]  }
 0x214   : > { %1196 = vmatpush1.bf16.msra.mxu1 %v7457_v57  ;;  %v8459_v52 = vld [vmem:[%s10445_s0 + $0x18c] ss:$16 sps:$4 sm:$0xff]   ;;  %v8454_v53 = vld [vmem:[%s10445_s0 + $0x180] ss:$16 sps:$4 sm:$0xff]   ;;  %v8457_v54 = vld [vmem:[%s10445_s0 + $0x188] ss:$16 sps:$4 sm:$0xff]  }
 0x215   : > { %7467 = vmatmul.mubr.msk.bf16.vlgmr.msra.gmra.mrb[8].mxu0 %vm974_vm0, %v10485_v25  ;;  %1279 = vmatprep.subr.bf16.mxu1 %v7446_v60  ;;  %v8462_v55 = vld [vmem:[%s10445_s0 + $0x1a4] ss:$16 sps:$4 sm:$0xff]   ;;  %v8465_v56 = vld [vmem:[%s10445_s0 + $0x1ac] ss:$16 sps:$4 sm:$0xff]   ;;  %v8460_v57 = vld [vmem:[%s10445_s0 + $0x1a0] ss:$16 sps:$4 sm:$0xff]  }
 0x216   : > { %1237 = vmatpush1.bf16.msra.mxu0 %v7443_v61  ;;  %1268 = vmatprep.mubr.bf16.mxu0 %v9911_v7  ;;  %v8463_v58 = vld [vmem:[%s10445_s0 + $0x1a8] ss:$16 sps:$4 sm:$0xff]   ;;  %v8468_v59 = vld [vmem:[%s10445_s0 + $0x1c4] ss:$16 sps:$4 sm:$0xff]   ;;  %v8471_v60 = vld [vmem:[%s10445_s0 + $0x1cc] ss:$16 sps:$4 sm:$0xff]  }
 0x217   : > { %7468 = vmatmul.mubr.msk.bf16.vlgmr.msra.gmra.mrb[8].mxu1 %vm974_vm0, %v10485_v25  ;;  %1238 = vmatprep.subr.bf16.mxu0 %v7460_v62  ;;  %v8466_v61 = vld [vmem:[%s10445_s0 + $0x1c0] ss:$16 sps:$4 sm:$0xff]   ;;  %v8469_v62 = vld [vmem:[%s10445_s0 + $0x1c8] ss:$16 sps:$4 sm:$0xff]  }
 0x218   : > { %1280 = vmatpush1.bf16.msra.mxu1 %v7445_v63  ;;  %1311 = vmatprep.mubr.bf16.mxu1 %v9911_v7  ;;  %v8391_v7 = vld [vmem:[%s10445_s0 + $0x28] ss:$16 sps:$4 sm:$0xff]   ;;  %v8474_v63 = vld [vmem:[%s10445_s0 + $0x1e4] ss:$16 sps:$4 sm:$0xff]  }
 0x219   : > { %1281 = vmatprep.subr.bf16.mxu1 %v7462_v0  ;;  %v8477_v0 = vld [vmem:[%s10445_s0 + $0x1ec] ss:$16 sps:$4 sm:$0xff]  }
 0x21a   : > { %1239 = vmatpush1.bf16.msra.mxu0 %v7459_v2  ;;  %v8475_v2 = vld [vmem:[%s10445_s0 + $0x1e8] ss:$16 sps:$4 sm:$0xff]  }
 0x21b   : > { %5291 = vmatprep.subr.bf16.mxu0 %v8384_v1  ;;  %v8472_v1 = vld [vmem:[%s10445_s0 + $0x1e0] ss:$16 sps:$4 sm:$0xff]  }
 0x21c   : > { %1282 = vmatpush1.bf16.msra.mxu1 %v7461_v4  ;;  %v8483_v4 = vld [vmem:[%s10445_s0 + $0x20c] ss:$16 sps:$4 sm:$0xff]  }
 0x21d   : > { %7469 = vmatmul.mubr.msk.bf16.vlgmr.msra.gmra.mrb[12].mxu0 %vm974_vm0, %v10485_v25  ;;  %5635 = vmatprep.subr.bf16.mxu1 %v8387_v3  ;;  %v8480_v3 = vld [vmem:[%s10445_s0 + $0x204] ss:$16 sps:$4 sm:$0xff]  }
 0x21e   : > { %5292 = vmatpush1.bf16.msra.mxu0 %v8382_v5  ;;  %v1937_v5 = vlaneseq }
 0x21f   : > { %7470 = vmatmul.mubr.msk.bf16.vlgmr.msra.gmra.mrb[12].mxu1 %vm974_vm0, %v10485_v25  ;;  %5293 = vmatprep.subr.bf16.mxu0 %v8390_v6  ;;  %v8412_v25 = vld [vmem:[%s10445_s0 + $0xa0] ss:$16 sps:$4 sm:$0xff]  }
 0x220   : > { %5636 = vmatpush1.bf16.msra.mxu1 %v8385_v8  ;;  %v10593_v6 = vshrl.u32 %v1937_v5, 7 }
 0x221   : > { %5637 = vmatprep.subr.bf16.mxu1 %v8393_v9  ;;  %v10599_v9 = vld [vmem:[%s10437_s22] sm:$0xff] }
 0x222   : > { %5294 = vmatpush1.bf16.msra.mxu0 %v8388_v10  ;;  %v10596_v8 = vsub.s32 0, %v10593_v6  ;;  %v10602_v10 = vsub.s32 1, %v10593_v6 }
 0x223   : > { %5295 = vmatprep.subr.bf16.mxu0 %v8396_v11  ;;  %v10608_v11 = vsub.s32 2, %v10593_v6 }
 0x224   : > { %5638 = vmatpush1.bf16.msra.mxu1 %v8391_v7  ;;  %11928 = vst [vmem:[#allocation41_spill] sm:$0xff] %v10596_v8  ;;  %11929 = vst [vmem:[#allocation42_spill] sm:$0xff] %v10602_v10  ;;  %v10605_v7 = vld [vmem:[%s10439_s8] sm:$0xff] }
 0x225   : > { %5639 = vmatprep.subr.bf16.mxu1 %v8399_v12  ;;  %11930 = vst [vmem:[#allocation43_spill] sm:$0xff] %v10608_v11  ;;  %v10611_v12 = vsub.s32 3, %v10593_v6 }
 0x226   : > { %5296 = vmatpush1.bf16.msra.mxu0 %v8394_v13 }
 0x227   : > { %5297 = vmatprep.subr.bf16.mxu0 %v8402_v15  ;;  %11931 = vst [vmem:[#allocation44_spill] sm:$0xff] %v10611_v12 }
 0x228   : > { %5640 = vmatpush1.bf16.msra.mxu1 %v8397_v14  ;;  %v10617_v14 = vrot.slane %v10599_v9, %v10596_v8 }
 0x229   : > { %5641 = vmatprep.subr.bf16.mxu1 %v8405_v16  ;;  %v10622_v16 = vrot.slane %v10605_v7, %v10596_v8 }
 0x22a   : > { %5298 = vmatpush1.bf16.msra.mxu0 %v8400_v17 }
 0x22b   : > { %5299 = vmatprep.subr.bf16.mxu0 %v8408_v19  ;;  %v10632_v19 = vrot.slane %v10605_v7, %v10602_v10 }
 0x22c   : > { %5642 = vmatpush1.bf16.msra.mxu1 %v8403_v18  ;;  %v10628_v18 = vrot.slane %v10599_v9, %v10602_v10 }
 0x22d   : > { %5643 = vmatprep.subr.bf16.mxu1 %v8411_v20 }
 0x22e   : > { %5300 = vmatpush1.bf16.msra.mxu0 %v8406_v21 }
 0x22f   : > { %5301 = vmatprep.subr.bf16.mxu0 %v8414_v23  ;;  %v10641_v23 = vrot.slane %v10599_v9, %v10608_v11 }
 0x230   : > { %5644 = vmatpush1.bf16.msra.mxu1 %v8409_v22 }
 0x231   : > { %5645 = vmatprep.subr.bf16.mxu1 %v8417_v24  ;;  %v10645_v24 = vrot.slane %v10605_v7, %v10608_v11 }
 0x232   : > { %5302 = vmatpush1.bf16.msra.mxu0 %v8412_v25  ;;  %v10649_v25 = vrot.slane %v10599_v9, %v10611_v12 }
 0x233   : > { %5303 = vmatprep.subr.bf16.mxu0 %v8420_v27 }
 0x234   : > { %5646 = vmatpush1.bf16.msra.mxu1 %v8415_v26 }
 0x235   : > { %5647 = vmatprep.subr.bf16.mxu1 %v8423_v28 }
 0x236   : > { %5304 = vmatpush1.bf16.msra.mxu0 %v8418_v29 }
 0x237   : > { %5305 = vmatprep.subr.bf16.mxu0 %v8426_v31  ;;  %v10659_v31 = vsub.s32 4, %v10593_v6 }
 0x238   : > { %5648 = vmatpush1.bf16.msra.mxu1 %v8421_v30 }
 0x239   : > { %5649 = vmatprep.subr.bf16.mxu1 %v8429_v32 }
 0x23a   : > { %5306 = vmatpush1.bf16.msra.mxu0 %v8424_v33 }
 0x23b   : > { %5307 = vmatprep.subr.bf16.mxu0 %v8432_v35 }
 0x23c   : > { %5650 = vmatpush1.bf16.msra.mxu1 %v8427_v34 }
 0x23d   : > { %5651 = vmatprep.subr.bf16.mxu1 %v8435_v36  ;;  %v10668_v36 = vrot.slane %v10605_v7, %v10611_v12 }
 0x23e   : > { %5308 = vmatpush1.bf16.msra.mxu0 %v8430_v37 }
 0x23f   : > { %5309 = vmatprep.subr.bf16.mxu0 %v8438_v39 }
 0x240   : > { %5652 = vmatpush1.bf16.msra.mxu1 %v8433_v38 }
 0x241   : > { %5653 = vmatprep.subr.bf16.mxu1 %v8441_v40 }
 0x242   : > { %5310 = vmatpush1.bf16.msra.mxu0 %v8436_v41 }
 0x243   : > { %5311 = vmatprep.subr.bf16.mxu0 %v8444_v43 }
 0x244   : > { %5654 = vmatpush1.bf16.msra.mxu1 %v8439_v42 }
 0x245   : > { %5655 = vmatprep.subr.bf16.mxu1 %v8447_v44 }
 0x246   : > { %5312 = vmatpush1.bf16.msra.mxu0 %v8442_v45 }
 0x247   : > { %5313 = vmatprep.subr.bf16.mxu0 %v8450_v47 }
 0x248   : > { %5656 = vmatpush1.bf16.msra.mxu1 %v8445_v46 }
 0x249   : > { %5657 = vmatprep.subr.bf16.mxu1 %v8453_v48 }
 0x24a   : > { %5314 = vmatpush1.bf16.msra.mxu0 %v8448_v49 }
 0x24b   : > { %5315 = vmatprep.subr.bf16.mxu0 %v8456_v51 }
 0x24c   : > { %5658 = vmatpush1.bf16.msra.mxu1 %v8451_v50 }
 0x24d   : > { %5659 = vmatprep.subr.bf16.mxu1 %v8459_v52 }
 0x24e   : > { %5316 = vmatpush1.bf16.msra.mxu0 %v8454_v53 }
 0x24f   : > { %5317 = vmatprep.subr.bf16.mxu0 %v8462_v55 }
 0x250   : > { %5660 = vmatpush1.bf16.msra.mxu1 %v8457_v54 }
 0x251   : > { %5661 = vmatprep.subr.bf16.mxu1 %v8465_v56 }
 0x252   : > { %5318 = vmatpush1.bf16.msra.mxu0 %v8460_v57 }
 0x253   : > { %5319 = vmatprep.subr.bf16.mxu0 %v8468_v59 }
 0x254   : > { %5662 = vmatpush1.bf16.msra.mxu1 %v8463_v58 }
 0x255   : > { %5663 = vmatprep.subr.bf16.mxu1 %v8471_v60 }
 0x256   : > { %5320 = vmatpush1.bf16.msra.mxu0 %v8466_v61 }
 0x257   : > { %5321 = vmatprep.subr.bf16.mxu0 %v8474_v63 }
 0x258   : > { %5664 = vmatpush1.bf16.msra.mxu1 %v8469_v62 }
 0x259   : > { %5665 = vmatprep.subr.bf16.mxu1 %v8477_v0 }
 0x25a   : > { %5322 = vmatpush1.bf16.msra.mxu0 %v8472_v1 }
 0x25b   : > { %5334 = vmatprep.subr.bf16.mxu0 %v8480_v3 }
 0x25c   : > { %5666 = vmatpush1.bf16.msra.mxu1 %v8475_v2 }
 0x25d   : > { %5678 = vmatprep.subr.bf16.mxu1 %v8483_v4 }
 0x2d8   : > { %v10613_v13 = vpop.f32.mrb[0].mxu0  ;;  %v10637_v22 = vpop.f32.mrb[0].mxu1 }
 0x2d9   : > { %v1326_v15 = vrot.slane %v10613_v13, 4  ;;  %v10624_v17 = vpop.f32.mrb[1].mxu0  ;;  %v1338_v29 = vrot.slane %v10637_v22, 4  ;;  %v10656_v30 = vpop.f32.mrb[1].mxu1 }
 0x2da   : > { %v1332_v20 = vrot.slane %v10624_v17, 4  ;;  %v10635_v21 = vpop.f32.mrb[2].mxu0  ;;  %v1344_v34 = vrot.slane %v10656_v30, 4  ;;  %v10664_v35 = vpop.f32.mrb[2].mxu1 }
 0x2db   : > { %v1327_v26 = vadd.f32 %v1326_v15, %v10613_v13  ;;  %v1422_v27 = vrot.slane %v10635_v21, 4  ;;  %v10653_v28 = vpop.f32.mrb[3].mxu0  ;;  %v1339_v39 = vadd.f32 %v1338_v29, %v10637_v22  ;;  %v1434_v40 = vrot.slane %v10664_v35, 4  ;;  %v10673_v41 = vpop.f32.mrb[3].mxu1 }
 0x2dc   : > { %v1333_v32 = vadd.f32 %v1332_v20, %v10624_v17  ;;  %v1428_v33 = vrot.slane %v10653_v28, 4  ;;  %v1345_v44 = vadd.f32 %v1344_v34, %v10656_v30  ;;  %v1440_v45 = vrot.slane %v10673_v41, 4 }
 0x2dd   : > { %v1328_v37 = vrot.slane %v1327_v26, 2  ;;  %v1423_v38 = vadd.f32 %v1422_v27, %v10635_v21  ;;  %v1340_v48 = vrot.slane %v1339_v39, 2  ;;  %v1435_v49 = vadd.f32 %v1434_v40, %v10664_v35 }
 0x2de   : > { %v1334_v42 = vrot.slane %v1333_v32, 2  ;;  %v1429_v43 = vadd.f32 %v1428_v33, %v10653_v28  ;;  %v1346_v52 = vrot.slane %v1345_v44, 2  ;;  %v1441_v53 = vadd.f32 %v1440_v45, %v10673_v41 }
 0x2df   : > { %v1329_v46 = vadd.f32 %v1328_v37, %v1327_v26  ;;  %v1424_v47 = vrot.slane %v1423_v38, 2  ;;  %v1341_v57 = vadd.f32 %v1340_v48, %v1339_v39  ;;  %v1436_v58 = vrot.slane %v1435_v49, 2 }
 0x2e0   : > { %v1335_v50 = vadd.f32 %v1334_v42, %v1333_v32  ;;  %v1430_v51 = vrot.slane %v1429_v43, 2  ;;  %v10680_v54 = vpop.f32.mrb[4].mxu0  ;;  %v1347_v62 = vadd.f32 %v1346_v52, %v1345_v44  ;;  %v1442_v63 = vrot.slane %v1441_v53, 2 }
 0x2e1   : > { %v1330_v55 = vrot.slane %v1329_v46, 1  ;;  %v1425_v56 = vadd.f32 %v1424_v47, %v1423_v38  ;;  %v10682_v59 = vpop.f32.mrb[5].mxu0  ;;  %v1342_v3 = vrot.slane %v1341_v57, 1  ;;  %v1437_v4 = vadd.f32 %v1436_v58, %v1435_v49 }
 0x2e2   : > { %v1336_v60 = vrot.slane %v1335_v50, 1  ;;  %v1431_v61 = vadd.f32 %v1430_v51, %v1429_v43  ;;  %v10684_v0 = vpop.f32.mrb[6].mxu0  ;;  %v1348_v26 = vrot.slane %v1347_v62, 1  ;;  %v1443_v27 = vadd.f32 %v1442_v63, %v1441_v53  ;;  %v10702_v53 = vpop.f32.mrb[4].mxu1 }
 0x2e3   : > { %v1331_v1 = vadd.f32 %v1330_v55, %v1329_v46  ;;  %v1426_v2 = vrot.slane %v1425_v56, 1  ;;  %v10686_v5 = vpop.f32.mrb[7].mxu0  ;;  %v1343_v33 = vadd.f32 %v1342_v3, %v1341_v57  ;;  %v1438_v34 = vrot.slane %v1437_v4, 1  ;;  %v10712_v58 = vpop.f32.mrb[5].mxu1 }
 0x2e4   : > { %v1337_v15 = vadd.f32 %v1336_v60, %v1335_v50  ;;  %v1432_v20 = vrot.slane %v1431_v61, 1  ;;  %v1349_v39 = vadd.f32 %v1348_v26, %v1347_v62  ;;  %v1444_v40 = vrot.slane %v1443_v27, 1  ;;  %v10721_v62 = vpop.f32.mrb[6].mxu1 }
 0x2e5   : > { %v1519_v29 = vmul.f32 0.125, %v1331_v1  ;;  %v1427_v32 = vadd.f32 %v1426_v2, %v1425_v56  ;;  %v1521_v44 = vmul.f32 0.125, %v1343_v33  ;;  %v1439_v45 = vadd.f32 %v1438_v34, %v1437_v4  ;;  %v10730_v2 = vpop.f32.mrb[7].mxu1 }
 0x2e6   : > { %v1520_v37 = vmul.f32 0.125, %v1337_v15  ;;  %v1433_v38 = vadd.f32 %v1432_v20, %v1431_v61  ;;  %v1522_v48 = vmul.f32 0.125, %v1349_v39  ;;  %v1445_v49 = vadd.f32 %v1444_v40, %v1443_v27 }
 0x2e7   : > { %v10689_v42 = vsub.f32 %v10613_v13, %v1519_v29  ;;  %v1535_v43 = vmul.f32 0.125, %v1427_v32  ;;  %v10700_v52 = vsub.f32 %v10637_v22, %v1521_v44  ;;  %v1537_v13 = vmul.f32 0.125, %v1439_v45 }
 0x2e8   : > { %v10692_v46 = vsub.f32 %v10624_v17, %v1520_v37  ;;  %v1536_v47 = vmul.f32 0.125, %v1433_v38  ;;  %v10710_v56 = vsub.f32 %v10656_v30, %v1522_v48  ;;  %v1538_v57 = vmul.f32 0.125, %v1445_v49  ;;  %v10736_v48 = vpop.f32.mrb[8].mxu0 }
 0x2e9   : > { %v1583_v50 = vmul.f32 %v10689_v42, %v10689_v42  ;;  %v10697_v51 = vsub.f32 %v10635_v21, %v1535_v43  ;;  %v1585_v60 = vmul.f32 %v10700_v52, %v10700_v52  ;;  %v10719_v61 = vsub.f32 %v10664_v35, %v1537_v13 }
 0x2ea   : > { %v1584_v55 = vmul.f32 %v10692_v46, %v10692_v46  ;;  %v10707_v17 = vsub.f32 %v10653_v28, %v1536_v47  ;;  %v1586_v63 = vmul.f32 %v10710_v56, %v10710_v56  ;;  %v10728_v1 = vsub.f32 %v10673_v41, %v1538_v57  ;;  %v10738_v49 = vpop.f32.mrb[8].mxu1 }
 0x2eb   : > { %v1615_v21 = vrot.slane %v1583_v50, 4  ;;  %v1599_v22 = vmul.f32 %v10697_v51, %v10697_v51  ;;  %v1627_v15 = vrot.slane %v1585_v60, 4  ;;  %v1601_v35 = vmul.f32 %v10719_v61, %v10719_v61 }
 0x2ec   : > { %v1621_v28 = vrot.slane %v1584_v55, 4  ;;  %v1600_v30 = vmul.f32 %v10707_v17, %v10707_v17  ;;  %v1633_v27 = vrot.slane %v1586_v63, 4  ;;  %v1602_v29 = vmul.f32 %v10728_v1, %v10728_v1 }
 0x2ed   : > { %v1616_v3 = vadd.f32 %v1615_v21, %v1583_v50  ;;  %v1711_v4 = vrot.slane %v1599_v22, 4  ;;  %v1628_v34 = vadd.f32 %v1627_v15, %v1585_v60  ;;  %v1723_v37 = vrot.slane %v1601_v35, 4  ;;  %v10740_v21 = vpop.f32.mrb[9].mxu0 }
 0x2ee   : > { %v1622_v20 = vadd.f32 %v1621_v28, %v1584_v55  ;;  %v1717_v26 = vrot.slane %v1600_v30, 4  ;;  %v1634_v39 = vadd.f32 %v1633_v27, %v1586_v63  ;;  %v1729_v40 = vrot.slane %v1602_v29, 4 }
 0x2ef   : > { %v1617_v32 = vrot.slane %v1616_v3, 2  ;;  %v1712_v33 = vadd.f32 %v1711_v4, %v1599_v22  ;;  %v1629_v45 = vrot.slane %v1628_v34, 2  ;;  %v1724_v47 = vadd.f32 %v1723_v37, %v1601_v35  ;;  %v10742_v22 = vpop.f32.mrb[9].mxu1 }
 0x2f0   : > { %v1623_v41 = vrot.slane %v1622_v20, 2  ;;  %v1718_v38 = vadd.f32 %v1717_v26, %v1600_v30  ;;  %v1635_v55 = vrot.slane %v1634_v39, 2  ;;  %v1730_v57 = vadd.f32 %v1729_v40, %v1602_v29  ;;  %11932 = vst [vmem:[#allocation45_spill] sm:$0xff] %v10742_v22  ;;  %v10746_v4 = vpop.f32.mrb[10].mxu1 }
 0x2f1   : > { %v1618_v43 = vadd.f32 %v1617_v32, %v1616_v3  ;;  %v1713_v44 = vrot.slane %v1712_v33, 2  ;;  %v1630_v30 = vadd.f32 %v1629_v45, %v1628_v34  ;;  %v1725_v63 = vrot.slane %v1724_v47, 2  ;;  %v10744_v3 = vpop.f32.mrb[10].mxu0  ;;  %11934 = vst [vmem:[#allocation47_spill] sm:$0xff] %v10746_v4  ;;  %v10750_v40 = vpop.f32.mrb[11].mxu1 }
 0x2f2   : > { %v1624_v50 = vadd.f32 %v1623_v41, %v1622_v20  ;;  %v1719_v13 = vrot.slane %v1718_v38, 2  ;;  %11933 = vst [vmem:[#allocation46_spill] sm:$0xff] %v10744_v3  ;;  %v1636_v26 = vadd.f32 %v1635_v55, %v1634_v39  ;;  %v1731_v27 = vrot.slane %v1730_v57, 2  ;;  %v10748_v41 = vpop.f32.mrb[11].mxu0  ;;  %11936 = vst [vmem:[#allocation49_spill] sm:$0xff] %v10750_v40  ;;  %v10754_v11 = vpop.f32.mrb[12].mxu1 }
 0x2f3   : > { %v1619_v60 = vrot.slane %v1618_v43, 1  ;;  %v1714_v28 = vadd.f32 %v1713_v44, %v1712_v33  ;;  %v1631_v37 = vrot.slane %v1630_v30, 1  ;;  %v1726_v29 = vadd.f32 %v1725_v63, %v1724_v47  ;;  %11935 = vst [vmem:[#allocation48_spill] sm:$0xff] %v10748_v41  ;;  %v10752_v63 = vpop.f32.mrb[12].mxu0 }
 0x2f4   : > { %v1625_v15 = vrot.slane %v1624_v50, 1  ;;  %v1720_v35 = vadd.f32 %v1719_v13, %v1718_v38  ;;  %v1637_v34 = vrot.slane %v1636_v26, 1  ;;  %v1732_v44 = vadd.f32 %v1731_v27, %v1730_v57 }
 0x2f5   : > { %v1620_v20 = vadd.f32 %v1619_v60, %v1618_v43  ;;  %v1715_v32 = vrot.slane %v1714_v28, 1  ;;  %v1632_v3 = vadd.f32 %v1631_v37, %v1630_v30  ;;  %v1727_v4 = vrot.slane %v1726_v29, 1 }
 0x2f6   : > { %v1626_v12 = vadd.f32 %v1625_v15, %v1624_v50  ;;  %v1721_v33 = vrot.slane %v1720_v35, 1  ;;  %v1638_v39 = vadd.f32 %v1637_v34, %v1636_v26  ;;  %v1733_v13 = vrot.slane %v1732_v44, 1 }
 0x2f7   : > { %v1807_v45 = vmul.f32 0.125, %v1620_v20  ;;  %v1716_v10 = vadd.f32 %v1715_v32, %v1714_v28  ;;  %v1809_v60 = vmul.f32 0.125, %v1632_v3  ;;  %v1728_v47 = vadd.f32 %v1727_v4, %v1726_v29  ;;  %v10758_v3 = vpop.f32.mrb[13].mxu1 }
 0x2f8   : > { %v1808_v22 = vmul.f32 0.125, %v1626_v12  ;;  %v1722_v38 = vadd.f32 %v1721_v33, %v1720_v35  ;;  %v1810_v50 = vmul.f32 0.125, %v1638_v39  ;;  %v1734_v15 = vadd.f32 %v1733_v13, %v1732_v44  ;;  %v10756_v12 = vpop.f32.mrb[13].mxu0  ;;  %11938 = vst [vmem:[#allocation51_spill] sm:$0xff] %v10758_v3  ;;  %v10764_v32 = vpop.f32.mrb[14].mxu1 }
 0x2f9   : > { %v1839_v43 = vadd.f32 1e-05, %v1807_v45  ;;  %v1823_v55 = vmul.f32 0.125, %v1716_v10  ;;  %v1841_v28 = vadd.f32 1e-05, %v1809_v60  ;;  %v1825_v30 = vmul.f32 0.125, %v1728_v47 }
 0x2fa   : > { %v1840_v41 = vadd.f32 1e-05, %v1808_v22  ;;  %v1824_v40 = vmul.f32 0.125, %v1722_v38  ;;  %11937 = vst [vmem:[#allocation50_spill] sm:$0xff] %v10756_v12  ;;  %v1842_v26 = vadd.f32 1e-05, %v1810_v50 }
 0x2fb   : > { %9150 = vrsqrt.f32 %v1839_v43  ;;  %v1855_v57 = vadd.f32 1e-05, %v1823_v55  ;;  %v1826_v10 = vmul.f32 0.125, %v1734_v15  ;;  %v1857_v4 = vadd.f32 1e-05, %v1825_v30  ;;  %v10762_v20 = vpop.f32.mrb[14].mxu0 }
 0x2fc   : > { %9152 = vrsqrt.f32 %v1840_v41  ;;  %v1856_v35 = vadd.f32 1e-05, %v1824_v40  ;;  %v1350_v22 = vrot.slane %v10680_v54, 4  ;;  %v1356_v27 = vrot.slane %v10682_v59, 4  ;;  %11939 = vst [vmem:[#allocation52_spill] sm:$0xff] %v10762_v20  ;;  %11940 = vst [vmem:[#allocation53_spill] sm:$0xff] %v10764_v32 }
 0x2fd   : > { %9154 = vrsqrt.f32 %v1855_v57  ;;  %v1858_v37 = vadd.f32 1e-05, %v1826_v10  ;;  %v1446_v29 = vrot.slane %v10684_v0, 4  ;;  %v1452_v41 = vrot.slane %v10686_v5, 4  ;;  %v10776_v39 = vpop.f32.mrb[15].mxu0  ;;  %v10778_v13 = vpop.f32.mrb[15].mxu1 }
 0x2fe   : > { %9156 = vrsqrt.f32 %v1856_v35  ;;  %v1351_v40 = vadd.f32 %v1350_v22, %v10680_v54  ;;  %v1357_v33 = vadd.f32 %v1356_v27, %v10682_v59  ;;  %v10771_v34 = vsub.s32 5, %v10593_v6  ;;  %11942 = vst [vmem:[#allocation55_spill] sm:$0xff] %v10776_v39  ;;  %11943 = vst [vmem:[#allocation56_spill] sm:$0xff] %v10778_v13 }
 0x2ff   : > { %9158 = vrsqrt.f32 %v1841_v28  ;;  %v1447_v44 = vadd.f32 %v1446_v29, %v10684_v0  ;;  %v1453_v45 = vadd.f32 %v1452_v41, %v10686_v5  ;;  %v1362_v38 = vrot.slane %v10702_v53, 4 }
 0x300   : > { %11941 = vst [vmem:[#allocation54_spill] sm:$0xff] %v10771_v34  ;;  %9160 = vrsqrt.f32 %v1842_v26  ;;  %v1352_v43 = vrot.slane %v1351_v40, 2  ;;  %v10782_v55 = vrot.slane %v10599_v9, %v10659_v31  ;;  %v1358_v60 = vrot.slane %v1357_v33, 2 }
 0x301   : > { %9162 = vrsqrt.f32 %v1857_v4  ;;  %v1448_v47 = vrot.slane %v1447_v44, 2  ;;  %v1454_v50 = vrot.slane %v1453_v45, 2  ;;  %v1363_v15 = vadd.f32 %v1362_v38, %v10702_v53 }
 0x302   : > { %9164 = vrsqrt.f32 %v1858_v37  ;;  %v1353_v57 = vadd.f32 %v1352_v43, %v1351_v40  ;;  %v10787_v28 = vrot.slane %v10605_v7, %v10659_v31  ;;  %v1359_v30 = vadd.f32 %v1358_v60, %v1357_v33 }
 0x303   : > { %v10791_v35 = vrot.slane %v10599_v9, %v10771_v34  ;;  %v1449_v26 = vadd.f32 %v1448_v47, %v1447_v44  ;;  %v1455_v10 = vadd.f32 %v1454_v50, %v1453_v45  ;;  %v1364_v4 = vrot.slane %v1363_v15, 2 }
 0x304   : > { %v1368_v22 = vrot.slane %v10712_v58, 4  ;;  %v1354_v37 = vrot.slane %v1353_v57, 1  ;;  %v1360_v29 = vrot.slane %v1359_v30, 1  ;;  %v10796_v41 = vrot.slane %v10605_v7, %v10771_v34 }
 0x305   : > { %v9151_v27 = vpop.eup %9150  ;;  %v1450_v43 = vrot.slane %v1449_v26, 1  ;;  %v1456_v60 = vrot.slane %v1455_v10, 1  ;;  %v10800_v13 = vadd.f32 %v1364_v4, %v1363_v15 }
 0x306   : > { %v9153_v38 = vpop.eup %9152  ;;  %v1903_v33 = vmul.f32 %v9151_v27, %v10689_v42  ;;  %v1355_v47 = vadd.f32 %v1354_v37, %v1353_v57  ;;  %v1361_v50 = vadd.f32 %v1360_v29, %v1359_v30  ;;  %v10804_v39 = vadd.f32 %v1368_v22, %v10712_v58 }
 0x307   : > { %v9155_v44 = vpop.eup %9154  ;;  %v1904_v45 = vmul.f32 %v9153_v38, %v10692_v46  ;;  %v1451_v20 = vadd.f32 %v1450_v43, %v1449_v26  ;;  %v1457_v3 = vadd.f32 %v1456_v60, %v1455_v10 }
 0x308   : > { %v9157_v32 = vpop.eup %9156  ;;  %v2017_v34 = vmul.f32 %v10617_v14, %v1903_v33  ;;  %v1919_v40 = vmul.f32 %v9155_v44, %v10697_v51  ;;  %v1523_v4 = vmul.f32 0.125, %v1355_v47  ;;  %v1524_v12 = vmul.f32 0.125, %v1361_v50 }
 0x309   : > { %v9159_v42 = vpop.eup %9158  ;;  %v2018_v27 = vmul.f32 %v10628_v18, %v1904_v45  ;;  %v1920_v15 = vmul.f32 %v9157_v32, %v10707_v17  ;;  %v1539_v37 = vmul.f32 0.125, %v1451_v20 }
 0x30a   : > { %v9161_v46 = vpop.eup %9160  ;;  %v2131_v57 = vadd.f32 %v10622_v16, %v2017_v34  ;;  %v2033_v30 = vmul.f32 %v10617_v14, %v1919_v40  ;;  %v1905_v22 = vmul.f32 %v9159_v42, %v10700_v52  ;;  %v10817_v38 = vsub.f32 %v10680_v54, %v1523_v4  ;;  %v8478_v42 = vld [vmem:[%s10445_s0 + $0x200] ss:$16 sps:$4 sm:$0xff]  }
 0x30b   : > { %v9163_v29 = vpop.eup %9162  ;;  %v2034_v51 = vmul.f32 %v10628_v18, %v1920_v15  ;;  %v1906_v26 = vmul.f32 %v9161_v46, %v10710_v56  ;;  %v2132_v10 = vadd.f32 %v10632_v19, %v2018_v27  ;;  %v10832_v44 = vsub.f32 %v10682_v59, %v1524_v12  ;;  %v8481_v27 = vld [vmem:[%s10445_s0 + $0x208] ss:$16 sps:$4 sm:$0xff]   ;;  %v8486_v46 = vld [vmem:[%s10445_s0 + $0x224] ss:$16 sps:$4 sm:$0xff]  }
 0x30c   : > { %v9165_v17 = vpop.eup %9164  ;;  %v2147_v32 = vadd.f32 %v10622_v16, %v2033_v30  ;;  %v2019_v34 = vmul.f32 %v10641_v23, %v1905_v22  ;;  %v1921_v14 = vmul.f32 %v9163_v29, %v10719_v61  ;;  %v2163_v40 = vmax.f32 %v2131_v57, 0.0  ;;  %v8489_v57 = vld [vmem:[%s10445_s0 + $0x22c] ss:$16 sps:$4 sm:$0xff]  }
 0x30d   : > { %v2020_v52 = vmul.f32 %v10649_v25, %v1906_v26  ;;  %v1922_v20 = vmul.f32 %v9165_v17, %v10728_v1  ;;  %v2148_v18 = vadd.f32 %v10632_v19, %v2034_v51  ;;  %v2164_v56 = vmax.f32 %v2132_v10, 0.0  ;;  %v8484_v10 = vld [vmem:[%s10445_s0 + $0x220] ss:$16 sps:$4 sm:$0xff]   ;;  %v8487_v17 = vld [vmem:[%s10445_s0 + $0x228] ss:$16 sps:$4 sm:$0xff]  }
 0x30e   : > { %v2133_v54 = vadd.f32 %v10645_v24, %v2019_v34  ;;  %v2035_v33 = vmul.f32 %v10641_v23, %v1921_v14  ;;  %v2179_v43 = vmax.f32 %v2147_v32, 0.0  ;;  %v1587_v16 = vmul.f32 %v10817_v38, %v10817_v38 }
 0x30f   : > { %v2036_v61 = vmul.f32 %v10649_v25, %v1922_v20  ;;  %v2180_v60 = vmax.f32 %v2148_v18, 0.0  ;;  %v2134_v1 = vadd.f32 %v10668_v36, %v2020_v52  ;;  %v10836_v23 = vsub.f32 %v10684_v0, %v1539_v37  ;;  %v8492_v52 = vld [vmem:[%s10445_s0 + $0x244] ss:$16 sps:$4 sm:$0xff]   ;;  %v8495_v20 = vld [vmem:[%s10445_s0 + $0x24c] ss:$16 sps:$4 sm:$0xff]  }
 0x310   : > { %v2149_v19 = vadd.f32 %v10645_v24, %v2035_v33  ;;  %v2203_v45 = vpack.c.bf16 %v2179_v43, %v2163_v40  ;;  %v1639_v47 = vrot.slane %v1587_v16, 4  ;;  %v1588_v25 = vmul.f32 %v10832_v44, %v10832_v44 }
 0x311   : > { %v2204_v50 = vpack.c.bf16 %v2180_v60, %v2164_v56  ;;  %v2150_v15 = vadd.f32 %v10668_v36, %v2036_v61  ;;  %v2166_v4 = vmax.f32 %v2134_v1, 0.0  ;;  %v1603_v24 = vmul.f32 %v10836_v23, %v10836_v23 }
 0x312   : > { %v1640_v59 = vadd.f32 %v1639_v47, %v1587_v16  ;;  %v1540_v12 = vmul.f32 0.125, %v1457_v3  ;;  %v2165_v30 = vmax.f32 %v2133_v54, 0.0  ;;  %v1645_v22 = vrot.slane %v1588_v25, 4 }
 0x313   : > { %5323 = vmatprep.mubr.bf16.mxu0 %v2204_v50  ;;  %5667 = vmatprep.mubr.bf16.mxu1 %v2204_v50  ;;  %v2182_v0 = vmax.f32 %v2150_v15, 0.0  ;;  %v2181_v37 = vmax.f32 %v2149_v19, 0.0  ;;  %v1366_v36 = vrot.slane %v10800_v13, 1  ;;  %v1735_v51 = vrot.slane %v1603_v24, 4  ;;  %v8490_v50 = vld [vmem:[%s10445_s0 + $0x240] ss:$16 sps:$4 sm:$0xff]  }
 0x314   : > { %5324 = vmatmul.mubr.bf16.vlgmr.msra.gmra.mrb[16].mxu0 %v2203_v45  ;;  %5668 = vmatmul.mubr.bf16.vlgmr.msra.gmra.mrb[16].mxu1 %v2203_v45  ;;  %v1641_v29 = vrot.slane %v1640_v59, 2  ;;  %v10849_v26 = vsub.f32 %v10686_v5, %v1540_v12  ;;  %v1370_v3 = vrot.slane %v10804_v39, 2  ;;  %v1646_v34 = vadd.f32 %v1645_v22, %v1588_v25  ;;  %v8501_v25 = vld [vmem:[%s10445_s0 + $0x26c] ss:$16 sps:$4 sm:$0xff]  }
 0x315   : > { %5335 = vmatpush1.bf16.msra.mxu0 %v8478_v42  ;;  %5679 = vmatpush1.bf16.msra.mxu1 %v8481_v27  ;;  %v2206_v32 = vpack.c.bf16 %v2182_v0, %v2166_v4  ;;  %v10854_v14 = vpack.c.bf16 %v2181_v37, %v2165_v30  ;;  %v1464_v40 = vrot.slane %v10730_v2, 4  ;;  %v1736_v5 = vadd.f32 %v1735_v51, %v1603_v24  ;;  %v8493_v42 = vld [vmem:[%s10445_s0 + $0x248] ss:$16 sps:$4 sm:$0xff]   ;;  %v8498_v4 = vld [vmem:[%s10445_s0 + $0x264] ss:$16 sps:$4 sm:$0xff]  }
 0x316   : > { %5336 = vmatprep.subr.bf16.mxu0 %v8486_v46  ;;  %5680 = vmatprep.subr.bf16.mxu1 %v8489_v57  ;;  %v1642_v18 = vadd.f32 %v1641_v29, %v1640_v59  ;;  %v1604_v56 = vmul.f32 %v10849_v26, %v10849_v26  ;;  %v10862_v54 = vsub.s32 6, %v10593_v6  ;;  %v1647_v33 = vrot.slane %v1646_v34, 2  ;;  %v8496_v37 = vld [vmem:[%s10445_s0 + $0x260] ss:$16 sps:$4 sm:$0xff]  }
 0x317   : > { %5366 = vmatprep.mubr.bf16.mxu0 %v2206_v32  ;;  %5710 = vmatprep.mubr.bf16.mxu1 %v2206_v32  ;;  %v1367_v43 = vadd.f32 %v1366_v36, %v10800_v13  ;;  %v1371_v16 = vadd.f32 %v1370_v3, %v10804_v39  ;;  %v1374_v61 = vrot.slane %v10736_v48, 4  ;;  %v1737_v1 = vrot.slane %v1736_v5, 2 }
 0x318   : > { %v1643_v60 = vrot.slane %v1642_v18, 1  ;;  %v1741_v19 = vrot.slane %v1604_v56, 4  ;;  %v11944_v45 = vrot.slane %v10721_v62, 4  ;;  %v1648_v27 = vadd.f32 %v1647_v33, %v1646_v34 }
 0x319   : > { %5337 = vmatpush1.bf16.msra.mxu0 %v8484_v10  ;;  %5681 = vmatpush1.bf16.msra.mxu1 %v8487_v17  ;;  %v1525_v13 = vmul.f32 0.125, %v1367_v43  ;;  %v1372_v15 = vrot.slane %v1371_v16, 1  ;;  %v1465_v39 = vadd.f32 %v1464_v40, %v10730_v2  ;;  %v1738_v57 = vadd.f32 %v1737_v1, %v1736_v5  ;;  %v8499_v10 = vld [vmem:[%s10445_s0 + $0x268] ss:$16 sps:$4 sm:$0xff]   ;;  %v8504_v17 = vld [vmem:[%s10445_s0 + $0x284] ss:$16 sps:$4 sm:$0xff]  }
 0x31a   : > { %v1459_v47 = vadd.f32 %v11944_v45, %v10721_v62  ;;  %5338 = vmatprep.subr.bf16.mxu0 %v8492_v52  ;;  %5682 = vmatprep.subr.bf16.mxu1 %v8495_v20  ;;  %v1644_v46 = vadd.f32 %v1643_v60, %v1642_v18  ;;  %v1742_v59 = vadd.f32 %v1741_v19, %v1604_v56  ;;  %v1649_v12 = vrot.slane %v1648_v27, 1  ;;  %v8507_v52 = vld [vmem:[%s10445_s0 + $0x28c] ss:$16 sps:$4 sm:$0xff]   ;;  %v8502_v1 = vld [vmem:[%s10445_s0 + $0x280] ss:$16 sps:$4 sm:$0xff]  }
 0x31b   : > { %v10876_v30 = vsub.f32 %v10702_v53, %v1525_v13  ;;  %v1373_v0 = vadd.f32 %v1372_v15, %v1371_v16  ;;  %v1466_v22 = vrot.slane %v1465_v39, 2  ;;  %v1739_v29 = vrot.slane %v1738_v57, 1 }
 0x31c   : > { %v1460_v24 = vrot.slane %v1459_v47, 2  ;;  %v1811_v36 = vmul.f32 0.125, %v1644_v46  ;;  %v1743_v51 = vrot.slane %v1742_v59, 2  ;;  %v1650_v32 = vadd.f32 %v1649_v12, %v1648_v27 }
 0x31d   : > { %5339 = vmatpush1.bf16.msra.mxu0 %v8490_v50  ;;  %5683 = vmatpush1.bf16.msra.mxu1 %v8493_v42  ;;  %v1589_v34 = vmul.f32 %v10876_v30, %v10876_v30  ;;  %v1526_v40 = vmul.f32 0.125, %v1373_v0  ;;  %v1467_v53 = vadd.f32 %v1466_v22, %v1465_v39  ;;  %v1740_v18 = vadd.f32 %v1739_v29, %v1738_v57  ;;  %v8505_v50 = vld [vmem:[%s10445_s0 + $0x288] ss:$16 sps:$4 sm:$0xff]   ;;  %v8510_v42 = vld [vmem:[%s10445_s0 + $0x2a4] ss:$16 sps:$4 sm:$0xff]  }
 0x31e   : > { %v1461_v3 = vadd.f32 %v1460_v24, %v1459_v47  ;;  %5340 = vmatprep.subr.bf16.mxu0 %v8498_v4  ;;  %5684 = vmatprep.subr.bf16.mxu1 %v8501_v25  ;;  %v1843_v20 = vadd.f32 1e-05, %v1811_v36  ;;  %v1744_v5 = vadd.f32 %v1743_v51, %v1742_v59  ;;  %v1812_v33 = vmul.f32 0.125, %v1650_v32  ;;  %v8508_v0 = vld [vmem:[%s10445_s0 + $0x2a0] ss:$16 sps:$4 sm:$0xff]  }
 0x31f   : > { %v1651_v43 = vrot.slane %v1589_v34, 4  ;;  %v10885_v16 = vsub.f32 %v10712_v58, %v1526_v40  ;;  %v1468_v60 = vrot.slane %v1467_v53, 1  ;;  %v1827_v19 = vmul.f32 0.125, %v1740_v18  ;;  %v8513_v58 = vld [vmem:[%s10445_s0 + $0x2ac] ss:$16 sps:$4 sm:$0xff]  }
 0x320   : > { %v1462_v56 = vrot.slane %v1461_v3, 1  ;;  %9166 = vrsqrt.f32 %v1843_v20  ;;  %v1745_v45 = vrot.slane %v1744_v5, 1  ;;  %v1844_v27 = vadd.f32 1e-05, %v1812_v33  ;;  %v8511_v29 = vld [vmem:[%s10445_s0 + $0x2a8] ss:$16 sps:$4 sm:$0xff]  }
 0x321   : > { %5341 = vmatpush1.bf16.msra.mxu0 %v8496_v37  ;;  %5685 = vmatpush1.bf16.msra.mxu1 %v8499_v10  ;;  %v1652_v13 = vadd.f32 %v1651_v43, %v1589_v34  ;;  %v1590_v15 = vmul.f32 %v10885_v16, %v10885_v16  ;;  %v1469_v39 = vadd.f32 %v1468_v60, %v1467_v53  ;;  %v1859_v4 = vadd.f32 1e-05, %v1827_v19  ;;  %v8516_v51 = vld [vmem:[%s10445_s0 + $0x2c4] ss:$16 sps:$4 sm:$0xff]   ;;  %v8519_v32 = vld [vmem:[%s10445_s0 + $0x2cc] ss:$16 sps:$4 sm:$0xff]  }
 0x322   : > { %v1463_v47 = vadd.f32 %v1462_v56, %v1461_v3  ;;  %5342 = vmatprep.subr.bf16.mxu0 %v8504_v17  ;;  %5686 = vmatprep.subr.bf16.mxu1 %v8507_v52  ;;  %v1746_v25 = vadd.f32 %v1745_v45, %v1744_v5  ;;  %v1375_v57 = vadd.f32 %v1374_v61, %v10736_v48  ;;  %9168 = vrsqrt.f32 %v1844_v27  ;;  %v10919_v56 = vld [vmem:[%s10437_s22 + $0x8] sm:$0xff]  ;;  %v8514_v43 = vld [vmem:[%s10445_s0 + $0x2c0] ss:$16 sps:$4 sm:$0xff]  }
 0x323   : > { %v1653_v59 = vrot.slane %v1652_v13, 2  ;;  %v1657_v24 = vrot.slane %v1590_v15, 4  ;;  %v1542_v12 = vmul.f32 0.125, %v1469_v39  ;;  %9170 = vrsqrt.f32 %v1859_v4  ;;  %v8517_v60 = vld [vmem:[%s10445_s0 + $0x2c8] ss:$16 sps:$4 sm:$0xff]  }
 0x324   : > { %v1541_v46 = vmul.f32 0.125, %v1463_v47  ;;  %v1828_v22 = vmul.f32 0.125, %v1746_v25  ;;  %v1376_v36 = vrot.slane %v1375_v57, 2  ;;  %v1386_v17 = vrot.slane %v10738_v49, 4  ;;  %v8525_v27 = vld [vmem:[%s10445_s0 + $0x2ec] ss:$16 sps:$4 sm:$0xff]  }
 0x325   : > { %5343 = vmatpush1.bf16.msra.mxu0 %v8502_v1  ;;  %5687 = vmatpush1.bf16.msra.mxu1 %v8505_v50  ;;  %v1654_v3 = vadd.f32 %v1653_v59, %v1652_v13  ;;  %v1658_v10 = vadd.f32 %v1657_v24, %v1590_v15  ;;  %v10903_v61 = vsub.f32 %v10730_v2, %v1542_v12  ;;  %v8520_v59 = vld [vmem:[%s10445_s0 + $0x2e0] ss:$16 sps:$4 sm:$0xff]   ;;  %v1325_v12 = vld [vmem:[%s10439_s8 + $0x8] sm:$0xff] }
 0x326   : > { %v10898_v37 = vsub.f32 %v10721_v62, %v1541_v46  ;;  %5344 = vmatprep.subr.bf16.mxu0 %v8510_v42  ;;  %5688 = vmatprep.subr.bf16.mxu1 %v8513_v58  ;;  %v1860_v34 = vadd.f32 1e-05, %v1828_v22  ;;  %v10908_v62 = vsub.s32 7, %v10593_v6  ;;  %v1377_v53 = vadd.f32 %v1376_v36, %v1375_v57  ;;  %v8522_v42 = vld [vmem:[%s10445_s0 + $0x2e4] ss:$16 sps:$4 sm:$0xff]  }
 0x327   : > { %v1655_v52 = vrot.slane %v1654_v3, 1  ;;  %v10914_v2 = vrot.slane %v10599_v9, %v10862_v54  ;;  %v1659_v20 = vrot.slane %v1658_v10, 2  ;;  %v1606_v18 = vmul.f32 %v10903_v61, %v10903_v61  ;;  %v8523_v36 = vld [vmem:[%s10445_s0 + $0x2e8] ss:$16 sps:$4 sm:$0xff]  }
 0x328   : > { %v1605_v40 = vmul.f32 %v10898_v37, %v10898_v37  ;;  %9172 = vrsqrt.f32 %v1860_v34  ;;  %v1378_v6 = vrot.slane %v1377_v53, 1  ;;  %v1387_v33 = vadd.f32 %v1386_v17, %v10738_v49  ;;  %v8531_v34 = vld [vmem:[%s10445_s0 + $0x30c] ss:$16 sps:$4 sm:$0xff]  }
 0x329   : > { %5345 = vmatpush1.bf16.msra.mxu0 %v8508_v0  ;;  %5689 = vmatpush1.bf16.msra.mxu1 %v8511_v29  ;;  %v1656_v1 = vadd.f32 %v1655_v52, %v1654_v3  ;;  %v10926_v19 = vrot.slane %v10605_v7, %v10862_v54  ;;  %v1660_v45 = vadd.f32 %v1659_v20, %v1658_v10  ;;  %v1753_v47 = vrot.slane %v1606_v18, 4 }
 0x32a   : > { %v1747_v5 = vrot.slane %v1605_v40, 4  ;;  %v9167_v50 = vpop.eup %9166  ;;  %5346 = vmatprep.subr.bf16.mxu0 %v8516_v51  ;;  %5690 = vmatprep.subr.bf16.mxu1 %v8519_v32  ;;  %v10932_v13 = vrot.slane %v10599_v9, %v10908_v62  ;;  %v1379_v39 = vadd.f32 %v1378_v6, %v1377_v53  ;;  %v1388_v58 = vrot.slane %v1387_v33, 2 }
 0x32b   : > { %v1813_v4 = vmul.f32 0.125, %v1656_v1  ;;  %v1661_v7 = vrot.slane %v1660_v45, 1  ;;  %v1754_v25 = vadd.f32 %v1753_v47, %v1606_v18  ;;  %v10936_v46 = vrot.slane %v10919_v56, %v10596_v8 }
 0x32c   : > { %v1748_v15 = vadd.f32 %v1747_v5, %v1605_v40  ;;  %v1907_v57 = vmul.f32 %v9167_v50, %v10817_v38  ;;  %v1527_v9 = vmul.f32 0.125, %v1379_v39  ;;  %v1389_v0 = vadd.f32 %v1388_v58, %v1387_v33  ;;  %v9169_v22 = vpop.eup %9168  ;;  %v8528_v38 = vld [vmem:[%s10445_s0 + $0x304] ss:$16 sps:$4 sm:$0xff]  }
 0x32d   : > { %5347 = vmatpush1.bf16.msra.mxu0 %v8514_v43  ;;  %5691 = vmatpush1.bf16.msra.mxu1 %v8517_v60  ;;  %v1845_v29 = vadd.f32 1e-05, %v1813_v4  ;;  %v1662_v51 = vadd.f32 %v1661_v7, %v1660_v45  ;;  %v1755_v3 = vrot.slane %v1754_v25, 2  ;;  %v1380_v10 = vrot.slane %v10740_v21, 4  ;;  %v9171_v17 = vpop.eup %9170  ;;  %v8526_v60 = vld [vmem:[%s10445_s0 + $0x300] ss:$16 sps:$4 sm:$0xff]  }
 0x32e   : > { %v1749_v24 = vrot.slane %v1748_v15, 2  ;;  %v1908_v32 = vmul.f32 %v9169_v22, %v10832_v44  ;;  %5348 = vmatprep.subr.bf16.mxu0 %v8522_v42  ;;  %5692 = vmatprep.subr.bf16.mxu1 %v8525_v27  ;;  %v10947_v53 = vsub.f32 %v10736_v48, %v1527_v9  ;;  %v1390_v52 = vrot.slane %v1389_v0, 1  ;;  %v8534_v50 = vld [vmem:[%s10445_s0 + $0x324] ss:$16 sps:$4 sm:$0xff]   ;;  %v8537_v42 = vld [vmem:[%s10445_s0 + $0x32c] ss:$16 sps:$4 sm:$0xff]  }
 0x32f   : > { %v1923_v20 = vmul.f32 %v9171_v17, %v10836_v23  ;;  %9174 = vrsqrt.f32 %v1845_v29  ;;  %v1814_v18 = vmul.f32 0.125, %v1662_v51  ;;  %v10951_v5 = vrot.slane %v1325_v12, %v10596_v8  ;;  %v8529_v23 = vld [vmem:[%s10445_s0 + $0x308] ss:$16 sps:$4 sm:$0xff]   ;;  %v8532_v9 = vld [vmem:[%s10445_s0 + $0x320] ss:$16 sps:$4 sm:$0xff]  }
 0x330   : > { %v1750_v40 = vadd.f32 %v1749_v24, %v1748_v15  ;;  %v2022_v44 = vmul.f32 %v10791_v35, %v1908_v32  ;;  %v1756_v33 = vadd.f32 %v1755_v3, %v1754_v25  ;;  %v1591_v43 = vmul.f32 %v10947_v53, %v10947_v53  ;;  %v11945_v58 = vld [vmem:[#allocation43_spill] sm:$0xff] }
 0x331   : > { %v2021_v48 = vmul.f32 %v10782_v55, %v1907_v57  ;;  %5349 = vmatpush1.bf16.msra.mxu0 %v8520_v59  ;;  %5693 = vmatpush1.bf16.msra.mxu1 %v8523_v36  ;;  %v1391_v1 = vadd.f32 %v1390_v52, %v1389_v0  ;;  %v1381_v45 = vadd.f32 %v1380_v10, %v10740_v21  ;;  %v1846_v0 = vadd.f32 1e-05, %v1814_v18  ;;  %v8540_v3 = vld [vmem:[%s10445_s0 + $0x344] ss:$16 sps:$4 sm:$0xff]  }
 0x332   : > { %v1751_v6 = vrot.slane %v1750_v40, 1  ;;  %v9173_v47 = vpop.eup %9172  ;;  %5350 = vmatprep.subr.bf16.mxu0 %v8528_v38  ;;  %5694 = vmatprep.subr.bf16.mxu1 %v8531_v34  ;;  %v1757_v15 = vrot.slane %v1756_v33, 1  ;;  %v1663_v39 = vrot.slane %v1591_v43, 4  ;;  %v10964_v4 = vrot.slane %v10919_v56, %v11945_v58  ;;  %v11946_v34 = vld [vmem:[#allocation45_spill] sm:$0xff] }
 0x333   : > { %v1924_v7 = vmul.f32 %v9173_v47, %v10849_v26  ;;  %v2136_v25 = vadd.f32 %v10796_v41, %v2022_v44  ;;  %v1529_v57 = vmul.f32 0.125, %v1391_v1  ;;  %v10969_v59 = vrot.slane %v1325_v12, %v11945_v58  ;;  %v8535_v26 = vld [vmem:[%s10445_s0 + $0x328] ss:$16 sps:$4 sm:$0xff]   ;;  %v8538_v44 = vld [vmem:[%s10445_s0 + $0x340] ss:$16 sps:$4 sm:$0xff]  }
 0x334   : > { %v1752_v27 = vadd.f32 %v1751_v6, %v1750_v40  ;;  %v2037_v24 = vmul.f32 %v10782_v55, %v1923_v20  ;;  %v1664_v36 = vadd.f32 %v1663_v39, %v1591_v43  ;;  %v10974_v29 = vadd.f32 %v10787_v28, %v2021_v48  ;;  %v8543_v55 = vld [vmem:[%s10445_s0 + $0x34c] ss:$16 sps:$4 sm:$0xff]   ;;  %v8541_v6 = vld [vmem:[%s10445_s0 + $0x348] ss:$16 sps:$4 sm:$0xff]  }
 0x335   : > { %v2038_v51 = vmul.f32 %v10791_v35, %v1924_v7  ;;  %5351 = vmatpush1.bf16.msra.mxu0 %v8526_v60  ;;  %5695 = vmatpush1.bf16.msra.mxu1 %v8529_v23  ;;  %v10980_v12 = vsub.f32 %v10738_v49, %v1529_v57  ;;  %v1382_v10 = vrot.slane %v1381_v45, 2  ;;  %v1758_v32 = vadd.f32 %v1757_v15, %v1756_v33  ;;  %v8546_v60 = vld [vmem:[%s10445_s0 + $0x364] ss:$16 sps:$4 sm:$0xff]   ;;  %v8547_v57 = vld [vmem:[%s10445_s0 + $0x368] ss:$16 sps:$4 sm:$0xff]  }
 0x336   : > { %v1829_v22 = vmul.f32 0.125, %v1752_v27  ;;  %5352 = vmatprep.subr.bf16.mxu0 %v8534_v50  ;;  %5696 = vmatprep.subr.bf16.mxu1 %v8537_v42  ;;  %v1665_v38 = vrot.slane %v1664_v36, 2  ;;  %v1392_v40 = vrot.slane %v11946_v34, 4  ;;  %v2168_v52 = vmax.f32 %v2136_v25, 0.0  ;;  %v8544_v25 = vld [vmem:[%s10445_s0 + $0x360] ss:$16 sps:$4 sm:$0xff]  }
 0x337   : > { %v2152_v35 = vadd.f32 %v10796_v41, %v2038_v51  ;;  %v1593_v20 = vmul.f32 %v10980_v12, %v10980_v12  ;;  %v1383_v18 = vadd.f32 %v1382_v10, %v1381_v45  ;;  %v10988_v49 = vadd.f32 %v10787_v28, %v2037_v24  ;;  %v11947_v45 = vld [vmem:[#allocation46_spill] sm:$0xff]  ;;  %v8552_v51 = vld [vmem:[%s10445_s0 + $0x384] ss:$16 sps:$4 sm:$0xff]  }
 0x338   : > { %v1861_v17 = vadd.f32 1e-05, %v1829_v22  ;;  %9176 = vrsqrt.f32 %v1846_v0  ;;  %v1666_v43 = vadd.f32 %v1665_v38, %v1664_v36  ;;  %v1393_v33 = vadd.f32 %v1392_v40, %v11946_v34  ;;  %v8549_v28 = vld [vmem:[%s10445_s0 + $0x36c] ss:$16 sps:$4 sm:$0xff]   ;;  %v11948_v22 = vld [vmem:[#allocation47_spill] sm:$0xff] }
 0x339   : > { %v9175_v48 = vpop.eup %9174  ;;  %5353 = vmatpush1.bf16.msra.mxu0 %v8532_v9  ;;  %5697 = vmatpush1.bf16.msra.mxu1 %v8535_v26  ;;  %v2184_v41 = vmax.f32 %v2152_v35, 0.0  ;;  %v1675_v23 = vrot.slane %v1593_v20, 4  ;;  %v1384_v1 = vrot.slane %v1383_v18, 1  ;;  %v1470_v47 = vrot.slane %v11947_v45, 4  ;;  %v11950_v40 = vld [vmem:[#allocation42_spill] sm:$0xff] }
 0x33a   : > { %5354 = vmatprep.subr.bf16.mxu0 %v8540_v3  ;;  %5698 = vmatprep.subr.bf16.mxu1 %v8543_v55  ;;  %9178 = vrsqrt.f32 %v1861_v17  ;;  %v1830_v50 = vmul.f32 0.125, %v1758_v32  ;;  %v1667_v42 = vrot.slane %v1666_v43, 1  ;;  %v1394_v27 = vrot.slane %v1393_v33, 2  ;;  %v11949_v55 = vld [vmem:[#allocation48_spill] sm:$0xff] }
 0x33b   : > { %v10996_v15 = vpack.c.bf16 %v2184_v41, %v2168_v52  ;;  %v1676_v39 = vadd.f32 %v1675_v23, %v1593_v20  ;;  %v1385_v58 = vadd.f32 %v1384_v1, %v1383_v18  ;;  %v1471_v7 = vadd.f32 %v1470_v47, %v11947_v45  ;;  %v8555_v32 = vld [vmem:[%s10445_s0 + $0x38c] ss:$16 sps:$4 sm:$0xff]   ;;  %v8558_v1 = vld [vmem:[%s10445_s0 + $0x3a4] ss:$16 sps:$4 sm:$0xff]  }
 0x33c   : > { %v1909_v24 = vmul.f32 %v9175_v48, %v10876_v30  ;;  %v1668_v9 = vadd.f32 %v1667_v42, %v1666_v43  ;;  %v1395_v0 = vadd.f32 %v1394_v27, %v1393_v33  ;;  %v1482_v36 = vrot.slane %v11948_v22, 4  ;;  %v8550_v43 = vld [vmem:[%s10445_s0 + $0x380] ss:$16 sps:$4 sm:$0xff]   ;;  %v8553_v33 = vld [vmem:[%s10445_s0 + $0x388] ss:$16 sps:$4 sm:$0xff]  }
 0x33d   : > { %5355 = vmatpush1.bf16.msra.mxu0 %v8538_v44  ;;  %5699 = vmatpush1.bf16.msra.mxu1 %v8541_v6  ;;  %v1677_v26 = vrot.slane %v1676_v39, 2  ;;  %v1528_v3 = vmul.f32 0.125, %v1385_v58  ;;  %v1472_v10 = vrot.slane %v1471_v7, 2  ;;  %v1476_v17 = vrot.slane %v11949_v55, 4  ;;  %v8561_v27 = vld [vmem:[%s10445_s0 + $0x3ac] ss:$16 sps:$4 sm:$0xff]  }
 0x33e   : > { %5356 = vmatprep.subr.bf16.mxu0 %v8546_v60  ;;  %5700 = vmatprep.subr.bf16.mxu1 %v8549_v28  ;;  %v1862_v38 = vadd.f32 1e-05, %v1830_v50  ;;  %v1815_v30 = vmul.f32 0.125, %v1668_v9  ;;  %v11008_v35 = vrot.slane %v10919_v56, %v11950_v40  ;;  %v1396_v52 = vrot.slane %v1395_v0, 1  ;;  %v11952_v9 = vld [vmem:[#allocation44_spill] sm:$0xff] }
 0x33f   : > { %v1678_v20 = vadd.f32 %v1677_v26, %v1676_v39  ;;  %v11011_v18 = vsub.f32 %v10740_v21, %v1528_v3  ;;  %v1473_v44 = vadd.f32 %v1472_v10, %v1471_v7  ;;  %v1483_v6 = vadd.f32 %v1482_v36, %v11948_v22  ;;  %v11951_v7 = vld [vmem:[#allocation49_spill] sm:$0xff] }
 0x340   : > { %v2023_v48 = vmul.f32 %v10914_v2, %v1909_v24  ;;  %v1847_v60 = vadd.f32 1e-05, %v1815_v30  ;;  %v1397_v41 = vadd.f32 %v1396_v52, %v1395_v0  ;;  %v1477_v23 = vadd.f32 %v1476_v17, %v11949_v55  ;;  %v8556_v3 = vld [vmem:[%s10445_s0 + $0x3a0] ss:$16 sps:$4 sm:$0xff]   ;;  %v8564_v30 = vld [vmem:[%s10445_s0 + $0x3c4] ss:$16 sps:$4 sm:$0xff]  }
 0x341   : > { %5357 = vmatpush1.bf16.msra.mxu0 %v8544_v25  ;;  %5701 = vmatpush1.bf16.msra.mxu1 %v8547_v57  ;;  %v1679_v47 = vrot.slane %v1678_v20, 1  ;;  %v1592_v21 = vmul.f32 %v11011_v18, %v11011_v18  ;;  %v1474_v28 = vrot.slane %v1473_v44, 1  ;;  %v1484_v50 = vrot.slane %v1483_v6, 2 }
 0x342   : > { %v9177_v42 = vpop.eup %9176  ;;  %5358 = vmatprep.subr.bf16.mxu0 %v8552_v51  ;;  %5702 = vmatprep.subr.bf16.mxu1 %v8555_v32  ;;  %9180 = vrsqrt.f32 %v1862_v38  ;;  %v1530_v39 = vmul.f32 0.125, %v1397_v41  ;;  %v1478_v58 = vrot.slane %v1477_v23, 2  ;;  %v1488_v25 = vrot.slane %v11951_v7, 4  ;;  %v8559_v38 = vld [vmem:[%s10445_s0 + $0x3a8] ss:$16 sps:$4 sm:$0xff]  }
 0x343   : > { %v1680_v57 = vadd.f32 %v1679_v47, %v1678_v20  ;;  %v1669_v24 = vrot.slane %v1592_v21, 4  ;;  %v11025_v0 = vrot.slane %v10919_v56, %v11952_v9  ;;  %v1475_v36 = vadd.f32 %v1474_v28, %v1473_v44  ;;  %v8567_v41 = vld [vmem:[%s10445_s0 + $0x3cc] ss:$16 sps:$4 sm:$0xff]  }
 0x344   : > { %v9179_v26 = vpop.eup %9178  ;;  %v11029_v51 = vadd.f32 %v10926_v19, %v2023_v48  ;;  %v11032_v10 = vsub.f32 %v11946_v34, %v1530_v39  ;;  %v1485_v17 = vadd.f32 %v1484_v50, %v1483_v6  ;;  %v1479_v32 = vadd.f32 %v1478_v58, %v1477_v23  ;;  %v8565_v39 = vld [vmem:[%s10445_s0 + $0x3c8] ss:$16 sps:$4 sm:$0xff]  }
 0x345   : > { %5359 = vmatpush1.bf16.msra.mxu0 %v8550_v43  ;;  %5703 = vmatpush1.bf16.msra.mxu1 %v8553_v33  ;;  %9182 = vrsqrt.f32 %v1847_v60  ;;  %v1817_v52 = vmul.f32 0.125, %v1680_v57  ;;  %v1670_v20 = vadd.f32 %v1669_v24, %v1592_v21  ;;  %v1489_v44 = vadd.f32 %v1488_v25, %v11951_v7 }
 0x346   : > { %5360 = vmatprep.subr.bf16.mxu0 %v8558_v1  ;;  %5704 = vmatprep.subr.bf16.mxu1 %v8561_v27  ;;  %v1594_v34 = vmul.f32 %v11032_v10, %v11032_v10  ;;  %v1543_v48 = vmul.f32 0.125, %v1475_v36  ;;  %v1486_v6 = vrot.slane %v1485_v17, 1  ;;  %v1480_v23 = vrot.slane %v1479_v32, 1  ;;  %v8562_v27 = vld [vmem:[%s10445_s0 + $0x3c0] ss:$16 sps:$4 sm:$0xff]  }
 0x347   : > { %v1910_v43 = vmul.f32 %v9177_v42, %v10885_v16  ;;  %v1925_v33 = vmul.f32 %v9179_v26, %v10898_v37  ;;  %v1849_v60 = vadd.f32 1e-05, %v1817_v52  ;;  %v1671_v47 = vrot.slane %v1670_v20, 2  ;;  %v8570_v37 = vld [vmem:[%s10445_s0 + $0x3e4] ss:$16 sps:$4 sm:$0xff]  }
 0x348   : > { %v1681_v21 = vrot.slane %v1594_v34, 4  ;;  %v11043_v1 = vsub.f32 %v11947_v45, %v1543_v48  ;;  %v1487_v28 = vadd.f32 %v1486_v6, %v1485_v17  ;;  %v1481_v50 = vadd.f32 %v1480_v23, %v1479_v32  ;;  %v8573_v42 = vld [vmem:[%s10445_s0 + $0x3ec] ss:$16 sps:$4 sm:$0xff]   ;;  %v8571_v48 = vld [vmem:[%s10445_s0 + $0x3e8] ss:$16 sps:$4 sm:$0xff]  }
 0x349   : > { %5361 = vmatpush1.bf16.msra.mxu0 %v8556_v3  ;;  %5705 = vmatpush1.bf16.msra.mxu1 %v8559_v38  ;;  %9184 = vrsqrt.f32 %v1849_v60  ;;  %v1672_v58 = vadd.f32 %v1671_v47, %v1670_v20  ;;  %v1490_v25 = vrot.slane %v1489_v44, 2  ;;  %v1398_v16 = vrot.slane %v10752_v63, 4  ;;  %v8576_v60 = vld [vmem:[%s10445_s0 + $0x404] ss:$16 sps:$4 sm:$0xff]   ;;  %v8579_v47 = vld [vmem:[%s10445_s0 + $0x40c] ss:$16 sps:$4 sm:$0xff]  }
 0x34a   : > { %5362 = vmatprep.subr.bf16.mxu0 %v8564_v30  ;;  %5706 = vmatprep.subr.bf16.mxu1 %v8567_v41  ;;  %v1682_v57 = vadd.f32 %v1681_v21, %v1594_v34  ;;  %v1607_v45 = vmul.f32 %v11043_v1, %v11043_v1  ;;  %v1545_v24 = vmul.f32 0.125, %v1487_v28  ;;  %v1544_v36 = vmul.f32 0.125, %v1481_v50  ;;  %v8568_v34 = vld [vmem:[%s10445_s0 + $0x3e0] ss:$16 sps:$4 sm:$0xff]  }
 0x34b   : > { %v11053_v26 = vmul.f32 %v10932_v13, %v1910_v43  ;;  %v1673_v3 = vrot.slane %v1672_v58, 1  ;;  %v1491_v17 = vadd.f32 %v1490_v25, %v1489_v44  ;;  %v1399_v32 = vadd.f32 %v1398_v16, %v10752_v63 }
 0x34c   : > { %v9181_v38 = vpop.eup %9180  ;;  %v1683_v30 = vrot.slane %v1682_v57, 2  ;;  %v1759_v52 = vrot.slane %v1607_v45, 4  ;;  %v11057_v20 = vsub.f32 %v11948_v22, %v1545_v24  ;;  %v11060_v41 = vsub.f32 %v11949_v55, %v1544_v36  ;;  %v8582_v36 = vld [vmem:[%s10445_s0 + $0x424] ss:$16 sps:$4 sm:$0xff]  }
 0x34d   : > { %5363 = vmatpush1.bf16.msra.mxu0 %v8562_v27  ;;  %5707 = vmatpush1.bf16.msra.mxu1 %v8565_v39  ;;  %v2039_v6 = vmul.f32 %v10914_v2, %v1925_v33  ;;  %v1674_v44 = vadd.f32 %v1673_v3, %v1672_v58  ;;  %v1492_v23 = vrot.slane %v1491_v17, 1  ;;  %v1400_v43 = vrot.slane %v1399_v32, 2  ;;  %v8574_v39 = vld [vmem:[%s10445_s0 + $0x400] ss:$16 sps:$4 sm:$0xff]   ;;  %v8585_v3 = vld [vmem:[%s10445_s0 + $0x42c] ss:$16 sps:$4 sm:$0xff]  }
 0x34e   : > { %5364 = vmatprep.subr.bf16.mxu0 %v8570_v37  ;;  %5708 = vmatprep.subr.bf16.mxu1 %v8573_v42  ;;  %v1684_v22 = vadd.f32 %v1683_v30, %v1682_v57  ;;  %v1760_v21 = vadd.f32 %v1759_v52, %v1607_v45  ;;  %v1609_v55 = vmul.f32 %v11057_v20, %v11057_v20  ;;  %v8577_v42 = vld [vmem:[%s10445_s0 + $0x408] ss:$16 sps:$4 sm:$0xff]   ;;  %v1410_v24 = vrot.slane %v10754_v11, 4 }
 0x34f   : > { %v9183_v28 = vpop.eup %9182  ;;  %v1926_v50 = vmul.f32 %v9181_v38, %v10903_v61  ;;  %v1816_v27 = vmul.f32 0.125, %v1674_v44  ;;  %v1608_v2 = vmul.f32 %v11060_v41, %v11060_v41  ;;  %v1493_v33 = vadd.f32 %v1492_v23, %v1491_v17 }
 0x350   : > { %v1685_v58 = vrot.slane %v1684_v22, 1  ;;  %v1761_v25 = vrot.slane %v1760_v21, 2  ;;  %v1771_v16 = vrot.slane %v1609_v55, 4  ;;  %v1401_v37 = vadd.f32 %v1400_v43, %v1399_v32 }
 0x351   : > { %5365 = vmatpush1.bf16.msra.mxu0 %v8568_v34  ;;  %5709 = vmatpush1.bf16.msra.mxu1 %v8571_v48  ;;  %v11075_v57 = vadd.f32 %v10926_v19, %v2039_v6  ;;  %v1765_v45 = vrot.slane %v1608_v2, 4  ;;  %v1546_v61 = vmul.f32 0.125, %v1493_v33  ;;  %v1911_v34 = vmul.f32 %v9183_v28, %v10947_v53  ;;  %v8583_v53 = vld [vmem:[%s10445_s0 + $0x428] ss:$16 sps:$4 sm:$0xff]   ;;  %v8591_v28 = vld [vmem:[%s10445_s0 + $0x44c] ss:$16 sps:$4 sm:$0xff]  }
 0x352   : > { %5377 = vmatprep.subr.bf16.mxu0 %v8576_v60  ;;  %5721 = vmatprep.subr.bf16.mxu1 %v8579_v47  ;;  %v1686_v17 = vadd.f32 %v1685_v58, %v1684_v22  ;;  %v1762_v38 = vadd.f32 %v1761_v25, %v1760_v21  ;;  %v1772_v30 = vadd.f32 %v1771_v16, %v1609_v55  ;;  %v1402_v32 = vrot.slane %v1401_v37, 1  ;;  %v8580_v47 = vld [vmem:[%s10445_s0 + $0x420] ss:$16 sps:$4 sm:$0xff]  }
 0x353   : > { %v9185_v52 = vpop.eup %9184  ;;  %v1848_v48 = vadd.f32 1e-05, %v1816_v27  ;;  %v1766_v19 = vadd.f32 %v1765_v45, %v1608_v2  ;;  %v11082_v6 = vsub.f32 %v11951_v7, %v1546_v61  ;;  %v1411_v55 = vadd.f32 %v1410_v24, %v10754_v11  ;;  %v8586_v61 = vld [vmem:[%s10445_s0 + $0x440] ss:$16 sps:$4 sm:$0xff]   ;;  %v8589_v24 = vld [vmem:[%s10445_s0 + $0x448] ss:$16 sps:$4 sm:$0xff]  }
 0x354   : > { %5367 = vmatmul.mubr.bf16.vlgmr.msra.gmra.mrb[16].mxu0 %v10854_v14  ;;  %5711 = vmatmul.mubr.bf16.vlgmr.msra.gmra.mrb[16].mxu1 %v10854_v14  ;;  %v1913_v44 = vmul.f32 %v9185_v52, %v10980_v12  ;;  %v1818_v23 = vmul.f32 0.125, %v1686_v17  ;;  %v1763_v43 = vrot.slane %v1762_v38, 1  ;;  %v1773_v60 = vrot.slane %v1772_v30, 2  ;;  %v8588_v14 = vld [vmem:[%s10445_s0 + $0x444] ss:$16 sps:$4 sm:$0xff]  }
 0x355   : > { %5378 = vmatpush1.bf16.msra.mxu0 %v8574_v39  ;;  %5722 = vmatpush1.bf16.msra.mxu1 %v8577_v42  ;;  %v1767_v22 = vrot.slane %v1766_v19, 2  ;;  %v1610_v7 = vmul.f32 %v11082_v6, %v11082_v6  ;;  %v1403_v21 = vadd.f32 %v1402_v32, %v1401_v37  ;;  %v1412_v16 = vrot.slane %v1411_v55, 2 }
 0x356   : > { %5379 = vmatprep.subr.bf16.mxu0 %v8582_v36  ;;  %5723 = vmatprep.subr.bf16.mxu1 %v8585_v3  ;;  %v2027_v12 = vmul.f32 %v10964_v4, %v1913_v44  ;;  %v1850_v27 = vadd.f32 1e-05, %v1818_v23  ;;  %v1764_v2 = vadd.f32 %v1763_v43, %v1762_v38  ;;  %v1774_v33 = vadd.f32 %v1773_v60, %v1772_v30  ;;  %v8594_v38 = vld [vmem:[%s10445_s0 + $0x464] ss:$16 sps:$4 sm:$0xff]   ;;  %v8597_v30 = vld [vmem:[%s10445_s0 + $0x46c] ss:$16 sps:$4 sm:$0xff]  }
 0x357   : > { %5409 = vmatprep.mubr.bf16.mxu0 %v10996_v15  ;;  %5753 = vmatprep.mubr.bf16.mxu1 %v10996_v15  ;;  %v1768_v39 = vadd.f32 %v1767_v22, %v1766_v19  ;;  %v1777_v58 = vrot.slane %v1610_v7, 4  ;;  %v1531_v25 = vmul.f32 0.125, %v1403_v21  ;;  %v11098_v37 = vmul.f32 %v10932_v13, %v1926_v50 }
 0x358   : > { %9186 = vrsqrt.f32 %v1850_v27  ;;  %v1831_v42 = vmul.f32 0.125, %v1764_v2  ;;  %v1775_v45 = vrot.slane %v1774_v33, 1  ;;  %v1413_v17 = vadd.f32 %v1412_v16, %v1411_v55 }
 0x359   : > { %5380 = vmatpush1.bf16.msra.mxu0 %v8580_v47  ;;  %5724 = vmatpush1.bf16.msra.mxu1 %v8583_v53  ;;  %v1769_v36 = vrot.slane %v1768_v39, 1  ;;  %v1778_v3 = vadd.f32 %v1777_v58, %v1610_v7  ;;  %v11103_v15 = vsub.f32 %v10752_v63, %v1531_v25  ;;  %v2025_v13 = vmul.f32 %v10936_v46, %v1911_v34  ;;  %v8592_v63 = vld [vmem:[%s10445_s0 + $0x460] ss:$16 sps:$4 sm:$0xff]   ;;  %v8600_v53 = vld [vmem:[%s10445_s0 + $0x484] ss:$16 sps:$4 sm:$0xff]  }
 0x35a   : > { %5381 = vmatprep.subr.bf16.mxu0 %v8588_v14  ;;  %5725 = vmatprep.subr.bf16.mxu1 %v8591_v28  ;;  %9188 = vrsqrt.f32 %v1848_v48  ;;  %v1863_v50 = vadd.f32 1e-05, %v1831_v42  ;;  %v1776_v32 = vadd.f32 %v1775_v45, %v1774_v33  ;;  %v1414_v23 = vrot.slane %v1413_v17, 1  ;;  %v11953_v47 = vld [vmem:[#allocation50_spill] sm:$0xff]  ;;  %v11954_v33 = vld [vmem:[#allocation51_spill] sm:$0xff] }
 0x35b   : > { %v1770_v52 = vadd.f32 %v1769_v36, %v1768_v39  ;;  %v1779_v19 = vrot.slane %v1778_v3, 2  ;;  %v1595_v44 = vmul.f32 %v11103_v15, %v11103_v15  ;;  %v11113_v60 = vrot.slane %v10919_v56, %v10659_v31  ;;  %v8595_v48 = vld [vmem:[%s10445_s0 + $0x468] ss:$16 sps:$4 sm:$0xff]   ;;  %v8603_v14 = vld [vmem:[%s10445_s0 + $0x48c] ss:$16 sps:$4 sm:$0xff]  }
 0x35c   : > { %9190 = vrsqrt.f32 %v1863_v50  ;;  %v1833_v43 = vmul.f32 0.125, %v1776_v32  ;;  %v1404_v34 = vrot.slane %v11953_v47, 4  ;;  %v1415_v55 = vadd.f32 %v1414_v23, %v1413_v17  ;;  %v8598_v36 = vld [vmem:[%s10445_s0 + $0x480] ss:$16 sps:$4 sm:$0xff]   ;;  %v8606_v50 = vld [vmem:[%s10445_s0 + $0x4a4] ss:$16 sps:$4 sm:$0xff]  }
 0x35d   : > { %5382 = vmatpush1.bf16.msra.mxu0 %v8586_v61  ;;  %5726 = vmatpush1.bf16.msra.mxu1 %v8589_v24  ;;  %v1832_v22 = vmul.f32 0.125, %v1770_v52  ;;  %v1780_v7 = vadd.f32 %v1779_v19, %v1778_v3  ;;  %v1687_v21 = vrot.slane %v1595_v44, 4  ;;  %v11120_v28 = vadd.f32 %v10951_v5, %v2025_v13  ;;  %v8601_v3 = vld [vmem:[%s10445_s0 + $0x488] ss:$16 sps:$4 sm:$0xff]   ;;  %v8609_v32 = vld [vmem:[%s10445_s0 + $0x4ac] ss:$16 sps:$4 sm:$0xff]  }
 0x35e   : > { %5383 = vmatprep.subr.bf16.mxu0 %v8594_v38  ;;  %5727 = vmatprep.subr.bf16.mxu1 %v8597_v30  ;;  %v1865_v27 = vadd.f32 1e-05, %v1833_v43  ;;  %v1405_v2 = vadd.f32 %v1404_v34, %v11953_v47  ;;  %v1416_v39 = vrot.slane %v11954_v33, 4  ;;  %v1533_v42 = vmul.f32 0.125, %v1415_v55  ;;  %v11956_v55 = vld [vmem:[#allocation53_spill] sm:$0xff] }
 0x35f   : > { %v1864_v58 = vadd.f32 1e-05, %v1832_v22  ;;  %v1781_v25 = vrot.slane %v1780_v7, 1  ;;  %v1688_v16 = vadd.f32 %v1687_v21, %v1595_v44  ;;  %v11125_v45 = vadd.f32 %v10969_v59, %v2027_v12  ;;  %v11955_v44 = vld [vmem:[#allocation52_spill] sm:$0xff] }
 0x360   : > { %9192 = vrsqrt.f32 %v1865_v27  ;;  %v1406_v61 = vrot.slane %v1405_v2, 2  ;;  %v1417_v24 = vadd.f32 %v1416_v39, %v11954_v33  ;;  %v11131_v30 = vsub.f32 %v10754_v11, %v1533_v42  ;;  %v8604_v22 = vld [vmem:[%s10445_s0 + $0x4a0] ss:$16 sps:$4 sm:$0xff]   ;;  %v8607_v27 = vld [vmem:[%s10445_s0 + $0x4a8] ss:$16 sps:$4 sm:$0xff]  }
 0x361   : > { %5384 = vmatpush1.bf16.msra.mxu0 %v8592_v63  ;;  %5728 = vmatpush1.bf16.msra.mxu1 %v8595_v48  ;;  %v1782_v17 = vadd.f32 %v1781_v25, %v1780_v7  ;;  %v1689_v38 = vrot.slane %v1688_v16, 2  ;;  %v11135_v13 = vrot.slane %v10919_v56, %v10862_v54  ;;  %9194 = vrsqrt.f32 %v1864_v58  ;;  %v8615_v42 = vld [vmem:[%s10445_s0 + $0x4cc] ss:$16 sps:$4 sm:$0xff]  }
 0x362   : > { %v9187_v12 = vpop.eup %9186  ;;  %5385 = vmatprep.subr.bf16.mxu0 %v8600_v53  ;;  %5729 = vmatprep.subr.bf16.mxu1 %v8603_v14  ;;  %v1407_v52 = vadd.f32 %v1406_v61, %v1405_v2  ;;  %v1418_v19 = vrot.slane %v1417_v24, 2  ;;  %v1494_v23 = vrot.slane %v11955_v44, 4  ;;  %v1597_v34 = vmul.f32 %v11131_v30, %v11131_v30 }
 0x363   : > { %v1914_v63 = vmul.f32 %v9187_v12, %v11032_v10  ;;  %v1834_v11 = vmul.f32 0.125, %v1782_v17  ;;  %v1690_v43 = vadd.f32 %v1689_v38, %v1688_v16  ;;  %v1506_v14 = vrot.slane %v11956_v55, 4  ;;  %v8612_v16 = vld [vmem:[%s10445_s0 + $0x4c4] ss:$16 sps:$4 sm:$0xff]  }
 0x364   : > { %v9189_v48 = vpop.eup %9188  ;;  %v1408_v53 = vrot.slane %v1407_v52, 1  ;;  %v1419_v7 = vadd.f32 %v1418_v19, %v1417_v24  ;;  %v1495_v21 = vadd.f32 %v1494_v23, %v11955_v44  ;;  %v1699_v58 = vrot.slane %v1597_v34, 4 }
 0x365   : > { %5386 = vmatpush1.bf16.msra.mxu0 %v8598_v36  ;;  %5730 = vmatpush1.bf16.msra.mxu1 %v8601_v3  ;;  %v11148_v10 = vmul.f32 %v11025_v0, %v1914_v63  ;;  %v1866_v2 = vadd.f32 1e-05, %v1834_v11  ;;  %v1691_v39 = vrot.slane %v1690_v43, 1  ;;  %v1507_v36 = vadd.f32 %v1506_v14, %v11956_v55  ;;  %v8610_v63 = vld [vmem:[%s10445_s0 + $0x4c0] ss:$16 sps:$4 sm:$0xff]  }
 0x366   : > { %v9191_v25 = vpop.eup %9190  ;;  %5387 = vmatprep.subr.bf16.mxu0 %v8606_v50  ;;  %5731 = vmatprep.subr.bf16.mxu1 %v8609_v32  ;;  %v1409_v61 = vadd.f32 %v1408_v53, %v1407_v52  ;;  %v1420_v24 = vrot.slane %v1419_v7, 1  ;;  %v1496_v17 = vrot.slane %v1495_v21, 2  ;;  %v1912_v3 = vmul.f32 %v9189_v48, %v11011_v18  ;;  %v8613_v11 = vld [vmem:[%s10445_s0 + $0x4c8] ss:$16 sps:$4 sm:$0xff]   ;;  %v8621_v48 = vld [vmem:[%s10445_s0 + $0x4ec] ss:$16 sps:$4 sm:$0xff]  }
 0x367   : > { %9196 = vrsqrt.f32 %v1866_v2  ;;  %v1692_v38 = vadd.f32 %v1691_v39, %v1690_v43  ;;  %v1700_v12 = vadd.f32 %v1699_v58, %v1597_v34  ;;  %v1508_v32 = vrot.slane %v1507_v36, 2  ;;  %v11957_v14 = vld [vmem:[#allocation54_spill] sm:$0xff]  ;;  %v8618_v34 = vld [vmem:[%s10445_s0 + $0x4e4] ss:$16 sps:$4 sm:$0xff]  }
 0x368   : > { %v1532_v19 = vmul.f32 0.125, %v1409_v61  ;;  %v1421_v23 = vadd.f32 %v1420_v24, %v1419_v7  ;;  %v1497_v50 = vadd.f32 %v1496_v17, %v1495_v21  ;;  %v1927_v52 = vmul.f32 %v9191_v25, %v11043_v1  ;;  %v11958_v58 = vld [vmem:[#allocation55_spill] sm:$0xff] }
 0x369   : > { %5388 = vmatpush1.bf16.msra.mxu0 %v8604_v22  ;;  %5732 = vmatpush1.bf16.msra.mxu1 %v8607_v27  ;;  %v1819_v53 = vmul.f32 0.125, %v1692_v38  ;;  %v1701_v8 = vrot.slane %v1700_v12, 2  ;;  %v11159_v18 = vrot.slane %v10919_v56, %v11957_v14  ;;  %v1509_v27 = vadd.f32 %v1508_v32, %v1507_v36  ;;  %v8619_v24 = vld [vmem:[%s10445_s0 + $0x4e8] ss:$16 sps:$4 sm:$0xff]   ;;  %v8624_v38 = vld [vmem:[%s10445_s0 + $0x504] ss:$16 sps:$4 sm:$0xff]  }
 0x36a   : > { %v9193_v43 = vpop.eup %9192  ;;  %5389 = vmatprep.subr.bf16.mxu0 %v8612_v16  ;;  %5733 = vmatprep.subr.bf16.mxu1 %v8615_v42  ;;  %v11164_v7 = vsub.f32 %v11953_v47, %v1532_v19  ;;  %v1534_v22 = vmul.f32 0.125, %v1421_v23  ;;  %v1498_v21 = vrot.slane %v1497_v50, 1  ;;  %v1500_v56 = vrot.slane %v11958_v58, 4 }
 0x36b   : > { %v1929_v1 = vmul.f32 %v9193_v43, %v11057_v20  ;;  %v1851_v2 = vadd.f32 1e-05, %v1819_v53  ;;  %v1702_v39 = vadd.f32 %v1701_v8, %v1700_v12  ;;  %v9195_v25 = vpop.eup %9194  ;;  %v11169_v16 = vmul.f32 %v11008_v35, %v1912_v3  ;;  %v8616_v20 = vld [vmem:[%s10445_s0 + $0x4e0] ss:$16 sps:$4 sm:$0xff]  }
 0x36c   : > { %v1596_v47 = vmul.f32 %v11164_v7, %v11164_v7  ;;  %v11174_v42 = vsub.f32 %v11954_v33, %v1534_v22  ;;  %v1499_v61 = vadd.f32 %v1498_v21, %v1497_v50  ;;  %v1510_v36 = vrot.slane %v1509_v27, 1  ;;  %v8627_v33 = vld [vmem:[%s10445_s0 + $0x50c] ss:$16 sps:$4 sm:$0xff]   ;;  %v8625_v22 = vld [vmem:[%s10445_s0 + $0x508] ss:$16 sps:$4 sm:$0xff]  }
 0x36d   : > { %5390 = vmatpush1.bf16.msra.mxu0 %v8610_v63  ;;  %5734 = vmatpush1.bf16.msra.mxu1 %v8613_v11  ;;  %v11179_v8 = vmul.f32 %v10964_v4, %v1929_v1  ;;  %9198 = vrsqrt.f32 %v1851_v2  ;;  %v1703_v17 = vrot.slane %v1702_v39, 1  ;;  %v11182_v3 = vmul.f32 %v10936_v46, %v1927_v52  ;;  %v8622_v11 = vld [vmem:[%s10445_s0 + $0x500] ss:$16 sps:$4 sm:$0xff]  }
 0x36e   : > { %5391 = vmatprep.subr.bf16.mxu0 %v8618_v34  ;;  %5735 = vmatprep.subr.bf16.mxu1 %v8621_v48  ;;  %v1693_v12 = vrot.slane %v1596_v47, 4  ;;  %v1598_v19 = vmul.f32 %v11174_v42, %v11174_v42  ;;  %v1547_v23 = vmul.f32 0.125, %v1499_v61  ;;  %v11189_v4 = vmul.f32 %v9195_v25, %v11060_v41  ;;  %v11959_v43 = vld [vmem:[#allocation56_spill] sm:$0xff] }
 0x36f   : > { %v1704_v50 = vadd.f32 %v1703_v17, %v1702_v39  ;;  %v1511_v32 = vadd.f32 %v1510_v36, %v1509_v27  ;;  %v1501_v63 = vadd.f32 %v1500_v56, %v11958_v58  ;;  %v1512_v34 = vrot.slane %v11959_v43, 4  ;;  %v8630_v39 = vld [vmem:[%s10445_s0 + $0x524] ss:$16 sps:$4 sm:$0xff]  }
 0x370   : > { %v1694_v53 = vadd.f32 %v1693_v12, %v1596_v47  ;;  %v1705_v46 = vrot.slane %v1598_v19, 4  ;;  %v11194_v52 = vsub.f32 %v11955_v44, %v1547_v23  ;;  %v2167_v27 = vmax.f32 %v10974_v29, 0.0  ;;  %v8633_v44 = vld [vmem:[%s10445_s0 + $0x52c] ss:$16 sps:$4 sm:$0xff]   ;;  %v8631_v12 = vld [vmem:[%s10445_s0 + $0x528] ss:$16 sps:$4 sm:$0xff]  }
 0x371   : > { %v9197_v48 = vpop.eup %9196  ;;  %5392 = vmatpush1.bf16.msra.mxu0 %v8616_v20  ;;  %5736 = vmatpush1.bf16.msra.mxu1 %v8619_v24  ;;  %v1821_v41 = vmul.f32 0.125, %v1704_v50  ;;  %v1549_v21 = vmul.f32 0.125, %v1511_v32  ;;  %v1502_v1 = vrot.slane %v1501_v63, 2  ;;  %v1513_v29 = vadd.f32 %v1512_v34, %v11959_v43 }
 0x372   : > { %5393 = vmatprep.subr.bf16.mxu0 %v8624_v38  ;;  %5737 = vmatprep.subr.bf16.mxu1 %v8627_v33  ;;  %v1930_v2 = vmul.f32 %v9197_v48, %v11082_v6  ;;  %v1695_v56 = vrot.slane %v1694_v53, 2  ;;  %v1706_v25 = vadd.f32 %v1705_v46, %v1598_v19  ;;  %v1611_v47 = vmul.f32 %v11194_v52, %v11194_v52  ;;  %v8628_v33 = vld [vmem:[%s10445_s0 + $0x520] ss:$16 sps:$4 sm:$0xff]  }
 0x373   : > { %v1853_v61 = vadd.f32 1e-05, %v1821_v41  ;;  %v11205_v20 = vsub.f32 %v11956_v55, %v1549_v21  ;;  %v1503_v24 = vadd.f32 %v1502_v1, %v1501_v63  ;;  %v1514_v23 = vrot.slane %v1513_v29, 2  ;;  %v8636_v63 = vld [vmem:[%s10445_s0 + $0x544] ss:$16 sps:$4 sm:$0xff]  }
 0x374   : > { %v11209_v17 = vmul.f32 %v11025_v0, %v1930_v2  ;;  %v1696_v6 = vadd.f32 %v1695_v56, %v1694_v53  ;;  %v1707_v36 = vrot.slane %v1706_v25, 2  ;;  %v1783_v38 = vrot.slane %v1611_v47, 4  ;;  %v8639_v53 = vld [vmem:[%s10445_s0 + $0x54c] ss:$16 sps:$4 sm:$0xff]   ;;  %v9214_v41 = vld [vmem:[%s10439_s8] sm:$0xff] }
 0x375   : > { %5394 = vmatpush1.bf16.msra.mxu0 %v8622_v11  ;;  %5738 = vmatpush1.bf16.msra.mxu1 %v8625_v22  ;;  %9200 = vrsqrt.f32 %v1853_v61  ;;  %v1613_v55 = vmul.f32 %v11205_v20, %v11205_v20  ;;  %v1504_v19 = vrot.slane %v1503_v24, 1  ;;  %v2183_v11 = vmax.f32 %v10988_v49, 0.0 }
 0x376   : > { %5395 = vmatprep.subr.bf16.mxu0 %v8630_v39  ;;  %5739 = vmatprep.subr.bf16.mxu1 %v8633_v44  ;;  %v1697_v0 = vrot.slane %v1696_v6, 1  ;;  %v1708_v50 = vadd.f32 %v1707_v36, %v1706_v25  ;;  %v1784_v32 = vadd.f32 %v1783_v38, %v1611_v47  ;;  %v1515_v22 = vadd.f32 %v1514_v23, %v1513_v29  ;;  %v8634_v25 = vld [vmem:[%s10445_s0 + $0x540] ss:$16 sps:$4 sm:$0xff]   ;;  %v8637_v47 = vld [vmem:[%s10445_s0 + $0x548] ss:$16 sps:$4 sm:$0xff]  }
 0x377   : > { %v9199_v46 = vpop.eup %9198  ;;  %v1795_v34 = vrot.slane %v1613_v55, 4  ;;  %v1505_v48 = vadd.f32 %v1504_v19, %v1503_v24  ;;  %v2082_v21 = vrot.slane %v9214_v41, %v10908_v62  ;;  %v11223_v36 = vpack.c.bf16 %v2183_v11, %v2167_v27  ;;  %v8642_v38 = vld [vmem:[%s10445_s0 + $0x564] ss:$16 sps:$4 sm:$0xff]  }
 0x378   : > { %v1915_v1 = vmul.f32 %v9199_v46, %v11103_v15  ;;  %v1698_v2 = vadd.f32 %v1697_v0, %v1696_v6  ;;  %v1709_v39 = vrot.slane %v1708_v50, 1  ;;  %v1785_v44 = vrot.slane %v1784_v32, 2 }
 0x379   : > { %5396 = vmatpush1.bf16.msra.mxu0 %v8628_v33  ;;  %5740 = vmatpush1.bf16.msra.mxu1 %v8631_v12  ;;  %v1796_v56 = vadd.f32 %v1795_v34, %v1613_v55  ;;  %v1548_v49 = vmul.f32 0.125, %v1505_v48  ;;  %v1516_v61 = vrot.slane %v1515_v22, 1  ;;  %v8645_v33 = vld [vmem:[%s10445_s0 + $0x56c] ss:$16 sps:$4 sm:$0xff]   ;;  %v2138_v27 = vadd.f32 %v2082_v21, %v11053_v26  ;;  %v8648_v34 = vld [vmem:[%s10445_s0 + $0x584] ss:$16 sps:$4 sm:$0xff]  }
 0x37a   : > { %v11226_v24 = vmul.f32 %v11113_v60, %v1915_v1  ;;  %v1820_v29 = vmul.f32 0.125, %v1698_v2  ;;  %v1710_v15 = vadd.f32 %v1709_v39, %v1708_v50  ;;  %v1786_v6 = vadd.f32 %v1785_v44, %v1784_v32  ;;  %5397 = vmatprep.subr.bf16.mxu0 %v8636_v63  ;;  %5741 = vmatprep.subr.bf16.mxu1 %v8639_v53  ;;  %v8640_v32 = vld [vmem:[%s10445_s0 + $0x560] ss:$16 sps:$4 sm:$0xff]  }
 0x37b   : > { %v1797_v12 = vrot.slane %v1796_v56, 2  ;;  %v11231_v55 = vsub.f32 %v11958_v58, %v1548_v49  ;;  %v1517_v19 = vadd.f32 %v1516_v61, %v1515_v22  ;;  %v2042_v23 = vmul.f32 %v11008_v35, %v11189_v4  ;;  %v8643_v58 = vld [vmem:[%s10445_s0 + $0x568] ss:$16 sps:$4 sm:$0xff]   ;;  %v8651_v35 = vld [vmem:[%s10445_s0 + $0x58c] ss:$16 sps:$4 sm:$0xff]  }
 0x37c   : > { %v1852_v0 = vadd.f32 1e-05, %v1820_v29  ;;  %v1822_v11 = vmul.f32 0.125, %v1710_v15  ;;  %v1787_v50 = vrot.slane %v1786_v6, 1  ;;  %v2154_v48 = vadd.f32 %v2082_v21, %v11098_v37  ;;  %v8646_v61 = vld [vmem:[%s10445_s0 + $0x580] ss:$16 sps:$4 sm:$0xff]  }
 0x37d   : > { %v1798_v63 = vadd.f32 %v1797_v12, %v1796_v56  ;;  %v1612_v53 = vmul.f32 %v11231_v55, %v11231_v55  ;;  %v1550_v46 = vmul.f32 0.125, %v1517_v19  ;;  %5398 = vmatpush1.bf16.msra.mxu0 %v8634_v25  ;;  %5742 = vmatpush1.bf16.msra.mxu1 %v8637_v47  ;;  %v2170_v4 = vmax.f32 %v2138_v27, 0.0 }
 0x37e   : > { %9202 = vrsqrt.f32 %v1852_v0  ;;  %v1854_v26 = vadd.f32 1e-05, %v1822_v11  ;;  %v1788_v22 = vadd.f32 %v1787_v50, %v1786_v6  ;;  %5399 = vmatprep.subr.bf16.mxu0 %v8642_v38  ;;  %5743 = vmatprep.subr.bf16.mxu1 %v8645_v33  ;;  %v2186_v44 = vmax.f32 %v2154_v48, 0.0  ;;  %v8657_v6 = vld [vmem:[%s10445_s0 + $0x5ac] ss:$16 sps:$4 sm:$0xff]  }
 0x37f   : > { %v9201_v41 = vpop.eup %9200  ;;  %v1799_v1 = vrot.slane %v1798_v63, 1  ;;  %v1789_v2 = vrot.slane %v1612_v53, 4  ;;  %v11244_v39 = vsub.f32 %v11959_v43, %v1550_v46  ;;  %v2169_v21 = vmax.f32 %v11029_v51, 0.0  ;;  %v8649_v43 = vld [vmem:[%s10445_s0 + $0x588] ss:$16 sps:$4 sm:$0xff]  }
 0x380   : > { %v1917_v56 = vmul.f32 %v9201_v41, %v11131_v30  ;;  %9204 = vrsqrt.f32 %v1854_v26  ;;  %v1835_v37 = vmul.f32 0.125, %v1788_v22  ;;  %v2185_v29 = vmax.f32 %v11075_v57, 0.0  ;;  %v8654_v51 = vld [vmem:[%s10445_s0 + $0x5a4] ss:$16 sps:$4 sm:$0xff]   ;;  %v11261_v33 = vld [vmem:[%s10439_s8 + $0x8] sm:$0xff] }
 0x381   : > { %v1800_v25 = vadd.f32 %v1799_v1, %v1798_v63  ;;  %v1790_v47 = vadd.f32 %v1789_v2, %v1612_v53  ;;  %v1614_v49 = vmul.f32 %v11244_v39, %v11244_v39  ;;  %5400 = vmatpush1.bf16.msra.mxu0 %v8640_v32  ;;  %5744 = vmatpush1.bf16.msra.mxu1 %v8643_v58  ;;  %v8652_v50 = vld [vmem:[%s10445_s0 + $0x5a0] ss:$16 sps:$4 sm:$0xff]   ;;  %v9216_v53 = vld [vmem:[%s10437_s22 + $0x8] sm:$0xff]  ;;  %v8660_v26 = vld [vmem:[%s10445_s0 + $0x5c4] ss:$16 sps:$4 sm:$0xff]  }
 0x382   : > { %v11254_v30 = vmul.f32 %v11135_v13, %v1917_v56  ;;  %v1867_v15 = vadd.f32 1e-05, %v1835_v37  ;;  %5401 = vmatprep.subr.bf16.mxu0 %v8648_v34  ;;  %5745 = vmatprep.subr.bf16.mxu1 %v8651_v35  ;;  %v11258_v38 = vpack.c.bf16 %v2186_v44, %v2170_v4  ;;  %v2090_v12 = vrot.slane %v11261_v33, %v11950_v40  ;;  %v8655_v48 = vld [vmem:[%s10445_s0 + $0x5a8] ss:$16 sps:$4 sm:$0xff]  }
 0x383   : > { %v1837_v19 = vmul.f32 0.125, %v1800_v25  ;;  %v1791_v57 = vrot.slane %v1790_v47, 2  ;;  %v1801_v27 = vrot.slane %v1614_v49, 4  ;;  %v11265_v0 = vpack.c.bf16 %v2185_v29, %v2169_v21 }
 0x384   : > { %v2155_v11 = vadd.f32 %v10951_v5, %v11182_v3  ;;  %9206 = vrsqrt.f32 %v1867_v15  ;;  %v2140_v32 = vadd.f32 %v2090_v12, %v11169_v16  ;;  %v2156_v63 = vadd.f32 %v2090_v12, %v2042_v23  ;;  %v8663_v5 = vld [vmem:[%s10445_s0 + $0x5cc] ss:$16 sps:$4 sm:$0xff]  }
 0x385   : > { %v11273_v46 = vrot.slane %v9216_v53, %v10908_v62  ;;  %v1869_v40 = vadd.f32 1e-05, %v1837_v19  ;;  %v1792_v58 = vadd.f32 %v1791_v57, %v1790_v47  ;;  %v1802_v34 = vadd.f32 %v1801_v27, %v1614_v49  ;;  %5402 = vmatpush1.bf16.msra.mxu0 %v8646_v61  ;;  %5746 = vmatpush1.bf16.msra.mxu1 %v8649_v43  ;;  %v8666_v49 = vld [vmem:[%s10445_s0 + $0x5e4] ss:$16 sps:$4 sm:$0xff]   ;;  %v8669_v61 = vld [vmem:[%s10445_s0 + $0x5ec] ss:$16 sps:$4 sm:$0xff]  }
 0x386   : > { %5403 = vmatprep.subr.bf16.mxu0 %v8654_v51  ;;  %5747 = vmatprep.subr.bf16.mxu1 %v8657_v6  ;;  %v2172_v3 = vmax.f32 %v2140_v32, 0.0  ;;  %v2188_v22 = vmax.f32 %v2156_v63, 0.0  ;;  %v2171_v35 = vmax.f32 %v11120_v28, 0.0  ;;  %v2098_v16 = vrot.slane %v11261_v33, %v11952_v9  ;;  %v8667_v27 = vld [vmem:[%s10445_s0 + $0x5e8] ss:$16 sps:$4 sm:$0xff]  }
 0x387   : > { %v2157_v23 = vadd.f32 %v10969_v59, %v11179_v8  ;;  %9208 = vrsqrt.f32 %v1869_v40  ;;  %v1793_v4 = vrot.slane %v1792_v58, 1  ;;  %v1803_v41 = vrot.slane %v1802_v34, 2  ;;  %v8658_v59 = vld [vmem:[%s10445_s0 + $0x5c0] ss:$16 sps:$4 sm:$0xff]   ;;  %v8661_v8 = vld [vmem:[%s10445_s0 + $0x5c8] ss:$16 sps:$4 sm:$0xff]  }
 0x388   : > { %v9203_v1 = vpop.eup %9202  ;;  %v11283_v2 = vpack.c.bf16 %v2188_v22, %v2172_v3  ;;  %v2187_v44 = vmax.f32 %v2155_v11, 0.0  ;;  %v2142_v56 = vadd.f32 %v2098_v16, %v11148_v10  ;;  %v2158_v28 = vadd.f32 %v2098_v16, %v11209_v17  ;;  %v8675_v32 = vld [vmem:[%s10445_s0 + $0x60c] ss:$16 sps:$4 sm:$0xff]   ;;  %v8673_v3 = vld [vmem:[%s10445_s0 + $0x608] ss:$16 sps:$4 sm:$0xff]  }
 0x389   : > { %v1916_v37 = vmul.f32 %v9203_v1, %v11164_v7  ;;  %v1794_v9 = vadd.f32 %v1793_v4, %v1792_v58  ;;  %v1804_v21 = vadd.f32 %v1803_v41, %v1802_v34  ;;  %5404 = vmatpush1.bf16.msra.mxu0 %v8652_v50  ;;  %5748 = vmatpush1.bf16.msra.mxu1 %v8655_v48  ;;  %v2173_v7 = vmax.f32 %v11125_v45, 0.0  ;;  %v8664_v45 = vld [vmem:[%s10445_s0 + $0x5e0] ss:$16 sps:$4 sm:$0xff]   ;;  %v8672_v50 = vld [vmem:[%s10445_s0 + $0x604] ss:$16 sps:$4 sm:$0xff]  }
 0x38a   : > { %v9205_v25 = vpop.eup %9204  ;;  %v2102_v47 = vrot.slane %v11261_v33, %v10659_v31  ;;  %5405 = vmatprep.subr.bf16.mxu0 %v8660_v26  ;;  %5749 = vmatprep.subr.bf16.mxu1 %v8663_v5  ;;  %v11294_v10 = vpack.c.bf16 %v2187_v44, %v2171_v35  ;;  %v2174_v31 = vmax.f32 %v2142_v56, 0.0  ;;  %v2190_v51 = vmax.f32 %v2158_v28, 0.0  ;;  %v8670_v5 = vld [vmem:[%s10445_s0 + $0x600] ss:$16 sps:$4 sm:$0xff]   ;;  %v8679_v4 = vld [vmem:[%s10445_s0 + $0x628] ss:$16 sps:$4 sm:$0xff]  }
 0x38b   : > { %v11298_v17 = vmul.f32 %v11159_v18, %v1916_v37  ;;  %v1918_v43 = vmul.f32 %v9205_v25, %v11174_v42  ;;  %v1836_v29 = vmul.f32 0.125, %v1794_v9  ;;  %v1805_v15 = vrot.slane %v1804_v21, 1  ;;  %v8684_v1 = vld [vmem:[%s10445_s0 + $0x644] ss:$16 sps:$4 sm:$0xff]   ;;  %v8687_v44 = vld [vmem:[%s10445_s0 + $0x64c] ss:$16 sps:$4 sm:$0xff]  }
 0x38c   : > { %v2189_v6 = vmax.f32 %v2157_v23, 0.0  ;;  %v2110_v42 = vrot.slane %v11261_v33, %v10862_v54  ;;  %v11310_v63 = vpack.c.bf16 %v2190_v51, %v2174_v31  ;;  %v2143_v40 = vadd.f32 %v2102_v47, %v11226_v24  ;;  %v8678_v24 = vld [vmem:[%s10445_s0 + $0x624] ss:$16 sps:$4 sm:$0xff]   ;;  %v8682_v9 = vld [vmem:[%s10445_s0 + $0x640] ss:$16 sps:$4 sm:$0xff]  }
 0x38d   : > { %v11302_v12 = vmul.f32 %v11273_v46, %v1918_v43  ;;  %v1868_v19 = vadd.f32 1e-05, %v1836_v29  ;;  %v1806_v57 = vadd.f32 %v1805_v15, %v1804_v21  ;;  %5406 = vmatpush1.bf16.msra.mxu0 %v8658_v59  ;;  %5750 = vmatpush1.bf16.msra.mxu1 %v8661_v8  ;;  %v8685_v21 = vld [vmem:[%s10445_s0 + $0x648] ss:$16 sps:$4 sm:$0xff]   ;;  %v2114_v59 = vrot.slane %v11261_v33, %v10908_v62  ;;  %v8693_v8 = vld [vmem:[%s10445_s0 + $0x66c] ss:$16 sps:$4 sm:$0xff]  }
 0x38e   : > { %v9207_v11 = vpop.eup %9206  ;;  %5407 = vmatprep.subr.bf16.mxu0 %v8666_v49  ;;  %5751 = vmatprep.subr.bf16.mxu1 %v8669_v61  ;;  %v11312_v53 = vpack.c.bf16 %v2189_v6, %v2173_v7  ;;  %v2145_v22 = vadd.f32 %v2110_v42, %v11254_v30  ;;  %v8676_v30 = vld [vmem:[%s10445_s0 + $0x620] ss:$16 sps:$4 sm:$0xff]   ;;  %v8696_v7 = vld [vmem:[%s10445_s0 + $0x684] ss:$16 sps:$4 sm:$0xff]   ;;  %v8699_v43 = vld [vmem:[%s10445_s0 + $0x68c] ss:$16 sps:$4 sm:$0xff]  }
 0x38f   : > { %v1931_v58 = vmul.f32 %v9207_v11, %v11194_v52  ;;  %9210 = vrsqrt.f32 %v1868_v19  ;;  %v1838_v34 = vmul.f32 0.125, %v1806_v57  ;;  %v8681_v52 = vld [vmem:[%s10445_s0 + $0x62c] ss:$16 sps:$4 sm:$0xff]   ;;  %v8688_v62 = vld [vmem:[%s10445_s0 + $0x660] ss:$16 sps:$4 sm:$0xff]   ;;  %v2146_v15 = vadd.f32 %v2114_v59, %v11302_v12 }
 0x390   : > { %v2177_v56 = vmax.f32 %v2145_v22, 0.0  ;;  %v8694_v51 = vld [vmem:[%s10445_s0 + $0x680] ss:$16 sps:$4 sm:$0xff]   ;;  %v8702_v6 = vld [vmem:[%s10445_s0 + $0x6a4] ss:$16 sps:$4 sm:$0xff]  }
 0x391   : > { %v9209_v48 = vpop.eup %9208  ;;  %v2045_v54 = vmul.f32 %v11113_v60, %v1931_v58  ;;  %v1870_v26 = vadd.f32 1e-05, %v1838_v34  ;;  %5408 = vmatpush1.bf16.msra.mxu0 %v8664_v45  ;;  %5752 = vmatpush1.bf16.msra.mxu1 %v8667_v27  ;;  %v2175_v60 = vmax.f32 %v2143_v40, 0.0  ;;  %v8705_v19 = vld [vmem:[%s10445_s0 + $0x6ac] ss:$16 sps:$4 sm:$0xff]   ;;  %v2178_v45 = vmax.f32 %v2146_v15, 0.0 }
 0x392   : > { %v1933_v35 = vmul.f32 %v9209_v48, %v11205_v20  ;;  %5420 = vmatprep.subr.bf16.mxu0 %v8672_v50  ;;  %5764 = vmatprep.subr.bf16.mxu1 %v8675_v32  ;;  %v8700_v27 = vld [vmem:[%s10445_s0 + $0x6a0] ss:$16 sps:$4 sm:$0xff]   ;;  %v8703_v11 = vld [vmem:[%s10445_s0 + $0x6a8] ss:$16 sps:$4 sm:$0xff]   ;;  %v8711_v50 = vld [vmem:[%s10445_s0 + $0x6cc] ss:$16 sps:$4 sm:$0xff]  }
 0x393   : > { %v2159_v16 = vadd.f32 %v2102_v47, %v2045_v54  ;;  %9212 = vrsqrt.f32 %v1870_v26  ;;  %v8706_v40 = vld [vmem:[%s10445_s0 + $0x6c0] ss:$16 sps:$4 sm:$0xff]   ;;  %v8709_v58 = vld [vmem:[%s10445_s0 + $0x6c8] ss:$16 sps:$4 sm:$0xff]   ;;  %v8714_v34 = vld [vmem:[%s10445_s0 + $0x6e4] ss:$16 sps:$4 sm:$0xff]  }
 0x394   : > { %v2047_v23 = vmul.f32 %v11135_v13, %v1933_v35  ;;  %5410 = vmatmul.mubr.bf16.vlgmr.msra.gmra.mrb[16].mxu0 %v11223_v36  ;;  %5754 = vmatmul.mubr.bf16.vlgmr.msra.gmra.mrb[16].mxu1 %v11223_v36  ;;  %v2106_v13 = vrot.slane %v11261_v33, %v11957_v14  ;;  %v8691_v33 = vld [vmem:[%s10445_s0 + $0x668] ss:$16 sps:$4 sm:$0xff]   ;;  %v8717_v48 = vld [vmem:[%s10445_s0 + $0x6ec] ss:$16 sps:$4 sm:$0xff]   ;;  %v8712_v54 = vld [vmem:[%s10445_s0 + $0x6e0] ss:$16 sps:$4 sm:$0xff]  }
 0x395   : > { %5421 = vmatpush1.bf16.msra.mxu0 %v8670_v5  ;;  %5765 = vmatpush1.bf16.msra.mxu1 %v8673_v3  ;;  %v2191_v20 = vmax.f32 %v2159_v16, 0.0  ;;  %v8715_v26 = vld [vmem:[%s10445_s0 + $0x6e8] ss:$16 sps:$4 sm:$0xff]   ;;  %v8720_v5 = vld [vmem:[%s10445_s0 + $0x704] ss:$16 sps:$4 sm:$0xff]  }
 0x396   : > { %v2161_v41 = vadd.f32 %v2110_v42, %v2047_v23  ;;  %5422 = vmatprep.subr.bf16.mxu0 %v8678_v24  ;;  %5766 = vmatprep.subr.bf16.mxu1 %v8681_v52  ;;  %v2144_v25 = vadd.f32 %v2106_v13, %v11298_v17  ;;  %v8708_v42 = vld [vmem:[%s10445_s0 + $0x6c4] ss:$16 sps:$4 sm:$0xff]   ;;  %v8723_v3 = vld [vmem:[%s10445_s0 + $0x70c] ss:$16 sps:$4 sm:$0xff]   ;;  %v8718_v22 = vld [vmem:[%s10445_s0 + $0x700] ss:$16 sps:$4 sm:$0xff]  }
 0x397   : > { %5452 = vmatprep.mubr.bf16.mxu0 %v11258_v38  ;;  %5796 = vmatprep.mubr.bf16.mxu1 %v11258_v38  ;;  %v11334_v36 = vpack.c.bf16 %v2191_v20, %v2175_v60  ;;  %v8690_v38 = vld [vmem:[%s10445_s0 + $0x664] ss:$16 sps:$4 sm:$0xff]   ;;  %v8721_v35 = vld [vmem:[%s10445_s0 + $0x708] ss:$16 sps:$4 sm:$0xff]   ;;  %v8729_v52 = vld [vmem:[%s10445_s0 + $0x72c] ss:$16 sps:$4 sm:$0xff]  }
 0x398   : > { %v2193_v28 = vmax.f32 %v2161_v41, 0.0  ;;  %v2176_v29 = vmax.f32 %v2144_v25, 0.0  ;;  %v8726_v24 = vld [vmem:[%s10445_s0 + $0x724] ss:$16 sps:$4 sm:$0xff]   ;;  %v8724_v16 = vld [vmem:[%s10445_s0 + $0x720] ss:$16 sps:$4 sm:$0xff]  }
 0x399   : > { %v9211_v37 = vpop.eup %9210  ;;  %5423 = vmatpush1.bf16.msra.mxu0 %v8676_v30  ;;  %5767 = vmatpush1.bf16.msra.mxu1 %v8679_v4  ;;  %v8727_v60 = vld [vmem:[%s10445_s0 + $0x728] ss:$16 sps:$4 sm:$0xff]   ;;  %v8732_v23 = vld [vmem:[%s10445_s0 + $0x744] ss:$16 sps:$4 sm:$0xff]   ;;  %v8735_v30 = vld [vmem:[%s10445_s0 + $0x74c] ss:$16 sps:$4 sm:$0xff]  }
 0x39a   : > { %v1932_v14 = vmul.f32 %v9211_v37, %v11231_v55  ;;  %5424 = vmatprep.subr.bf16.mxu0 %v8684_v1  ;;  %5768 = vmatprep.subr.bf16.mxu1 %v8687_v44  ;;  %v11344_v47 = vpack.c.bf16 %v2193_v28, %v2177_v56  ;;  %v8730_v4 = vld [vmem:[%s10445_s0 + $0x740] ss:$16 sps:$4 sm:$0xff]   ;;  %v8733_v20 = vld [vmem:[%s10445_s0 + $0x748] ss:$16 sps:$4 sm:$0xff]   ;;  %v8738_v41 = vld [vmem:[%s10445_s0 + $0x764] ss:$16 sps:$4 sm:$0xff]  }
 0x39b   : > { %v8741_v1 = vld [vmem:[%s10445_s0 + $0x76c] ss:$16 sps:$4 sm:$0xff]   ;;  %v8736_v44 = vld [vmem:[%s10445_s0 + $0x760] ss:$16 sps:$4 sm:$0xff]   ;;  %v8744_v56 = vld [vmem:[%s10445_s0 + $0x784] ss:$16 sps:$4 sm:$0xff]  }
 0x39c   : > { %v2046_v49 = vmul.f32 %v11159_v18, %v1932_v14  ;;  %v8747_v28 = vld [vmem:[%s10445_s0 + $0x78c] ss:$16 sps:$4 sm:$0xff]   ;;  %v8742_v37 = vld [vmem:[%s10445_s0 + $0x780] ss:$16 sps:$4 sm:$0xff]   ;;  %v8769_v15 = vld [vmem:[%s10445_s0 + $0x808] ss:$16 sps:$4 sm:$0xff]  }
 0x39d   : > { %v9213_v61 = vpop.eup %9212  ;;  %5425 = vmatpush1.bf16.msra.mxu0 %v8682_v9  ;;  %5769 = vmatpush1.bf16.msra.mxu1 %v8685_v21  ;;  %v8745_v9 = vld [vmem:[%s10445_s0 + $0x788] ss:$16 sps:$4 sm:$0xff]   ;;  %v8750_v21 = vld [vmem:[%s10445_s0 + $0x7a4] ss:$16 sps:$4 sm:$0xff]   ;;  %v8748_v14 = vld [vmem:[%s10445_s0 + $0x7a0] ss:$16 sps:$4 sm:$0xff]  }
 0x39e   : > { %v1934_v55 = vmul.f32 %v9213_v61, %v11244_v39  ;;  %5426 = vmatprep.subr.bf16.mxu0 %v8690_v38  ;;  %5770 = vmatprep.subr.bf16.mxu1 %v8693_v8  ;;  %v2160_v17 = vadd.f32 %v2106_v13, %v2046_v49  ;;  %v8697_v39 = vld [vmem:[%s10445_s0 + $0x688] ss:$16 sps:$4 sm:$0xff]   ;;  %v8756_v8 = vld [vmem:[%s10445_s0 + $0x7c4] ss:$16 sps:$4 sm:$0xff]   ;;  %v8759_v25 = vld [vmem:[%s10445_s0 + $0x7cc] ss:$16 sps:$4 sm:$0xff]  }
 0x39f   : > { %v8739_v13 = vld [vmem:[%s10445_s0 + $0x768] ss:$16 sps:$4 sm:$0xff]   ;;  %v8754_v49 = vld [vmem:[%s10445_s0 + $0x7c0] ss:$16 sps:$4 sm:$0xff]  }
 0x3a0   : > { %v2048_v18 = vmul.f32 %v11273_v46, %v1934_v55  ;;  %v2192_v31 = vmax.f32 %v2160_v17, 0.0  ;;  %v8751_v38 = vld [vmem:[%s10445_s0 + $0x7a8] ss:$16 sps:$4 sm:$0xff]   ;;  %v8760_v55 = vld [vmem:[%s10445_s0 + $0x7e0] ss:$16 sps:$4 sm:$0xff]  }
 0x3a1   : > { %5427 = vmatpush1.bf16.msra.mxu0 %v8688_v62  ;;  %5771 = vmatpush1.bf16.msra.mxu1 %v8691_v33  ;;  %v8757_v61 = vld [vmem:[%s10445_s0 + $0x7c8] ss:$16 sps:$4 sm:$0xff]   ;;  %v8762_v62 = vld [vmem:[%s10445_s0 + $0x7e4] ss:$16 sps:$4 sm:$0xff]   ;;  %v8765_v33 = vld [vmem:[%s10445_s0 + $0x7ec] ss:$16 sps:$4 sm:$0xff]  }
 0x3a2   : > { %5428 = vmatprep.subr.bf16.mxu0 %v8696_v7  ;;  %5772 = vmatprep.subr.bf16.mxu1 %v8699_v43  ;;  %v11358_v57 = vpack.c.bf16 %v2192_v31, %v2176_v29  ;;  %v2162_v12 = vadd.f32 %v2114_v59, %v2048_v18  ;;  %v8753_v59 = vld [vmem:[%s10445_s0 + $0x7ac] ss:$16 sps:$4 sm:$0xff]   ;;  %v8763_v7 = vld [vmem:[%s10445_s0 + $0x7e8] ss:$16 sps:$4 sm:$0xff]   ;;  %v8768_v43 = vld [vmem:[%s10445_s0 + $0x804] ss:$16 sps:$4 sm:$0xff]  }
 0x3a3   : > { %v8771_v17 = vld [vmem:[%s10445_s0 + $0x80c] ss:$16 sps:$4 sm:$0xff]   ;;  %v8766_v29 = vld [vmem:[%s10445_s0 + $0x800] ss:$16 sps:$4 sm:$0xff]   ;;  %v8774_v18 = vld [vmem:[%s10445_s0 + $0x824] ss:$16 sps:$4 sm:$0xff]  }
 0x3a4   : > { %v2194_v46 = vmax.f32 %v2162_v12, 0.0  ;;  %v8777_v31 = vld [vmem:[%s10445_s0 + $0x82c] ss:$16 sps:$4 sm:$0xff]   ;;  %v8781_v12 = vld [vmem:[%s10445_s0 + $0x848] ss:$16 sps:$4 sm:$0xff]  }
 0x3a5   : > { %5429 = vmatpush1.bf16.msra.mxu0 %v8694_v51  ;;  %5773 = vmatpush1.bf16.msra.mxu1 %v8697_v39  ;;  %v8772_v51 = vld [vmem:[%s10445_s0 + $0x820] ss:$16 sps:$4 sm:$0xff]   ;;  %v8775_v39 = vld [vmem:[%s10445_s0 + $0x828] ss:$16 sps:$4 sm:$0xff]  }
 0x3a6   : > { %5430 = vmatprep.subr.bf16.mxu0 %v8702_v6  ;;  %5774 = vmatprep.subr.bf16.mxu1 %v8705_v19  ;;  %v11364_v32 = vpack.c.bf16 %v2194_v46, %v2178_v45  ;;  %v8780_v6 = vld [vmem:[%s10445_s0 + $0x844] ss:$16 sps:$4 sm:$0xff]   ;;  %v8783_v19 = vld [vmem:[%s10445_s0 + $0x84c] ss:$16 sps:$4 sm:$0xff]  }
 0x3a7   : > { %v8786_v45 = vld [vmem:[%s10445_s0 + $0x864] ss:$16 sps:$4 sm:$0xff]   ;;  %v8789_v46 = vld [vmem:[%s10445_s0 + $0x86c] ss:$16 sps:$4 sm:$0xff]  }
 0x3a9   : > { %5431 = vmatpush1.bf16.msra.mxu0 %v8700_v27  ;;  %5775 = vmatpush1.bf16.msra.mxu1 %v8703_v11  ;;  %v8787_v27 = vld [vmem:[%s10445_s0 + $0x868] ss:$16 sps:$4 sm:$0xff]   ;;  %v8792_v11 = vld [vmem:[%s10445_s0 + $0x884] ss:$16 sps:$4 sm:$0xff]  }
 0x3aa   : > { %5432 = vmatprep.subr.bf16.mxu0 %v8708_v42  ;;  %5776 = vmatprep.subr.bf16.mxu1 %v8711_v50  ;;  %v8795_v42 = vld [vmem:[%s10445_s0 + $0x88c] ss:$16 sps:$4 sm:$0xff]   ;;  %v8790_v50 = vld [vmem:[%s10445_s0 + $0x880] ss:$16 sps:$4 sm:$0xff]  }
 0x3ad   : > { %5433 = vmatpush1.bf16.msra.mxu0 %v8706_v40  ;;  %5777 = vmatpush1.bf16.msra.mxu1 %v8709_v58  ;;  %v8793_v40 = vld [vmem:[%s10445_s0 + $0x888] ss:$16 sps:$4 sm:$0xff]   ;;  %v8798_v58 = vld [vmem:[%s10445_s0 + $0x8a4] ss:$16 sps:$4 sm:$0xff]  }
 0x3ae   : > { %5434 = vmatprep.subr.bf16.mxu0 %v8714_v34  ;;  %5778 = vmatprep.subr.bf16.mxu1 %v8717_v48  ;;  %v8801_v34 = vld [vmem:[%s10445_s0 + $0x8ac] ss:$16 sps:$4 sm:$0xff]   ;;  %v8796_v48 = vld [vmem:[%s10445_s0 + $0x8a0] ss:$16 sps:$4 sm:$0xff]  }
 0x3b1   : > { %5435 = vmatpush1.bf16.msra.mxu0 %v8712_v54  ;;  %5779 = vmatpush1.bf16.msra.mxu1 %v8715_v26  ;;  %v8799_v54 = vld [vmem:[%s10445_s0 + $0x8a8] ss:$16 sps:$4 sm:$0xff]   ;;  %v8804_v26 = vld [vmem:[%s10445_s0 + $0x8c4] ss:$16 sps:$4 sm:$0xff]  }
 0x3b2   : > { %5436 = vmatprep.subr.bf16.mxu0 %v8720_v5  ;;  %5780 = vmatprep.subr.bf16.mxu1 %v8723_v3  ;;  %v8807_v5 = vld [vmem:[%s10445_s0 + $0x8cc] ss:$16 sps:$4 sm:$0xff]   ;;  %v8802_v3 = vld [vmem:[%s10445_s0 + $0x8c0] ss:$16 sps:$4 sm:$0xff]  }
 0x3b5   : > { %5437 = vmatpush1.bf16.msra.mxu0 %v8718_v22  ;;  %5781 = vmatpush1.bf16.msra.mxu1 %v8721_v35  ;;  %v8805_v22 = vld [vmem:[%s10445_s0 + $0x8c8] ss:$16 sps:$4 sm:$0xff]   ;;  %v8810_v35 = vld [vmem:[%s10445_s0 + $0x8e4] ss:$16 sps:$4 sm:$0xff]  }
 0x3b6   : > { %5438 = vmatprep.subr.bf16.mxu0 %v8726_v24  ;;  %5782 = vmatprep.subr.bf16.mxu1 %v8729_v52  ;;  %v8813_v24 = vld [vmem:[%s10445_s0 + $0x8ec] ss:$16 sps:$4 sm:$0xff]   ;;  %v8808_v52 = vld [vmem:[%s10445_s0 + $0x8e0] ss:$16 sps:$4 sm:$0xff]  }
 0x3b9   : > { %5439 = vmatpush1.bf16.msra.mxu0 %v8724_v16  ;;  %5783 = vmatpush1.bf16.msra.mxu1 %v8727_v60  ;;  %v8811_v16 = vld [vmem:[%s10445_s0 + $0x8e8] ss:$16 sps:$4 sm:$0xff]   ;;  %v8816_v60 = vld [vmem:[%s10445_s0 + $0x904] ss:$16 sps:$4 sm:$0xff]  }
 0x3ba   : > { %5440 = vmatprep.subr.bf16.mxu0 %v8732_v23  ;;  %5784 = vmatprep.subr.bf16.mxu1 %v8735_v30  ;;  %v8819_v23 = vld [vmem:[%s10445_s0 + $0x90c] ss:$16 sps:$4 sm:$0xff]   ;;  %v8814_v30 = vld [vmem:[%s10445_s0 + $0x900] ss:$16 sps:$4 sm:$0xff]  }
 0x3bd   : > { %5441 = vmatpush1.bf16.msra.mxu0 %v8730_v4  ;;  %5785 = vmatpush1.bf16.msra.mxu1 %v8733_v20  ;;  %v8817_v4 = vld [vmem:[%s10445_s0 + $0x908] ss:$16 sps:$4 sm:$0xff]   ;;  %v8822_v20 = vld [vmem:[%s10445_s0 + $0x924] ss:$16 sps:$4 sm:$0xff]  }
 0x3be   : > { %5442 = vmatprep.subr.bf16.mxu0 %v8738_v41  ;;  %5786 = vmatprep.subr.bf16.mxu1 %v8741_v1  ;;  %v8825_v41 = vld [vmem:[%s10445_s0 + $0x92c] ss:$16 sps:$4 sm:$0xff]   ;;  %v8820_v1 = vld [vmem:[%s10445_s0 + $0x920] ss:$16 sps:$4 sm:$0xff]  }
 0x3c1   : > { %5443 = vmatpush1.bf16.msra.mxu0 %v8736_v44  ;;  %5787 = vmatpush1.bf16.msra.mxu1 %v8739_v13  ;;  %v8823_v44 = vld [vmem:[%s10445_s0 + $0x928] ss:$16 sps:$4 sm:$0xff]   ;;  %v8828_v13 = vld [vmem:[%s10445_s0 + $0x944] ss:$16 sps:$4 sm:$0xff]  }
 0x3c2   : > { %5444 = vmatprep.subr.bf16.mxu0 %v8744_v56  ;;  %5788 = vmatprep.subr.bf16.mxu1 %v8747_v28  ;;  %v8831_v56 = vld [vmem:[%s10445_s0 + $0x94c] ss:$16 sps:$4 sm:$0xff]   ;;  %v8826_v28 = vld [vmem:[%s10445_s0 + $0x940] ss:$16 sps:$4 sm:$0xff]  }
 0x3c5   : > { %5445 = vmatpush1.bf16.msra.mxu0 %v8742_v37  ;;  %5789 = vmatpush1.bf16.msra.mxu1 %v8745_v9  ;;  %v8829_v37 = vld [vmem:[%s10445_s0 + $0x948] ss:$16 sps:$4 sm:$0xff]   ;;  %v8834_v9 = vld [vmem:[%s10445_s0 + $0x964] ss:$16 sps:$4 sm:$0xff]  }
 0x3c6   : > { %5446 = vmatprep.subr.bf16.mxu0 %v8750_v21  ;;  %5790 = vmatprep.subr.bf16.mxu1 %v8753_v59  ;;  %v8837_v21 = vld [vmem:[%s10445_s0 + $0x96c] ss:$16 sps:$4 sm:$0xff]   ;;  %v8832_v59 = vld [vmem:[%s10445_s0 + $0x960] ss:$16 sps:$4 sm:$0xff]  }
 0x3c9   : > { %5447 = vmatpush1.bf16.msra.mxu0 %v8748_v14  ;;  %5791 = vmatpush1.bf16.msra.mxu1 %v8751_v38  ;;  %v8835_v14 = vld [vmem:[%s10445_s0 + $0x968] ss:$16 sps:$4 sm:$0xff]   ;;  %v8840_v38 = vld [vmem:[%s10445_s0 + $0x984] ss:$16 sps:$4 sm:$0xff]  }
 0x3ca   : > { %5448 = vmatprep.subr.bf16.mxu0 %v8756_v8  ;;  %5792 = vmatprep.subr.bf16.mxu1 %v8759_v25  ;;  %v8843_v8 = vld [vmem:[%s10445_s0 + $0x98c] ss:$16 sps:$4 sm:$0xff]   ;;  %v8838_v25 = vld [vmem:[%s10445_s0 + $0x980] ss:$16 sps:$4 sm:$0xff]  }
 0x3cd   : > { %5449 = vmatpush1.bf16.msra.mxu0 %v8754_v49  ;;  %5793 = vmatpush1.bf16.msra.mxu1 %v8757_v61  ;;  %v8841_v49 = vld [vmem:[%s10445_s0 + $0x988] ss:$16 sps:$4 sm:$0xff]   ;;  %v8846_v61 = vld [vmem:[%s10445_s0 + $0x9a4] ss:$16 sps:$4 sm:$0xff]  }
 0x3ce   : > { %5450 = vmatprep.subr.bf16.mxu0 %v8762_v62  ;;  %5794 = vmatprep.subr.bf16.mxu1 %v8765_v33  ;;  %v8849_v62 = vld [vmem:[%s10445_s0 + $0x9ac] ss:$16 sps:$4 sm:$0xff]   ;;  %v8844_v33 = vld [vmem:[%s10445_s0 + $0x9a0] ss:$16 sps:$4 sm:$0xff]  }
 0x3d1   : > { %5451 = vmatpush1.bf16.msra.mxu0 %v8760_v55  ;;  %5795 = vmatpush1.bf16.msra.mxu1 %v8763_v7  ;;  %v8847_v55 = vld [vmem:[%s10445_s0 + $0x9a8] ss:$16 sps:$4 sm:$0xff]   ;;  %v8852_v7 = vld [vmem:[%s10445_s0 + $0x9c4] ss:$16 sps:$4 sm:$0xff]  }
 0x3d2   : > { %5463 = vmatprep.subr.bf16.mxu0 %v8768_v43  ;;  %5807 = vmatprep.subr.bf16.mxu1 %v8771_v17  ;;  %v8855_v43 = vld [vmem:[%s10445_s0 + $0x9cc] ss:$16 sps:$4 sm:$0xff]   ;;  %v8850_v17 = vld [vmem:[%s10445_s0 + $0x9c0] ss:$16 sps:$4 sm:$0xff]  }
 0x3d4   : > { %5453 = vmatmul.mubr.bf16.vlgmr.msra.gmra.mrb[16].mxu0 %v11265_v0  ;;  %5797 = vmatmul.mubr.bf16.vlgmr.msra.gmra.mrb[16].mxu1 %v11265_v0  ;;  %v8778_v0 = vld [vmem:[%s10445_s0 + $0x840] ss:$16 sps:$4 sm:$0xff]  }
 0x3d5   : > { %5464 = vmatpush1.bf16.msra.mxu0 %v8766_v29  ;;  %5495 = vmatprep.mubr.bf16.mxu0 %v11283_v2  ;;  %v8853_v29 = vld [vmem:[%s10445_s0 + $0x9c8] ss:$16 sps:$4 sm:$0xff]  }
 0x3d6   : > { %5808 = vmatpush1.bf16.msra.mxu1 %v8769_v15  ;;  %5839 = vmatprep.mubr.bf16.mxu1 %v11283_v2  ;;  %v8784_v2 = vld [vmem:[%s10445_s0 + $0x860] ss:$16 sps:$4 sm:$0xff]   ;;  %v8858_v15 = vld [vmem:[%s10445_s0 + $0x9e4] ss:$16 sps:$4 sm:$0xff]  }
 0x3d7   : > { %5465 = vmatprep.subr.bf16.mxu0 %v8774_v18  ;;  %5809 = vmatprep.subr.bf16.mxu1 %v8777_v31  ;;  %v8861_v18 = vld [vmem:[%s10445_s0 + $0x9ec] ss:$16 sps:$4 sm:$0xff]   ;;  %v8856_v31 = vld [vmem:[%s10445_s0 + $0x9e0] ss:$16 sps:$4 sm:$0xff]  }
 0x3d9   : > { %5466 = vmatpush1.bf16.msra.mxu0 %v8772_v51  ;;  %v8859_v51 = vld [vmem:[%s10445_s0 + $0x9e8] ss:$16 sps:$4 sm:$0xff]  }
 0x3da   : > { %5810 = vmatpush1.bf16.msra.mxu1 %v8775_v39  ;;  %5467 = vmatprep.subr.bf16.mxu0 %v8780_v6  ;;  %v8864_v39 = vld [vmem:[%s10445_s0 + $0xa04] ss:$16 sps:$4 sm:$0xff]   ;;  %v8867_v6 = vld [vmem:[%s10445_s0 + $0xa0c] ss:$16 sps:$4 sm:$0xff]  }
 0x3db   : > { %5811 = vmatprep.subr.bf16.mxu1 %v8783_v19  ;;  %v8862_v19 = vld [vmem:[%s10445_s0 + $0xa00] ss:$16 sps:$4 sm:$0xff]  }
 0x3dd   : > { %5468 = vmatpush1.bf16.msra.mxu0 %v8778_v0  ;;  %v8865_v0 = vld [vmem:[%s10445_s0 + $0xa08] ss:$16 sps:$4 sm:$0xff]  }
 0x3de   : > { %5812 = vmatpush1.bf16.msra.mxu1 %v8781_v12  ;;  %5469 = vmatprep.subr.bf16.mxu0 %v8786_v45  ;;  %v8870_v12 = vld [vmem:[%s10445_s0 + $0xa24] ss:$16 sps:$4 sm:$0xff]   ;;  %v8873_v45 = vld [vmem:[%s10445_s0 + $0xa2c] ss:$16 sps:$4 sm:$0xff]  }
 0x3df   : > { %5813 = vmatprep.subr.bf16.mxu1 %v8789_v46  ;;  %v8868_v46 = vld [vmem:[%s10445_s0 + $0xa20] ss:$16 sps:$4 sm:$0xff]  }
 0x3e1   : > { %5470 = vmatpush1.bf16.msra.mxu0 %v8784_v2  ;;  %v8871_v2 = vld [vmem:[%s10445_s0 + $0xa28] ss:$16 sps:$4 sm:$0xff]  }
 0x3e2   : > { %5814 = vmatpush1.bf16.msra.mxu1 %v8787_v27  ;;  %5471 = vmatprep.subr.bf16.mxu0 %v8792_v11  ;;  %v8876_v27 = vld [vmem:[%s10445_s0 + $0xa44] ss:$16 sps:$4 sm:$0xff]   ;;  %v8879_v11 = vld [vmem:[%s10445_s0 + $0xa4c] ss:$16 sps:$4 sm:$0xff]  }
 0x3e3   : > { %5815 = vmatprep.subr.bf16.mxu1 %v8795_v42  ;;  %v8877_v42 = vld [vmem:[%s10445_s0 + $0xa48] ss:$16 sps:$4 sm:$0xff]  }
 0x3e5   : > { %5472 = vmatpush1.bf16.msra.mxu0 %v8790_v50  ;;  %v8882_v50 = vld [vmem:[%s10445_s0 + $0xa64] ss:$16 sps:$4 sm:$0xff]  }
 0x3e6   : > { %5816 = vmatpush1.bf16.msra.mxu1 %v8793_v40  ;;  %5473 = vmatprep.subr.bf16.mxu0 %v8798_v58  ;;  %v8885_v40 = vld [vmem:[%s10445_s0 + $0xa6c] ss:$16 sps:$4 sm:$0xff]   ;;  %v8883_v58 = vld [vmem:[%s10445_s0 + $0xa68] ss:$16 sps:$4 sm:$0xff]  }
 0x3e7   : > { %5817 = vmatprep.subr.bf16.mxu1 %v8801_v34  ;;  %v8888_v34 = vld [vmem:[%s10445_s0 + $0xa84] ss:$16 sps:$4 sm:$0xff]  }
 0x3e9   : > { %5474 = vmatpush1.bf16.msra.mxu0 %v8796_v48  ;;  %v8891_v48 = vld [vmem:[%s10445_s0 + $0xa8c] ss:$16 sps:$4 sm:$0xff]  }
 0x3ea   : > { %5818 = vmatpush1.bf16.msra.mxu1 %v8799_v54  ;;  %5475 = vmatprep.subr.bf16.mxu0 %v8804_v26  ;;  %v8886_v54 = vld [vmem:[%s10445_s0 + $0xa80] ss:$16 sps:$4 sm:$0xff]   ;;  %v8889_v26 = vld [vmem:[%s10445_s0 + $0xa88] ss:$16 sps:$4 sm:$0xff]  }
 0x3eb   : > { %5819 = vmatprep.subr.bf16.mxu1 %v8807_v5  ;;  %v8894_v5 = vld [vmem:[%s10445_s0 + $0xaa4] ss:$16 sps:$4 sm:$0xff]  }
 0x3ed   : > { %5476 = vmatpush1.bf16.msra.mxu0 %v8802_v3  ;;  %v8897_v3 = vld [vmem:[%s10445_s0 + $0xaac] ss:$16 sps:$4 sm:$0xff]  }
 0x3ee   : > { %5820 = vmatpush1.bf16.msra.mxu1 %v8805_v22  ;;  %5477 = vmatprep.subr.bf16.mxu0 %v8810_v35  ;;  %v8892_v22 = vld [vmem:[%s10445_s0 + $0xaa0] ss:$16 sps:$4 sm:$0xff]   ;;  %v8895_v35 = vld [vmem:[%s10445_s0 + $0xaa8] ss:$16 sps:$4 sm:$0xff]  }
 0x3ef   : > { %5821 = vmatprep.subr.bf16.mxu1 %v8813_v24  ;;  %v8900_v24 = vld [vmem:[%s10445_s0 + $0xac4] ss:$16 sps:$4 sm:$0xff]  }
 0x3f1   : > { %5478 = vmatpush1.bf16.msra.mxu0 %v8808_v52  ;;  %v8903_v52 = vld [vmem:[%s10445_s0 + $0xacc] ss:$16 sps:$4 sm:$0xff]  }
 0x3f2   : > { %5822 = vmatpush1.bf16.msra.mxu1 %v8811_v16  ;;  %5479 = vmatprep.subr.bf16.mxu0 %v8816_v60  ;;  %v8898_v16 = vld [vmem:[%s10445_s0 + $0xac0] ss:$16 sps:$4 sm:$0xff]   ;;  %v8901_v60 = vld [vmem:[%s10445_s0 + $0xac8] ss:$16 sps:$4 sm:$0xff]  }
 0x3f3   : > { %5823 = vmatprep.subr.bf16.mxu1 %v8819_v23  ;;  %v8906_v23 = vld [vmem:[%s10445_s0 + $0xae4] ss:$16 sps:$4 sm:$0xff]  }
 0x3f5   : > { %5480 = vmatpush1.bf16.msra.mxu0 %v8814_v30  ;;  %v8909_v30 = vld [vmem:[%s10445_s0 + $0xaec] ss:$16 sps:$4 sm:$0xff]  }
 0x3f6   : > { %5824 = vmatpush1.bf16.msra.mxu1 %v8817_v4  ;;  %5481 = vmatprep.subr.bf16.mxu0 %v8822_v20  ;;  %v8904_v4 = vld [vmem:[%s10445_s0 + $0xae0] ss:$16 sps:$4 sm:$0xff]   ;;  %v8907_v20 = vld [vmem:[%s10445_s0 + $0xae8] ss:$16 sps:$4 sm:$0xff]  }
 0x3f7   : > { %5825 = vmatprep.subr.bf16.mxu1 %v8825_v41  ;;  %v8912_v41 = vld [vmem:[%s10445_s0 + $0xb04] ss:$16 sps:$4 sm:$0xff]  }
 0x3f9   : > { %5482 = vmatpush1.bf16.msra.mxu0 %v8820_v1  ;;  %v8915_v1 = vld [vmem:[%s10445_s0 + $0xb0c] ss:$16 sps:$4 sm:$0xff]  }
 0x3fa   : > { %5826 = vmatpush1.bf16.msra.mxu1 %v8823_v44  ;;  %5483 = vmatprep.subr.bf16.mxu0 %v8828_v13  ;;  %v8910_v44 = vld [vmem:[%s10445_s0 + $0xb00] ss:$16 sps:$4 sm:$0xff]   ;;  %v8913_v13 = vld [vmem:[%s10445_s0 + $0xb08] ss:$16 sps:$4 sm:$0xff]  }
 0x3fb   : > { %5827 = vmatprep.subr.bf16.mxu1 %v8831_v56  ;;  %v8918_v56 = vld [vmem:[%s10445_s0 + $0xb24] ss:$16 sps:$4 sm:$0xff]  }
 0x3fd   : > { %5484 = vmatpush1.bf16.msra.mxu0 %v8826_v28  ;;  %v8921_v28 = vld [vmem:[%s10445_s0 + $0xb2c] ss:$16 sps:$4 sm:$0xff]  }
 0x3fe   : > { %5828 = vmatpush1.bf16.msra.mxu1 %v8829_v37  ;;  %5485 = vmatprep.subr.bf16.mxu0 %v8834_v9  ;;  %v8916_v37 = vld [vmem:[%s10445_s0 + $0xb20] ss:$16 sps:$4 sm:$0xff]   ;;  %v8919_v9 = vld [vmem:[%s10445_s0 + $0xb28] ss:$16 sps:$4 sm:$0xff]  }
 0x3ff   : > { %5829 = vmatprep.subr.bf16.mxu1 %v8837_v21  ;;  %v8924_v21 = vld [vmem:[%s10445_s0 + $0xb44] ss:$16 sps:$4 sm:$0xff]  }
 0x401   : > { %5486 = vmatpush1.bf16.msra.mxu0 %v8832_v59  ;;  %v8927_v59 = vld [vmem:[%s10445_s0 + $0xb4c] ss:$16 sps:$4 sm:$0xff]  }
 0x402   : > { %5830 = vmatpush1.bf16.msra.mxu1 %v8835_v14  ;;  %5487 = vmatprep.subr.bf16.mxu0 %v8840_v38  ;;  %v8922_v14 = vld [vmem:[%s10445_s0 + $0xb40] ss:$16 sps:$4 sm:$0xff]   ;;  %v8925_v38 = vld [vmem:[%s10445_s0 + $0xb48] ss:$16 sps:$4 sm:$0xff]  }
 0x403   : > { %5831 = vmatprep.subr.bf16.mxu1 %v8843_v8  ;;  %v8930_v8 = vld [vmem:[%s10445_s0 + $0xb64] ss:$16 sps:$4 sm:$0xff]  }
 0x405   : > { %5488 = vmatpush1.bf16.msra.mxu0 %v8838_v25  ;;  %v8933_v25 = vld [vmem:[%s10445_s0 + $0xb6c] ss:$16 sps:$4 sm:$0xff]  }
 0x406   : > { %5832 = vmatpush1.bf16.msra.mxu1 %v8841_v49  ;;  %5489 = vmatprep.subr.bf16.mxu0 %v8846_v61  ;;  %v8928_v49 = vld [vmem:[%s10445_s0 + $0xb60] ss:$16 sps:$4 sm:$0xff]   ;;  %v8931_v61 = vld [vmem:[%s10445_s0 + $0xb68] ss:$16 sps:$4 sm:$0xff]  }
 0x407   : > { %5833 = vmatprep.subr.bf16.mxu1 %v8849_v62  ;;  %v8936_v62 = vld [vmem:[%s10445_s0 + $0xb84] ss:$16 sps:$4 sm:$0xff]  }
 0x409   : > { %5490 = vmatpush1.bf16.msra.mxu0 %v8844_v33  ;;  %v8939_v33 = vld [vmem:[%s10445_s0 + $0xb8c] ss:$16 sps:$4 sm:$0xff]  }
 0x40a   : > { %5834 = vmatpush1.bf16.msra.mxu1 %v8847_v55  ;;  %5491 = vmatprep.subr.bf16.mxu0 %v8852_v7  ;;  %v8934_v55 = vld [vmem:[%s10445_s0 + $0xb80] ss:$16 sps:$4 sm:$0xff]   ;;  %v8937_v7 = vld [vmem:[%s10445_s0 + $0xb88] ss:$16 sps:$4 sm:$0xff]  }
 0x40b   : > { %5835 = vmatprep.subr.bf16.mxu1 %v8855_v43  ;;  %v8942_v43 = vld [vmem:[%s10445_s0 + $0xba4] ss:$16 sps:$4 sm:$0xff]  }
 0x40d   : > { %5492 = vmatpush1.bf16.msra.mxu0 %v8850_v17  ;;  %v8945_v17 = vld [vmem:[%s10445_s0 + $0xbac] ss:$16 sps:$4 sm:$0xff]  }
 0x40e   : > { %5836 = vmatpush1.bf16.msra.mxu1 %v8853_v29  ;;  %5493 = vmatprep.subr.bf16.mxu0 %v8858_v15  ;;  %v8940_v29 = vld [vmem:[%s10445_s0 + $0xba0] ss:$16 sps:$4 sm:$0xff]   ;;  %v8943_v15 = vld [vmem:[%s10445_s0 + $0xba8] ss:$16 sps:$4 sm:$0xff]  }
 0x40f   : > { %5837 = vmatprep.subr.bf16.mxu1 %v8861_v18  ;;  %v8948_v18 = vld [vmem:[%s10445_s0 + $0xbc4] ss:$16 sps:$4 sm:$0xff]  }
 0x411   : > { %5494 = vmatpush1.bf16.msra.mxu0 %v8856_v31  ;;  %v8951_v31 = vld [vmem:[%s10445_s0 + $0xbcc] ss:$16 sps:$4 sm:$0xff]  }
 0x412   : > { %5838 = vmatpush1.bf16.msra.mxu1 %v8859_v51  ;;  %5506 = vmatprep.subr.bf16.mxu0 %v8864_v39  ;;  %v8946_v51 = vld [vmem:[%s10445_s0 + $0xbc0] ss:$16 sps:$4 sm:$0xff]   ;;  %v8949_v39 = vld [vmem:[%s10445_s0 + $0xbc8] ss:$16 sps:$4 sm:$0xff]  }
 0x413   : > { %5850 = vmatprep.subr.bf16.mxu1 %v8867_v6  ;;  %v8954_v6 = vld [vmem:[%s10445_s0 + $0xbe4] ss:$16 sps:$4 sm:$0xff]  }
 0x414   : > { %5496 = vmatmul.mubr.bf16.vlgmr.msra.gmra.mrb[16].mxu0 %v11294_v10 }
 0x415   : > { %5840 = vmatmul.mubr.bf16.vlgmr.msra.gmra.mrb[16].mxu1 %v11294_v10  ;;  %5507 = vmatpush1.bf16.msra.mxu0 %v8862_v19  ;;  %v8874_v10 = vld [vmem:[%s10445_s0 + $0xa40] ss:$16 sps:$4 sm:$0xff]   ;;  %v8957_v19 = vld [vmem:[%s10445_s0 + $0xbec] ss:$16 sps:$4 sm:$0xff]  }
 0x416   : > { %5538 = vmatprep.mubr.bf16.mxu0 %v11310_v63  ;;  %5851 = vmatpush1.bf16.msra.mxu1 %v8865_v0  ;;  %v8952_v0 = vld [vmem:[%s10445_s0 + $0xbe0] ss:$16 sps:$4 sm:$0xff]  }
 0x417   : > { %5882 = vmatprep.mubr.bf16.mxu1 %v11310_v63  ;;  %5508 = vmatprep.subr.bf16.mxu0 %v8870_v12  ;;  %v8880_v63 = vld [vmem:[%s10445_s0 + $0xa60] ss:$16 sps:$4 sm:$0xff]   ;;  %v8955_v12 = vld [vmem:[%s10445_s0 + $0xbe8] ss:$16 sps:$4 sm:$0xff]  }
 0x418   : > { %5852 = vmatprep.subr.bf16.mxu1 %v8873_v45  ;;  %v8960_v45 = vld [vmem:[%s10445_s0 + $0xc04] ss:$16 sps:$4 sm:$0xff]  }
 0x419   : > { %5509 = vmatpush1.bf16.msra.mxu0 %v8868_v46  ;;  %v8963_v46 = vld [vmem:[%s10445_s0 + $0xc0c] ss:$16 sps:$4 sm:$0xff]  }
 0x41a   : > { %5853 = vmatpush1.bf16.msra.mxu1 %v8871_v2  ;;  %5510 = vmatprep.subr.bf16.mxu0 %v8876_v27  ;;  %v8958_v2 = vld [vmem:[%s10445_s0 + $0xc00] ss:$16 sps:$4 sm:$0xff]   ;;  %v8961_v27 = vld [vmem:[%s10445_s0 + $0xc08] ss:$16 sps:$4 sm:$0xff]  }
 0x41b   : > { %5854 = vmatprep.subr.bf16.mxu1 %v8879_v11  ;;  %v8966_v11 = vld [vmem:[%s10445_s0 + $0xc24] ss:$16 sps:$4 sm:$0xff]  }
 0x41d   : > { %5511 = vmatpush1.bf16.msra.mxu0 %v8874_v10  ;;  %v8969_v10 = vld [vmem:[%s10445_s0 + $0xc2c] ss:$16 sps:$4 sm:$0xff]  }
 0x41e   : > { %5855 = vmatpush1.bf16.msra.mxu1 %v8877_v42  ;;  %5512 = vmatprep.subr.bf16.mxu0 %v8882_v50  ;;  %v8964_v42 = vld [vmem:[%s10445_s0 + $0xc20] ss:$16 sps:$4 sm:$0xff]   ;;  %v8967_v50 = vld [vmem:[%s10445_s0 + $0xc28] ss:$16 sps:$4 sm:$0xff]  }
 0x41f   : > { %5856 = vmatprep.subr.bf16.mxu1 %v8885_v40  ;;  %v8972_v40 = vld [vmem:[%s10445_s0 + $0xc44] ss:$16 sps:$4 sm:$0xff]  }
 0x421   : > { %5513 = vmatpush1.bf16.msra.mxu0 %v8880_v63  ;;  %v8975_v63 = vld [vmem:[%s10445_s0 + $0xc4c] ss:$16 sps:$4 sm:$0xff]  }
 0x422   : > { %5857 = vmatpush1.bf16.msra.mxu1 %v8883_v58  ;;  %5514 = vmatprep.subr.bf16.mxu0 %v8888_v34  ;;  %v8973_v58 = vld [vmem:[%s10445_s0 + $0xc48] ss:$16 sps:$4 sm:$0xff]   ;;  %v8978_v34 = vld [vmem:[%s10445_s0 + $0xc64] ss:$16 sps:$4 sm:$0xff]  }
 0x423   : > { %5858 = vmatprep.subr.bf16.mxu1 %v8891_v48  ;;  %v8981_v48 = vld [vmem:[%s10445_s0 + $0xc6c] ss:$16 sps:$4 sm:$0xff]  }
 0x425   : > { %5515 = vmatpush1.bf16.msra.mxu0 %v8886_v54  ;;  %v8979_v54 = vld [vmem:[%s10445_s0 + $0xc68] ss:$16 sps:$4 sm:$0xff]  }
 0x426   : > { %5859 = vmatpush1.bf16.msra.mxu1 %v8889_v26  ;;  %5516 = vmatprep.subr.bf16.mxu0 %v8894_v5  ;;  %v8984_v26 = vld [vmem:[%s10445_s0 + $0xc84] ss:$16 sps:$4 sm:$0xff]   ;;  %v8987_v5 = vld [vmem:[%s10445_s0 + $0xc8c] ss:$16 sps:$4 sm:$0xff]  }
 0x427   : > { %5860 = vmatprep.subr.bf16.mxu1 %v8897_v3  ;;  %v8982_v3 = vld [vmem:[%s10445_s0 + $0xc80] ss:$16 sps:$4 sm:$0xff]  }
 0x429   : > { %5517 = vmatpush1.bf16.msra.mxu0 %v8892_v22  ;;  %v8985_v22 = vld [vmem:[%s10445_s0 + $0xc88] ss:$16 sps:$4 sm:$0xff]  }
 0x42a   : > { %5861 = vmatpush1.bf16.msra.mxu1 %v8895_v35  ;;  %5518 = vmatprep.subr.bf16.mxu0 %v8900_v24  ;;  %v8990_v35 = vld [vmem:[%s10445_s0 + $0xca4] ss:$16 sps:$4 sm:$0xff]   ;;  %v8993_v24 = vld [vmem:[%s10445_s0 + $0xcac] ss:$16 sps:$4 sm:$0xff]  }
 0x42b   : > { %5862 = vmatprep.subr.bf16.mxu1 %v8903_v52  ;;  %v8988_v52 = vld [vmem:[%s10445_s0 + $0xca0] ss:$16 sps:$4 sm:$0xff]  }
 0x42d   : > { %5519 = vmatpush1.bf16.msra.mxu0 %v8898_v16  ;;  %v8991_v16 = vld [vmem:[%s10445_s0 + $0xca8] ss:$16 sps:$4 sm:$0xff]  }
 0x42e   : > { %5863 = vmatpush1.bf16.msra.mxu1 %v8901_v60  ;;  %5520 = vmatprep.subr.bf16.mxu0 %v8906_v23  ;;  %v8996_v60 = vld [vmem:[%s10445_s0 + $0xcc4] ss:$16 sps:$4 sm:$0xff]   ;;  %v8999_v23 = vld [vmem:[%s10445_s0 + $0xccc] ss:$16 sps:$4 sm:$0xff]  }
 0x42f   : > { %5864 = vmatprep.subr.bf16.mxu1 %v8909_v30  ;;  %v8994_v30 = vld [vmem:[%s10445_s0 + $0xcc0] ss:$16 sps:$4 sm:$0xff]  }
 0x431   : > { %5521 = vmatpush1.bf16.msra.mxu0 %v8904_v4  ;;  %v8997_v4 = vld [vmem:[%s10445_s0 + $0xcc8] ss:$16 sps:$4 sm:$0xff]  }
 0x432   : > { %5865 = vmatpush1.bf16.msra.mxu1 %v8907_v20  ;;  %5522 = vmatprep.subr.bf16.mxu0 %v8912_v41  ;;  %v9002_v20 = vld [vmem:[%s10445_s0 + $0xce4] ss:$16 sps:$4 sm:$0xff]   ;;  %v9005_v41 = vld [vmem:[%s10445_s0 + $0xcec] ss:$16 sps:$4 sm:$0xff]  }
 0x433   : > { %5866 = vmatprep.subr.bf16.mxu1 %v8915_v1  ;;  %v9000_v1 = vld [vmem:[%s10445_s0 + $0xce0] ss:$16 sps:$4 sm:$0xff]  }
 0x435   : > { %5523 = vmatpush1.bf16.msra.mxu0 %v8910_v44  ;;  %v9003_v44 = vld [vmem:[%s10445_s0 + $0xce8] ss:$16 sps:$4 sm:$0xff]  }
 0x436   : > { %5867 = vmatpush1.bf16.msra.mxu1 %v8913_v13  ;;  %5524 = vmatprep.subr.bf16.mxu0 %v8918_v56  ;;  %v9008_v13 = vld [vmem:[%s10445_s0 + $0xd04] ss:$16 sps:$4 sm:$0xff]   ;;  %v9011_v56 = vld [vmem:[%s10445_s0 + $0xd0c] ss:$16 sps:$4 sm:$0xff]  }
 0x437   : > { %5868 = vmatprep.subr.bf16.mxu1 %v8921_v28  ;;  %v9006_v28 = vld [vmem:[%s10445_s0 + $0xd00] ss:$16 sps:$4 sm:$0xff]  }
 0x439   : > { %5525 = vmatpush1.bf16.msra.mxu0 %v8916_v37  ;;  %v9009_v37 = vld [vmem:[%s10445_s0 + $0xd08] ss:$16 sps:$4 sm:$0xff]  }
 0x43a   : > { %5869 = vmatpush1.bf16.msra.mxu1 %v8919_v9  ;;  %5526 = vmatprep.subr.bf16.mxu0 %v8924_v21  ;;  %v9014_v9 = vld [vmem:[%s10445_s0 + $0xd24] ss:$16 sps:$4 sm:$0xff]   ;;  %v9017_v21 = vld [vmem:[%s10445_s0 + $0xd2c] ss:$16 sps:$4 sm:$0xff]  }
 0x43b   : > { %5870 = vmatprep.subr.bf16.mxu1 %v8927_v59  ;;  %v9012_v59 = vld [vmem:[%s10445_s0 + $0xd20] ss:$16 sps:$4 sm:$0xff]  }
 0x43d   : > { %5527 = vmatpush1.bf16.msra.mxu0 %v8922_v14  ;;  %v9015_v14 = vld [vmem:[%s10445_s0 + $0xd28] ss:$16 sps:$4 sm:$0xff]  }
 0x43e   : > { %5871 = vmatpush1.bf16.msra.mxu1 %v8925_v38  ;;  %5528 = vmatprep.subr.bf16.mxu0 %v8930_v8  ;;  %v9020_v38 = vld [vmem:[%s10445_s0 + $0xd44] ss:$16 sps:$4 sm:$0xff]   ;;  %v9023_v8 = vld [vmem:[%s10445_s0 + $0xd4c] ss:$16 sps:$4 sm:$0xff]  }
 0x43f   : > { %5872 = vmatprep.subr.bf16.mxu1 %v8933_v25  ;;  %v9018_v25 = vld [vmem:[%s10445_s0 + $0xd40] ss:$16 sps:$4 sm:$0xff]  }
 0x441   : > { %5529 = vmatpush1.bf16.msra.mxu0 %v8928_v49  ;;  %v9021_v49 = vld [vmem:[%s10445_s0 + $0xd48] ss:$16 sps:$4 sm:$0xff]  }
 0x442   : > { %5873 = vmatpush1.bf16.msra.mxu1 %v8931_v61  ;;  %5530 = vmatprep.subr.bf16.mxu0 %v8936_v62  ;;  %v9026_v61 = vld [vmem:[%s10445_s0 + $0xd64] ss:$16 sps:$4 sm:$0xff]   ;;  %v9029_v62 = vld [vmem:[%s10445_s0 + $0xd6c] ss:$16 sps:$4 sm:$0xff]  }
 0x443   : > { %5874 = vmatprep.subr.bf16.mxu1 %v8939_v33  ;;  %v9024_v33 = vld [vmem:[%s10445_s0 + $0xd60] ss:$16 sps:$4 sm:$0xff]  }
 0x445   : > { %5531 = vmatpush1.bf16.msra.mxu0 %v8934_v55  ;;  %v9027_v55 = vld [vmem:[%s10445_s0 + $0xd68] ss:$16 sps:$4 sm:$0xff]  }
 0x446   : > { %5875 = vmatpush1.bf16.msra.mxu1 %v8937_v7  ;;  %5532 = vmatprep.subr.bf16.mxu0 %v8942_v43  ;;  %v9032_v7 = vld [vmem:[%s10445_s0 + $0xd84] ss:$16 sps:$4 sm:$0xff]   ;;  %v9035_v43 = vld [vmem:[%s10445_s0 + $0xd8c] ss:$16 sps:$4 sm:$0xff]  }
 0x447   : > { %5876 = vmatprep.subr.bf16.mxu1 %v8945_v17  ;;  %v9030_v17 = vld [vmem:[%s10445_s0 + $0xd80] ss:$16 sps:$4 sm:$0xff]  }
 0x449   : > { %5533 = vmatpush1.bf16.msra.mxu0 %v8940_v29  ;;  %v9033_v29 = vld [vmem:[%s10445_s0 + $0xd88] ss:$16 sps:$4 sm:$0xff]  }
 0x44a   : > { %5877 = vmatpush1.bf16.msra.mxu1 %v8943_v15  ;;  %5534 = vmatprep.subr.bf16.mxu0 %v8948_v18  ;;  %v9038_v15 = vld [vmem:[%s10445_s0 + $0xda4] ss:$16 sps:$4 sm:$0xff]   ;;  %v9041_v18 = vld [vmem:[%s10445_s0 + $0xdac] ss:$16 sps:$4 sm:$0xff]  }
 0x44b   : > { %5878 = vmatprep.subr.bf16.mxu1 %v8951_v31  ;;  %v9036_v31 = vld [vmem:[%s10445_s0 + $0xda0] ss:$16 sps:$4 sm:$0xff]  }
 0x44d   : > { %5535 = vmatpush1.bf16.msra.mxu0 %v8946_v51  ;;  %v9039_v51 = vld [vmem:[%s10445_s0 + $0xda8] ss:$16 sps:$4 sm:$0xff]  }
 0x44e   : > { %5879 = vmatpush1.bf16.msra.mxu1 %v8949_v39  ;;  %5536 = vmatprep.subr.bf16.mxu0 %v8954_v6  ;;  %v9044_v39 = vld [vmem:[%s10445_s0 + $0xdc4] ss:$16 sps:$4 sm:$0xff]   ;;  %v9047_v6 = vld [vmem:[%s10445_s0 + $0xdcc] ss:$16 sps:$4 sm:$0xff]  }
 0x44f   : > { %5880 = vmatprep.subr.bf16.mxu1 %v8957_v19  ;;  %v9042_v19 = vld [vmem:[%s10445_s0 + $0xdc0] ss:$16 sps:$4 sm:$0xff]  }
 0x451   : > { %5537 = vmatpush1.bf16.msra.mxu0 %v8952_v0  ;;  %v9045_v0 = vld [vmem:[%s10445_s0 + $0xdc8] ss:$16 sps:$4 sm:$0xff]  }
 0x452   : > { %5881 = vmatpush1.bf16.msra.mxu1 %v8955_v12  ;;  %5549 = vmatprep.subr.bf16.mxu0 %v8960_v45  ;;  %v9050_v12 = vld [vmem:[%s10445_s0 + $0xde4] ss:$16 sps:$4 sm:$0xff]   ;;  %v9053_v45 = vld [vmem:[%s10445_s0 + $0xdec] ss:$16 sps:$4 sm:$0xff]  }
 0x453   : > { %5893 = vmatprep.subr.bf16.mxu1 %v8963_v46  ;;  %v9048_v46 = vld [vmem:[%s10445_s0 + $0xde0] ss:$16 sps:$4 sm:$0xff]  }
 0x454   : > { %5539 = vmatmul.mubr.bf16.vlgmr.msra.gmra.mrb[16].mxu0 %v11312_v53 }
 0x455   : > { %5883 = vmatmul.mubr.bf16.vlgmr.msra.gmra.mrb[16].mxu1 %v11312_v53  ;;  %5550 = vmatpush1.bf16.msra.mxu0 %v8958_v2  ;;  %v8970_v53 = vld [vmem:[%s10445_s0 + $0xc40] ss:$16 sps:$4 sm:$0xff]   ;;  %v9051_v2 = vld [vmem:[%s10445_s0 + $0xde8] ss:$16 sps:$4 sm:$0xff]  }
 0x456   : > { %5581 = vmatprep.mubr.bf16.mxu0 %v11358_v57  ;;  %5894 = vmatpush1.bf16.msra.mxu1 %v8961_v27  ;;  %v9056_v27 = vld [vmem:[%s10445_s0 + $0xe04] ss:$16 sps:$4 sm:$0xff]  }
 0x457   : > { %5925 = vmatprep.mubr.bf16.mxu1 %v11358_v57  ;;  %5551 = vmatprep.subr.bf16.mxu0 %v8966_v11  ;;  %v8976_v57 = vld [vmem:[%s10445_s0 + $0xc60] ss:$16 sps:$4 sm:$0xff]   ;;  %v9059_v11 = vld [vmem:[%s10445_s0 + $0xe0c] ss:$16 sps:$4 sm:$0xff]  }
 0x458   : > { %5895 = vmatprep.subr.bf16.mxu1 %v8969_v10  ;;  %v9054_v10 = vld [vmem:[%s10445_s0 + $0xe00] ss:$16 sps:$4 sm:$0xff]  }
 0x459   : > { %5552 = vmatpush1.bf16.msra.mxu0 %v8964_v42  ;;  %v9057_v42 = vld [vmem:[%s10445_s0 + $0xe08] ss:$16 sps:$4 sm:$0xff]  }
 0x45a   : > { %5896 = vmatpush1.bf16.msra.mxu1 %v8967_v50  ;;  %5553 = vmatprep.subr.bf16.mxu0 %v8972_v40  ;;  %v9062_v50 = vld [vmem:[%s10445_s0 + $0xe24] ss:$16 sps:$4 sm:$0xff]   ;;  %v9065_v40 = vld [vmem:[%s10445_s0 + $0xe2c] ss:$16 sps:$4 sm:$0xff]  }
 0x45b   : > { %5897 = vmatprep.subr.bf16.mxu1 %v8975_v63  ;;  %v9060_v63 = vld [vmem:[%s10445_s0 + $0xe20] ss:$16 sps:$4 sm:$0xff]  }
 0x45d   : > { %5554 = vmatpush1.bf16.msra.mxu0 %v8970_v53  ;;  %v9063_v53 = vld [vmem:[%s10445_s0 + $0xe28] ss:$16 sps:$4 sm:$0xff]  }
 0x45e   : > { %5898 = vmatpush1.bf16.msra.mxu1 %v8973_v58  ;;  %5555 = vmatprep.subr.bf16.mxu0 %v8978_v34  ;;  %v9068_v58 = vld [vmem:[%s10445_s0 + $0xe44] ss:$16 sps:$4 sm:$0xff]   ;;  %v9071_v34 = vld [vmem:[%s10445_s0 + $0xe4c] ss:$16 sps:$4 sm:$0xff]  }
 0x45f   : > { %5899 = vmatprep.subr.bf16.mxu1 %v8981_v48  ;;  %v9069_v48 = vld [vmem:[%s10445_s0 + $0xe48] ss:$16 sps:$4 sm:$0xff]  }
 0x461   : > { %5556 = vmatpush1.bf16.msra.mxu0 %v8976_v57  ;;  %v9074_v57 = vld [vmem:[%s10445_s0 + $0xe64] ss:$16 sps:$4 sm:$0xff]  }
 0x462   : > { %5900 = vmatpush1.bf16.msra.mxu1 %v8979_v54  ;;  %5557 = vmatprep.subr.bf16.mxu0 %v8984_v26  ;;  %v9077_v54 = vld [vmem:[%s10445_s0 + $0xe6c] ss:$16 sps:$4 sm:$0xff]   ;;  %v9075_v26 = vld [vmem:[%s10445_s0 + $0xe68] ss:$16 sps:$4 sm:$0xff]  }
 0x463   : > { %5901 = vmatprep.subr.bf16.mxu1 %v8987_v5  ;;  %v9080_v5 = vld [vmem:[%s10445_s0 + $0xe84] ss:$16 sps:$4 sm:$0xff]  }
 0x465   : > { %5558 = vmatpush1.bf16.msra.mxu0 %v8982_v3  ;;  %v9083_v3 = vld [vmem:[%s10445_s0 + $0xe8c] ss:$16 sps:$4 sm:$0xff]  }
 0x466   : > { %5902 = vmatpush1.bf16.msra.mxu1 %v8985_v22  ;;  %5559 = vmatprep.subr.bf16.mxu0 %v8990_v35  ;;  %v9078_v22 = vld [vmem:[%s10445_s0 + $0xe80] ss:$16 sps:$4 sm:$0xff]   ;;  %v9081_v35 = vld [vmem:[%s10445_s0 + $0xe88] ss:$16 sps:$4 sm:$0xff]  }
 0x467   : > { %5903 = vmatprep.subr.bf16.mxu1 %v8993_v24  ;;  %v9086_v24 = vld [vmem:[%s10445_s0 + $0xea4] ss:$16 sps:$4 sm:$0xff]  }
 0x469   : > { %5560 = vmatpush1.bf16.msra.mxu0 %v8988_v52  ;;  %v9089_v52 = vld [vmem:[%s10445_s0 + $0xeac] ss:$16 sps:$4 sm:$0xff]  }
 0x46a   : > { %5904 = vmatpush1.bf16.msra.mxu1 %v8991_v16  ;;  %5561 = vmatprep.subr.bf16.mxu0 %v8996_v60  ;;  %v9084_v16 = vld [vmem:[%s10445_s0 + $0xea0] ss:$16 sps:$4 sm:$0xff]   ;;  %v9087_v60 = vld [vmem:[%s10445_s0 + $0xea8] ss:$16 sps:$4 sm:$0xff]  }
 0x46b   : > { %5905 = vmatprep.subr.bf16.mxu1 %v8999_v23  ;;  %v9092_v23 = vld [vmem:[%s10445_s0 + $0xec4] ss:$16 sps:$4 sm:$0xff]  }
 0x46d   : > { %5562 = vmatpush1.bf16.msra.mxu0 %v8994_v30  ;;  %v9095_v30 = vld [vmem:[%s10445_s0 + $0xecc] ss:$16 sps:$4 sm:$0xff]  }
 0x46e   : > { %5906 = vmatpush1.bf16.msra.mxu1 %v8997_v4  ;;  %5563 = vmatprep.subr.bf16.mxu0 %v9002_v20  ;;  %v9090_v4 = vld [vmem:[%s10445_s0 + $0xec0] ss:$16 sps:$4 sm:$0xff]   ;;  %v9093_v20 = vld [vmem:[%s10445_s0 + $0xec8] ss:$16 sps:$4 sm:$0xff]  }
 0x46f   : > { %5907 = vmatprep.subr.bf16.mxu1 %v9005_v41  ;;  %v9098_v41 = vld [vmem:[%s10445_s0 + $0xee4] ss:$16 sps:$4 sm:$0xff]  }
 0x471   : > { %5564 = vmatpush1.bf16.msra.mxu0 %v9000_v1  ;;  %v9101_v1 = vld [vmem:[%s10445_s0 + $0xeec] ss:$16 sps:$4 sm:$0xff]  }
 0x472   : > { %5908 = vmatpush1.bf16.msra.mxu1 %v9003_v44  ;;  %5565 = vmatprep.subr.bf16.mxu0 %v9008_v13  ;;  %v9096_v44 = vld [vmem:[%s10445_s0 + $0xee0] ss:$16 sps:$4 sm:$0xff]   ;;  %v9099_v13 = vld [vmem:[%s10445_s0 + $0xee8] ss:$16 sps:$4 sm:$0xff]  }
 0x473   : > { %5909 = vmatprep.subr.bf16.mxu1 %v9011_v56  ;;  %v9104_v56 = vld [vmem:[%s10445_s0 + $0xf04] ss:$16 sps:$4 sm:$0xff]  }
 0x475   : > { %5566 = vmatpush1.bf16.msra.mxu0 %v9006_v28  ;;  %v9107_v28 = vld [vmem:[%s10445_s0 + $0xf0c] ss:$16 sps:$4 sm:$0xff]  }
 0x476   : > { %5910 = vmatpush1.bf16.msra.mxu1 %v9009_v37  ;;  %5567 = vmatprep.subr.bf16.mxu0 %v9014_v9  ;;  %v9102_v37 = vld [vmem:[%s10445_s0 + $0xf00] ss:$16 sps:$4 sm:$0xff]   ;;  %v9105_v9 = vld [vmem:[%s10445_s0 + $0xf08] ss:$16 sps:$4 sm:$0xff]  }
 0x477   : > { %5911 = vmatprep.subr.bf16.mxu1 %v9017_v21  ;;  %v9110_v21 = vld [vmem:[%s10445_s0 + $0xf24] ss:$16 sps:$4 sm:$0xff]  }
 0x479   : > { %5568 = vmatpush1.bf16.msra.mxu0 %v9012_v59  ;;  %v9113_v59 = vld [vmem:[%s10445_s0 + $0xf2c] ss:$16 sps:$4 sm:$0xff]  }
 0x47a   : > { %5912 = vmatpush1.bf16.msra.mxu1 %v9015_v14  ;;  %5569 = vmatprep.subr.bf16.mxu0 %v9020_v38  ;;  %v9108_v14 = vld [vmem:[%s10445_s0 + $0xf20] ss:$16 sps:$4 sm:$0xff]   ;;  %v9111_v38 = vld [vmem:[%s10445_s0 + $0xf28] ss:$16 sps:$4 sm:$0xff]  }
 0x47b   : > { %5913 = vmatprep.subr.bf16.mxu1 %v9023_v8  ;;  %v9116_v8 = vld [vmem:[%s10445_s0 + $0xf44] ss:$16 sps:$4 sm:$0xff]  }
 0x47d   : > { %5570 = vmatpush1.bf16.msra.mxu0 %v9018_v25  ;;  %v9119_v25 = vld [vmem:[%s10445_s0 + $0xf4c] ss:$16 sps:$4 sm:$0xff]  }
 0x47e   : > { %5914 = vmatpush1.bf16.msra.mxu1 %v9021_v49  ;;  %5571 = vmatprep.subr.bf16.mxu0 %v9026_v61  ;;  %v9114_v49 = vld [vmem:[%s10445_s0 + $0xf40] ss:$16 sps:$4 sm:$0xff]   ;;  %v9117_v61 = vld [vmem:[%s10445_s0 + $0xf48] ss:$16 sps:$4 sm:$0xff]  }
 0x47f   : > { %5915 = vmatprep.subr.bf16.mxu1 %v9029_v62  ;;  %v9122_v62 = vld [vmem:[%s10445_s0 + $0xf64] ss:$16 sps:$4 sm:$0xff]  }
 0x481   : > { %5572 = vmatpush1.bf16.msra.mxu0 %v9024_v33  ;;  %v9125_v33 = vld [vmem:[%s10445_s0 + $0xf6c] ss:$16 sps:$4 sm:$0xff]  }
 0x482   : > { %5916 = vmatpush1.bf16.msra.mxu1 %v9027_v55  ;;  %5573 = vmatprep.subr.bf16.mxu0 %v9032_v7  ;;  %v9120_v55 = vld [vmem:[%s10445_s0 + $0xf60] ss:$16 sps:$4 sm:$0xff]   ;;  %v9123_v7 = vld [vmem:[%s10445_s0 + $0xf68] ss:$16 sps:$4 sm:$0xff]  }
 0x483   : > { %5917 = vmatprep.subr.bf16.mxu1 %v9035_v43  ;;  %v9128_v43 = vld [vmem:[%s10445_s0 + $0xf84] ss:$16 sps:$4 sm:$0xff]  }
 0x485   : > { %5574 = vmatpush1.bf16.msra.mxu0 %v9030_v17  ;;  %v9131_v17 = vld [vmem:[%s10445_s0 + $0xf8c] ss:$16 sps:$4 sm:$0xff]  }
 0x486   : > { %5918 = vmatpush1.bf16.msra.mxu1 %v9033_v29  ;;  %5575 = vmatprep.subr.bf16.mxu0 %v9038_v15  ;;  %v9126_v29 = vld [vmem:[%s10445_s0 + $0xf80] ss:$16 sps:$4 sm:$0xff]   ;;  %v9129_v15 = vld [vmem:[%s10445_s0 + $0xf88] ss:$16 sps:$4 sm:$0xff]  }
 0x487   : > { %5919 = vmatprep.subr.bf16.mxu1 %v9041_v18  ;;  %v9134_v18 = vld [vmem:[%s10445_s0 + $0xfa4] ss:$16 sps:$4 sm:$0xff]  }
 0x489   : > { %5576 = vmatpush1.bf16.msra.mxu0 %v9036_v31  ;;  %v9137_v31 = vld [vmem:[%s10445_s0 + $0xfac] ss:$16 sps:$4 sm:$0xff]  }
 0x48a   : > { %5920 = vmatpush1.bf16.msra.mxu1 %v9039_v51  ;;  %5577 = vmatprep.subr.bf16.mxu0 %v9044_v39  ;;  %v9132_v51 = vld [vmem:[%s10445_s0 + $0xfa0] ss:$16 sps:$4 sm:$0xff]   ;;  %v9135_v39 = vld [vmem:[%s10445_s0 + $0xfa8] ss:$16 sps:$4 sm:$0xff]  }
 0x48b   : > { %5921 = vmatprep.subr.bf16.mxu1 %v9047_v6  ;;  %v9140_v6 = vld [vmem:[%s10445_s0 + $0xfc4] ss:$16 sps:$4 sm:$0xff]  }
 0x48d   : > { %5578 = vmatpush1.bf16.msra.mxu0 %v9042_v19  ;;  %v9143_v19 = vld [vmem:[%s10445_s0 + $0xfcc] ss:$16 sps:$4 sm:$0xff]  }
 0x48e   : > { %5922 = vmatpush1.bf16.msra.mxu1 %v9045_v0  ;;  %5579 = vmatprep.subr.bf16.mxu0 %v9050_v12  ;;  %v9138_v0 = vld [vmem:[%s10445_s0 + $0xfc0] ss:$16 sps:$4 sm:$0xff]   ;;  %v9141_v12 = vld [vmem:[%s10445_s0 + $0xfc8] ss:$16 sps:$4 sm:$0xff]  }
 0x48f   : > { %5923 = vmatprep.subr.bf16.mxu1 %v9053_v45  ;;  %v9146_v45 = vld [vmem:[%s10445_s0 + $0xfe4] ss:$16 sps:$4 sm:$0xff]  }
 0x491   : > { %5580 = vmatpush1.bf16.msra.mxu0 %v9048_v46  ;;  %v9149_v46 = vld [vmem:[%s10445_s0 + $0xfec] ss:$16 sps:$4 sm:$0xff]  }
 0x492   : > { %5924 = vmatpush1.bf16.msra.mxu1 %v9051_v2  ;;  %5592 = vmatprep.subr.bf16.mxu0 %v9056_v27  ;;  %v9144_v2 = vld [vmem:[%s10445_s0 + $0xfe0] ss:$16 sps:$4 sm:$0xff]   ;;  %v9147_v27 = vld [vmem:[%s10445_s0 + $0xfe8] ss:$16 sps:$4 sm:$0xff]  }
 0x493   : > { %5936 = vmatprep.subr.bf16.mxu1 %v9059_v11  ;;  %v2195_v11 = vld [vmem:[#allocation2] sm:$0xff] }
 0x494   : > { %5582 = vmatmul.mubr.bf16.vlgmr.msra.gmra.mrb[16].mxu0 %v11334_v36 }
 0x495   : > { %5926 = vmatmul.mubr.bf16.vlgmr.msra.gmra.mrb[16].mxu1 %v11334_v36  ;;  %5593 = vmatpush1.bf16.msra.mxu0 %v9054_v10  ;;  %v9066_v36 = vld [vmem:[%s10445_s0 + $0xe40] ss:$16 sps:$4 sm:$0xff]   ;;  %v2197_v10 = vld [vmem:[#allocation2 + $0x10] sm:$0xff] }
 0x496   : > { %5624 = vmatprep.mubr.bf16.mxu0 %v11364_v32  ;;  %5937 = vmatpush1.bf16.msra.mxu1 %v9057_v42  ;;  %v2196_v42 = vld [vmem:[#allocation2 + $0x8] sm:$0xff] }
 0x497   : > { %5968 = vmatprep.mubr.bf16.mxu1 %v11364_v32  ;;  %5594 = vmatprep.subr.bf16.mxu0 %v9062_v50  ;;  %v9072_v32 = vld [vmem:[%s10445_s0 + $0xe60] ss:$16 sps:$4 sm:$0xff]  }
 0x498   : > { %5938 = vmatprep.subr.bf16.mxu1 %v9065_v40  ;;  %v2198_v40 = vld [vmem:[#allocation2 + $0x18] sm:$0xff] }
 0x499   : > { %5595 = vmatpush1.bf16.msra.mxu0 %v9060_v63  ;;  %v2199_v63 = vld [vmem:[#allocation2 + $0x20] sm:$0xff] }
 0x49a   : > { %5939 = vmatpush1.bf16.msra.mxu1 %v9063_v53  ;;  %5596 = vmatprep.subr.bf16.mxu0 %v9068_v58 }
 0x49b   : > { %5940 = vmatprep.subr.bf16.mxu1 %v9071_v34 }
 0x49d   : > { %5597 = vmatpush1.bf16.msra.mxu0 %v9066_v36  ;;  %v2201_v36 = vld [vmem:[#allocation2 + $0x30] sm:$0xff] }
 0x49e   : > { %5941 = vmatpush1.bf16.msra.mxu1 %v9069_v48  ;;  %5598 = vmatprep.subr.bf16.mxu0 %v9074_v57  ;;  %v2200_v48 = vld [vmem:[#allocation2 + $0x28] sm:$0xff] }
 0x49f   : > { %5942 = vmatprep.subr.bf16.mxu1 %v9077_v54 }
 0x4a1   : > { %5599 = vmatpush1.bf16.msra.mxu0 %v9072_v32 }
 0x4a2   : > { %5943 = vmatpush1.bf16.msra.mxu1 %v9075_v26  ;;  %5600 = vmatprep.subr.bf16.mxu0 %v9080_v5  ;;  %v2202_v5 = vld [vmem:[#allocation2 + $0x38] sm:$0xff] }
 0x4a3   : > { %5944 = vmatprep.subr.bf16.mxu1 %v9083_v3 }
 0x4a5   : > { %5601 = vmatpush1.bf16.msra.mxu0 %v9078_v22 }
 0x4a6   : > { %5945 = vmatpush1.bf16.msra.mxu1 %v9081_v35  ;;  %5602 = vmatprep.subr.bf16.mxu0 %v9086_v24 }
 0x4a7   : > { %5946 = vmatprep.subr.bf16.mxu1 %v9089_v52 }
 0x4a9   : > { %5603 = vmatpush1.bf16.msra.mxu0 %v9084_v16 }
 0x4aa   : > { %5947 = vmatpush1.bf16.msra.mxu1 %v9087_v60  ;;  %5604 = vmatprep.subr.bf16.mxu0 %v9092_v23  ;;  %v9217_v23 = vld [vmem:[#allocation15 + $0x4] ss:$8 sps:$4 sm:$0xff] (!%p7983_p5)  }
 0x4ab   : > { %5948 = vmatprep.subr.bf16.mxu1 %v9095_v30  ;;  %v9219_v30 = vld [vmem:[#allocation15] ss:$8 sps:$4 sm:$0xff] (!%p7983_p5)  }
 0x4ad   : > { %5605 = vmatpush1.bf16.msra.mxu0 %v9090_v4  ;;  %v9220_v4 = vld [vmem:[#allocation15 + $0x14] ss:$8 sps:$4 sm:$0xff] (!%p7983_p5)  }
 0x4ae   : > { %5949 = vmatpush1.bf16.msra.mxu1 %v9093_v20  ;;  %5606 = vmatprep.subr.bf16.mxu0 %v9098_v41  ;;  %v9222_v20 = vld [vmem:[#allocation15 + $0x10] ss:$8 sps:$4 sm:$0xff] (!%p7983_p5)   ;;  %v9223_v41 = vld [vmem:[#allocation15 + $0x24] ss:$8 sps:$4 sm:$0xff] (!%p7983_p5)  }
 0x4af   : > { %5950 = vmatprep.subr.bf16.mxu1 %v9101_v1  ;;  %v9225_v1 = vld [vmem:[#allocation15 + $0x20] ss:$8 sps:$4 sm:$0xff] (!%p7983_p5)  }
 0x4b1   : > { %5607 = vmatpush1.bf16.msra.mxu0 %v9096_v44  ;;  %v9226_v44 = vld [vmem:[#allocation15 + $0x34] ss:$8 sps:$4 sm:$0xff] (!%p7983_p5)  }
 0x4b2   : > { %5951 = vmatpush1.bf16.msra.mxu1 %v9099_v13  ;;  %5608 = vmatprep.subr.bf16.mxu0 %v9104_v56  ;;  %v9228_v13 = vld [vmem:[#allocation15 + $0x30] ss:$8 sps:$4 sm:$0xff] (!%p7983_p5)   ;;  %v9229_v56 = vld [vmem:[#allocation15 + $0x44] ss:$8 sps:$4 sm:$0xff] (!%p7983_p5)  }
 0x4b3   : > { %5952 = vmatprep.subr.bf16.mxu1 %v9107_v28  ;;  %v9231_v28 = vld [vmem:[#allocation15 + $0x40] ss:$8 sps:$4 sm:$0xff] (!%p7983_p5)  }
 0x4b5   : > { %5609 = vmatpush1.bf16.msra.mxu0 %v9102_v37  ;;  %v9232_v37 = vld [vmem:[#allocation15 + $0x54] ss:$8 sps:$4 sm:$0xff] (!%p7983_p5)  }
 0x4b6   : > { %5953 = vmatpush1.bf16.msra.mxu1 %v9105_v9  ;;  %5610 = vmatprep.subr.bf16.mxu0 %v9110_v21  ;;  %v9234_v9 = vld [vmem:[#allocation15 + $0x50] ss:$8 sps:$4 sm:$0xff] (!%p7983_p5)   ;;  %v9235_v21 = vld [vmem:[#allocation15 + $0x64] ss:$8 sps:$4 sm:$0xff] (!%p7983_p5)  }
 0x4b7   : > { %5954 = vmatprep.subr.bf16.mxu1 %v9113_v59 }
 0x4b9   : > { %5611 = vmatpush1.bf16.msra.mxu0 %v9108_v14 }
 0x4ba   : > { %5955 = vmatpush1.bf16.msra.mxu1 %v9111_v38  ;;  %5612 = vmatprep.subr.bf16.mxu0 %v9116_v8 }
 0x4bb   : > { %5956 = vmatprep.subr.bf16.mxu1 %v9119_v25  ;;  %v9237_v25 = vld [vmem:[#allocation15 + $0x60] ss:$8 sps:$4 sm:$0xff] (!%p7983_p5)  }
 0x4bd   : > { %5613 = vmatpush1.bf16.msra.mxu0 %v9114_v49  ;;  %v9238_v49 = vld [vmem:[#allocation15 + $0x74] ss:$8 sps:$4 sm:$0xff] (!%p7983_p5)  }
 0x4be   : > { %5957 = vmatpush1.bf16.msra.mxu1 %v9117_v61  ;;  %5614 = vmatprep.subr.bf16.mxu0 %v9122_v62 }
 0x4bf   : > { %5958 = vmatprep.subr.bf16.mxu1 %v9125_v33 }
 0x4c1   : > { %5615 = vmatpush1.bf16.msra.mxu0 %v9120_v55 }
 0x4c2   : > { %5959 = vmatpush1.bf16.msra.mxu1 %v9123_v7  ;;  %5616 = vmatprep.subr.bf16.mxu0 %v9128_v43 }
 0x4c3   : > { %5960 = vmatprep.subr.bf16.mxu1 %v9131_v17 }
 0x4c5   : > { %5617 = vmatpush1.bf16.msra.mxu0 %v9126_v29 }
 0x4c6   : > { %5961 = vmatpush1.bf16.msra.mxu1 %v9129_v15  ;;  %5618 = vmatprep.subr.bf16.mxu0 %v9134_v18  ;;  %v9240_v15 = vld [vmem:[#allocation15 + $0x70] ss:$8 sps:$4 sm:$0xff] (!%p7983_p5)  }
 0x4c7   : > { %5962 = vmatprep.subr.bf16.mxu1 %v9137_v31 }
 0x4c9   : > { %5619 = vmatpush1.bf16.msra.mxu0 %v9132_v51  ;;  %v9241_v51 = vld [vmem:[#allocation15 + $0x84] ss:$8 sps:$4 sm:$0xff] (!%p7983_p5)  }
 0x4ca   : > { %5963 = vmatpush1.bf16.msra.mxu1 %v9135_v39  ;;  %5620 = vmatprep.subr.bf16.mxu0 %v9140_v6 }
 0x4cb   : > { %5964 = vmatprep.subr.bf16.mxu1 %v9143_v19 }
 0x4cd   : > { %5621 = vmatpush1.bf16.msra.mxu0 %v9138_v0 }
 0x4ce   : > { %5965 = vmatpush1.bf16.msra.mxu1 %v9141_v12  ;;  %5622 = vmatprep.subr.bf16.mxu0 %v9146_v45 }
 0x4cf   : > { %5966 = vmatprep.subr.bf16.mxu1 %v9149_v46  ;;  %v9243_v46 = vld [vmem:[#allocation15 + $0x80] ss:$8 sps:$4 sm:$0xff] (!%p7983_p5)  }
 0x4d1   : > { %5623 = vmatpush1.bf16.msra.mxu0 %v9144_v2 }
 0x4d2   : > { %5967 = vmatpush1.bf16.msra.mxu1 %v9147_v27  ;;  %6615 = vmatprep.subr.bf16.mxu0 (!%p7983_p5), %v9217_v23 }
 0x4d4   : > { %5625 = vmatmul.mubr.bf16.vlgmr.msra.gmra.mrb[16].mxu0 %v11344_v47 }
 0x4d5   : > { %5969 = vmatmul.mubr.bf16.vlgmr.msra.gmra.mrb[16].mxu1 %v11344_v47  ;;  %6616 = vmatpush1.bf16.msra.mxu0 (!%p7983_p5), %v9219_v30 }
 0x4d6   : > { %6617 = vmatprep.subr.bf16.mxu0 (!%p7983_p5), %v9220_v4 }
 0x4d9   : > { %6618 = vmatpush1.bf16.msra.mxu0 (!%p7983_p5), %v9222_v20  ;;  %v9252_v20 = vld [vmem:[#allocation15 + $0xb0] ss:$8 sps:$4 sm:$0xff] (!%p7983_p5)  }
 0x4da   : > { %6619 = vmatprep.subr.bf16.mxu0 (!%p7983_p5), %v9223_v41 }
 0x4dd   : > { %6620 = vmatpush1.bf16.msra.mxu0 (!%p7983_p5), %v9225_v1 }
 0x4de   : > { %6621 = vmatprep.subr.bf16.mxu0 (!%p7983_p5), %v9226_v44  ;;  %v9253_v44 = vld [vmem:[#allocation15 + $0xc4] ss:$8 sps:$4 sm:$0xff] (!%p7983_p5)  }
 0x4e1   : > { %6622 = vmatpush1.bf16.msra.mxu0 (!%p7983_p5), %v9228_v13 }
 0x4e2   : > { %6623 = vmatprep.subr.bf16.mxu0 (!%p7983_p5), %v9229_v56 }
 0x4e5   : > { %6624 = vmatpush1.bf16.msra.mxu0 (!%p7983_p5), %v9231_v28  ;;  %v9255_v28 = vld [vmem:[#allocation15 + $0xc0] ss:$8 sps:$4 sm:$0xff] (!%p7983_p5)  }
 0x4e6   : > { %6625 = vmatprep.subr.bf16.mxu0 (!%p7983_p5), %v9232_v37 }
 0x4e9   : > { %6626 = vmatpush1.bf16.msra.mxu0 (!%p7983_p5), %v9234_v9 }
 0x4ea   : > { %6627 = vmatprep.subr.bf16.mxu0 (!%p7983_p5), %v9235_v21 }
 0x4ed   : > { %6628 = vmatpush1.bf16.msra.mxu0 (!%p7983_p5), %v9237_v25 }
 0x4ee   : > { %6629 = vmatprep.subr.bf16.mxu0 (!%p7983_p5), %v9238_v49 }
 0x4f1   : > { %6630 = vmatpush1.bf16.msra.mxu0 (!%p7983_p5), %v9240_v15 }
 0x4f2   : > { %6631 = vmatprep.subr.bf16.mxu0 (!%p7983_p5), %v9241_v51 }
 0x4f5   : > { %6632 = vmatpush1.bf16.msra.mxu0 (!%p7983_p5), %v9243_v46 }
 0x5a7   : > { %v5626_v50 = vpop.f32.mrb[16].mxu0 }
 0x5a8   : > { %v5979_v53 = vadd.f32 %v5626_v50, %v2195_v11  ;;  %v5970_v58 = vpop.f32.mrb[16].mxu1  ;;  %v5628_v34 = vpop.f32.mrb[17].mxu0  ;;  %5998 = sbr.rel (%p7983_p5) target bundleno = 2342 (0x926), region = 148  ;;  %v9244_v11 = vld [vmem:[#allocation15 + $0x94] ss:$8 sps:$4 sm:$0xff] (!%p7983_p5)  }
 0x5a9   : > { %v5981_v57 = vadd.f32 %v5970_v58, %v2197_v10  ;;  %v5980_v54 = vadd.f32 %v5628_v34, %v2196_v42  ;;  %v5972_v32 = vpop.f32.mrb[17].mxu1  ;;  %v5630_v26 = vpop.f32.mrb[18].mxu0  ;;  %v9246_v58 = vld [vmem:[#allocation15 + $0x90] ss:$8 sps:$4 sm:$0xff] (!%p7983_p5)   ;;  %6633 = vmatprep.subr.bf16.mxu0 (!%p7983_p5), %v9244_v11 }
 0x5aa   : > { %5987 = vst [vmem:[#allocation2] sm:$0xff] %v5979_v53  ;;  %v5982_v3 = vadd.f32 %v5972_v32, %v2198_v40  ;;  %v5983_v22 = vadd.f32 %v5630_v26, %v2199_v63  ;;  %v5974_v47 = vpop.f32.mrb[18].mxu1  ;;  %v5632_v35 = vpop.f32.mrb[19].mxu0  ;;  %6634 = vmatpush1.bf16.msra.mxu0 (!%p7983_p5), %v9246_v58  ;;  %v9261_v58 = vld [vmem:[#allocation15 + $0xe0] ss:$8 sps:$4 sm:$0xff] (!%p7983_p5)  }
 0x5ab   : > { %5989 = vst [vmem:[#allocation2 + $0x10] sm:$0xff] %v5981_v57  ;;  %5988 = vst [vmem:[#allocation2 + $0x8] sm:$0xff] %v5980_v54  ;;  %v5985_v24 = vadd.f32 %v5974_v47, %v2201_v36  ;;  %v5984_v52 = vadd.f32 %v5632_v35, %v2200_v48  ;;  %v5976_v16 = vpop.f32.mrb[19].mxu1  ;;  %v9247_v48 = vld [vmem:[#allocation15 + $0xa4] ss:$8 sps:$4 sm:$0xff] (!%p7983_p5)  }
 0x5ac   : > { %5990 = vst [vmem:[#allocation2 + $0x18] sm:$0xff] %v5982_v3  ;;  %5991 = vst [vmem:[#allocation2 + $0x20] sm:$0xff] %v5983_v22  ;;  %v5986_v60 = vadd.f32 %v5976_v16, %v2202_v5  ;;  %v9249_v22 = vld [vmem:[#allocation15 + $0xa0] ss:$8 sps:$4 sm:$0xff] (!%p7983_p5)   ;;  %6635 = vmatprep.subr.bf16.mxu0 (!%p7983_p5), %v9247_v48 }
 0x5ad   : > { %5993 = vst [vmem:[#allocation2 + $0x30] sm:$0xff] %v5985_v24  ;;  %5992 = vst [vmem:[#allocation2 + $0x28] sm:$0xff] %v5984_v52  ;;  %v9250_v24 = vld [vmem:[#allocation15 + $0xb4] ss:$8 sps:$4 sm:$0xff] (!%p7983_p5)  }
 0x5ae   : > { %5994 = vst [vmem:[#allocation2 + $0x38] sm:$0xff] %v5986_v60  ;;  %6636 = vmatpush1.bf16.msra.mxu0 (!%p7983_p5), %v9249_v22 }
 0x5af   : > { %6637 = vmatprep.subr.bf16.mxu0 %v9250_v24 }
 0x5b1   : > { %v5999_v33 = vld [vmem:[#allocation2] sm:$0xff] }
 0x5b2   : > { %v6000_v59 = vld [vmem:[#allocation2 + $0x8] sm:$0xff]  ;;  %v6009_v7 = vrot.slane %v5999_v33, 4  ;;  %6638 = vmatpush1.bf16.msra.mxu0 %v9252_v20 }
 0x5b3   : > { %v6015_v38 = vrot.slane %v6000_v59, 4  ;;  %v6003_v55 = vld [vmem:[#allocation2 + $0x20] sm:$0xff]  ;;  %v11695_v21 = vld [vmem:[#allocation2 + $0x18] sm:$0xff]  ;;  %6639 = vmatprep.subr.bf16.mxu0 %v9253_v44 }
 0x5b4   : > { %v6004_v14 = vld [vmem:[#allocation2 + $0x28] sm:$0xff]  ;;  %v6033_v43 = vrot.slane %v6003_v55, 4  ;;  %v6010_v18 = vadd.f32 %v6009_v7, %v5999_v33  ;;  %v6027_v25 = vrot.slane %v11695_v21, 4 }
 0x5b5   : > { %v6039_v8 = vrot.slane %v6004_v14, 4  ;;  %v6016_v61 = vadd.f32 %v6015_v38, %v6000_v59  ;;  %v9264_v20 = vld [vmem:[#allocation15 + $0xf0] ss:$8 sps:$4 sm:$0xff]  }
 0x5b6   : > { %v6034_v31 = vadd.f32 %v6033_v43, %v6003_v55  ;;  %v6011_v19 = vrot.slane %v6010_v18, 2  ;;  %v6028_v15 = vadd.f32 %v6027_v25, %v11695_v21  ;;  %6640 = vmatpush1.bf16.msra.mxu0 %v9255_v28 }
 0x5b7   : > { %v6040_v62 = vadd.f32 %v6039_v8, %v6004_v14  ;;  %v6017_v17 = vrot.slane %v6016_v61, 2 }
 0x5b8   : > { %v6035_v0 = vrot.slane %v6034_v31, 2  ;;  %v6012_v2 = vadd.f32 %v6011_v19, %v6010_v18  ;;  %v6029_v46 = vrot.slane %v6028_v15, 2 }
 0x5b9   : > { %v6041_v29 = vrot.slane %v6040_v62, 2  ;;  %v6018_v39 = vadd.f32 %v6017_v17, %v6016_v61  ;;  %v11701_v61 = vld [vmem:[#allocation2 + $0x10] sm:$0xff] }
 0x5ba   : > { %v6036_v27 = vadd.f32 %v6035_v0, %v6034_v31  ;;  %v6013_v50 = vrot.slane %v6012_v2, 1  ;;  %v6021_v7 = vrot.slane %v11701_v61, 4  ;;  %v9258_v31 = vld [vmem:[#allocation15 + $0xd0] ss:$8 sps:$4 sm:$0xff]   ;;  %v9259_v0 = vld [vmem:[#allocation15 + $0xe4] ss:$8 sps:$4 sm:$0xff]  }
 0x5bb   : > { %v6042_v6 = vadd.f32 %v6041_v29, %v6040_v62  ;;  %v6019_v12 = vrot.slane %v6018_v39, 1  ;;  %v11703_v62 = vld [vmem:[#allocation2 + $0x30] sm:$0xff] }
 0x5bc   : > { %v6037_v40 = vrot.slane %v6036_v27, 1  ;;  %v6014_v34 = vadd.f32 %v6013_v50, %v6012_v2  ;;  %v6045_v43 = vrot.slane %v11703_v62, 4 }
 0x5bd   : > { %v6043_v45 = vrot.slane %v6042_v6, 1  ;;  %v6020_v10 = vadd.f32 %v6019_v12, %v6018_v39 }
 0x5be   : > { %v6038_v36 = vadd.f32 %v6037_v40, %v6036_v27  ;;  %v6057_v32 = vmul.f32 0.125, %v6014_v34  ;;  %v6046_v19 = vadd.f32 %v6045_v43, %v11703_v62 }
 0x5bf   : > { %v6044_v42 = vadd.f32 %v6043_v45, %v6042_v6  ;;  %v6058_v63 = vmul.f32 0.125, %v6020_v10  ;;  %v6022_v6 = vadd.f32 %v6021_v7, %v11701_v61 }
 0x5c0   : > { %v6061_v26 = vmul.f32 0.125, %v6038_v36  ;;  %v11687_v47 = vsub.f32 %v5999_v33, %v6057_v32 }
 0x5c1   : > { %v6062_v53 = vmul.f32 0.125, %v6044_v42  ;;  %v11679_v57 = vsub.f32 %v6000_v59, %v6058_v63  ;;  %v11697_v59 = vld [vmem:[#allocation2 + $0x38] sm:$0xff]  ;;  %v6023_v10 = vrot.slane %v6022_v6, 2  ;;  %v6047_v42 = vrot.slane %v6046_v19, 2 }
 0x5c2   : > { %v11689_v35 = vsub.f32 %v6003_v55, %v6061_v26  ;;  %v6073_v60 = vmul.f32 %v11687_v47, %v11687_v47  ;;  %v6051_v49 = vrot.slane %v11697_v59, 4  ;;  %v6030_v63 = vadd.f32 %v6029_v46, %v6028_v15  ;;  %v9262_v26 = vld [vmem:[#allocation15 + $0xf4] ss:$8 sps:$4 sm:$0xff]  }
 0x5c3   : > { %v11681_v54 = vsub.f32 %v6004_v14, %v6062_v53  ;;  %v6074_v5 = vmul.f32 %v11679_v57, %v11679_v57  ;;  %v9256_v14 = vld [vmem:[#allocation15 + $0xd4] ss:$8 sps:$4 sm:$0xff]   ;;  %v6024_v48 = vadd.f32 %v6023_v10, %v6022_v6  ;;  %v6048_v32 = vadd.f32 %v6047_v42, %v6046_v19 }
 0x5c4   : > { %v6077_v23 = vmul.f32 %v11689_v35, %v11689_v35  ;;  %v6081_v41 = vrot.slane %v6073_v60, 4  ;;  %v6052_v18 = vadd.f32 %v6051_v49, %v11697_v59  ;;  %6641 = vmatprep.subr.bf16.mxu0 %v9256_v14  ;;  %v6031_v22 = vrot.slane %v6030_v63, 1  ;;  %v11711_v14 = vld [vmem:[#allocation12] sm:$0xf] }
 0x5c5   : > { %v6078_v3 = vmul.f32 %v11681_v54, %v11681_v54  ;;  %v6087_v52 = vrot.slane %v6074_v5, 4  ;;  %6642 = vmatpush1.bf16.msra.mxu0 %v9258_v31 }
 0x5c6   : > { %v6105_v1 = vrot.slane %v6077_v23, 4  ;;  %v6082_v37 = vadd.f32 %v6081_v41, %v6073_v60  ;;  %v6053_v2 = vrot.slane %v6052_v18, 2  ;;  %v6025_v60 = vrot.slane %v6024_v48, 1  ;;  %6643 = vmatprep.subr.bf16.mxu0 %v9259_v0 }
 0x5c7   : > { %v6111_v16 = vrot.slane %v6078_v3, 4  ;;  %v6088_v30 = vadd.f32 %v6087_v52, %v6074_v5 }
 0x5c8   : > { %v6106_v9 = vadd.f32 %v6105_v1, %v6077_v23  ;;  %v6083_v33 = vrot.slane %v6082_v37, 2  ;;  %v6054_v53 = vadd.f32 %v6053_v2, %v6052_v18  ;;  %v6049_v23 = vrot.slane %v6048_v32, 1 }
 0x5c9   : > { %v6112_v4 = vadd.f32 %v6111_v16, %v6078_v3  ;;  %v6089_v13 = vrot.slane %v6088_v30, 2  ;;  %v6026_v44 = vadd.f32 %v6025_v60, %v6024_v48  ;;  %6644 = vmatpush1.bf16.msra.mxu0 %v9261_v58 }
 0x5ca   : > { %v6107_v55 = vrot.slane %v6106_v9, 2  ;;  %v6084_v51 = vadd.f32 %v6083_v33, %v6082_v37  ;;  %v6055_v24 = vrot.slane %v6054_v53, 1  ;;  %v6050_v37 = vadd.f32 %v6049_v23, %v6048_v32  ;;  %6645 = vmatprep.subr.bf16.mxu0 %v9262_v26  ;;  %v11722_v33 = vld [vmem:[#allocation14] sm:$0xf] }
 0x5cb   : > { %v6113_v56 = vrot.slane %v6112_v4, 2  ;;  %v6090_v38 = vadd.f32 %v6089_v13, %v6088_v30  ;;  %v6032_v30 = vadd.f32 %v6031_v22, %v6030_v63  ;;  %v9267_v13 = vld [vmem:[#allocation15 + $0x104] ss:$8 sps:$4 sm:$0xff]  }
 0x5cc   : > { %v6108_v39 = vadd.f32 %v6107_v55, %v6106_v9  ;;  %v6085_v27 = vrot.slane %v6084_v51, 1  ;;  %v6059_v9 = vmul.f32 0.125, %v6026_v44  ;;  %v6063_v25 = vmul.f32 0.125, %v6050_v37 }
 0x5cd   : > { %v6114_v8 = vadd.f32 %v6113_v56, %v6112_v4  ;;  %v6091_v17 = vrot.slane %v6090_v38, 1  ;;  %v6056_v4 = vadd.f32 %v6055_v24, %v6054_v53  ;;  %v6060_v56 = vmul.f32 0.125, %v6032_v30  ;;  %6646 = vmatpush1.bf16.msra.mxu0 %v9264_v20 }
 0x5ce   : > { %v6109_v11 = vrot.slane %v6108_v39, 1  ;;  %v6086_v34 = vadd.f32 %v6085_v27, %v6084_v51  ;;  %v11720_v49 = vsub.f32 %v11701_v61, %v6059_v9  ;;  %v11729_v43 = vsub.f32 %v11703_v62, %v6063_v25  ;;  %6658 = vmatprep.subr.bf16.mxu0 %v9267_v13 }
 0x5cf   : > { %v6115_v29 = vrot.slane %v6114_v8, 1  ;;  %v6092_v12 = vadd.f32 %v6091_v17, %v6090_v38  ;;  %v6064_v28 = vmul.f32 0.125, %v6056_v4  ;;  %v11714_v38 = vsub.f32 %v11695_v21, %v6060_v56 }
 0x5d0   : > { %v6110_v36 = vadd.f32 %v6109_v11, %v6108_v39  ;;  %v6129_v52 = vmul.f32 0.125, %v6086_v34  ;;  %v6075_v21 = vmul.f32 %v11720_v49, %v11720_v49  ;;  %v6079_v61 = vmul.f32 %v11729_v43, %v11729_v43 }
 0x5d1   : > { %v6116_v45 = vadd.f32 %v6115_v29, %v6114_v8  ;;  %v6130_v50 = vmul.f32 0.125, %v6092_v12  ;;  %v11717_v8 = vsub.f32 %v11697_v59, %v6064_v28  ;;  %v6076_v55 = vmul.f32 %v11714_v38, %v11714_v38  ;;  %v11960_v29 = vld [vmem:[#allocation42_spill] sm:$0xff]  ;;  %v11961_v12 = vld [vmem:[#allocation41_spill] sm:$0xff] }
 0x5d2   : > { %v6133_v16 = vmul.f32 0.125, %v6110_v36  ;;  %v6137_v41 = vadd.f32 1e-05, %v6129_v52  ;;  %v6169_v15 = vrot.slane %v11711_v14, %v11960_v29  ;;  %v6093_v18 = vrot.slane %v6075_v21, 4 }
 0x5d3   : > { %v6134_v40 = vmul.f32 0.125, %v6116_v45  ;;  %v6138_v5 = vadd.f32 1e-05, %v6130_v50  ;;  %v6080_v7 = vmul.f32 %v11717_v8, %v11717_v8  ;;  %v6099_v59 = vrot.slane %v6076_v55, 4 }
 0x5d4   : > { %v6141_v1 = vadd.f32 1e-05, %v6133_v16  ;;  %v6117_v6 = vrot.slane %v6079_v61, 4  ;;  %v6198_v0 = vrot.slane %v11722_v33, %v11960_v29  ;;  %v6165_v45 = vrot.slane %v11711_v14, %v11961_v12 }
 0x5d5   : > { %v6142_v3 = vadd.f32 1e-05, %v6134_v40  ;;  %9337 = vrsqrt.f32 %v6138_v5  ;;  %v6123_v17 = vrot.slane %v6080_v7, 4  ;;  %v6100_v51 = vadd.f32 %v6099_v59, %v6076_v55  ;;  %v9265_v55 = vld [vmem:[#allocation15 + $0x100] ss:$8 sps:$4 sm:$0xff]  }
 0x5d6   : > { %v6094_v46 = vadd.f32 %v6093_v18, %v6075_v21  ;;  %v6118_v10 = vadd.f32 %v6117_v6, %v6079_v61  ;;  %v6194_v40 = vrot.slane %v11722_v33, %v11961_v12  ;;  %v9276_v6 = vld [vmem:[#allocation15 + $0x134] ss:$8 sps:$4 sm:$0xff]  }
 0x5d7   : > { %9339 = vrsqrt.f32 %v6142_v3  ;;  %v6124_v39 = vadd.f32 %v6123_v17, %v6080_v7  ;;  %v6101_v27 = vrot.slane %v6100_v51, 2  ;;  %v9270_v17 = vld [vmem:[#allocation15 + $0x114] ss:$8 sps:$4 sm:$0xff]  }
 0x5d8   : > { %9341 = vrsqrt.f32 %v6137_v41  ;;  %v6095_v63 = vrot.slane %v6094_v46, 2 }
 0x5d9   : > { %9343 = vrsqrt.f32 %v6141_v1  ;;  %v6125_v11 = vrot.slane %v6124_v39, 2  ;;  %v6102_v34 = vadd.f32 %v6101_v27, %v6100_v51  ;;  %v9273_v51 = vld [vmem:[#allocation15 + $0x124] ss:$8 sps:$4 sm:$0xff]  }
 0x5da   : > { %v6096_v26 = vadd.f32 %v6095_v63, %v6094_v46 }
 0x5db   : > { %v6126_v36 = vadd.f32 %v6125_v11, %v6124_v39  ;;  %v6103_v22 = vrot.slane %v6102_v34, 1  ;;  %v9271_v39 = vld [vmem:[#allocation15 + $0x120] ss:$8 sps:$4 sm:$0xff]  }
 0x5dc   : > { %v6097_v60 = vrot.slane %v6096_v26, 1 }
 0x5dd   : > { %v6127_v24 = vrot.slane %v6126_v36, 1  ;;  %v6104_v20 = vadd.f32 %v6103_v22, %v6102_v34  ;;  %v9277_v34 = vld [vmem:[#allocation15 + $0x140] ss:$8 sps:$4 sm:$0xff]  }
 0x5de   : > { %v6098_v1 = vadd.f32 %v6097_v60, %v6096_v26  ;;  %v9283_v60 = vld [vmem:[#allocation15 + $0x160] ss:$8 sps:$4 sm:$0xff]  }
 0x5df   : > { %v9338_v31 = vpop.eup %9337  ;;  %v6128_v41 = vadd.f32 %v6127_v24, %v6126_v36  ;;  %v9285_v24 = vld [vmem:[#allocation15 + $0x164] ss:$8 sps:$4 sm:$0xff]  }
 0x5e0   : > { %v6154_v19 = vmul.f32 %v9338_v31, %v11679_v57  ;;  %v6131_v25 = vmul.f32 0.125, %v6098_v1  ;;  %v9268_v31 = vld [vmem:[#allocation15 + $0x110] ss:$8 sps:$4 sm:$0xff]   ;;  %v9297_v1 = vld [vmem:[#allocation15 + $0x1a4] ss:$8 sps:$4 sm:$0xff]  }
 0x5e1   : > { %v9340_v62 = vpop.eup %9339  ;;  %v6136_v28 = vmul.f32 0.125, %v6128_v41  ;;  %v9294_v41 = vld [vmem:[#allocation15 + $0x194] ss:$8 sps:$4 sm:$0xff]  }
 0x5e2   : > { %v6158_v2 = vmul.f32 %v9340_v62, %v11681_v54  ;;  %v9342_v42 = vpop.eup %9341  ;;  %v6183_v50 = vmul.f32 %v6169_v15, %v6154_v19  ;;  %v6119_v54 = vrot.slane %v6118_v10, 2  ;;  %v11962_v62 = vld [vmem:[#allocation44_spill] sm:$0xff] }
 0x5e3   : > { %v9344_v53 = vpop.eup %9343  ;;  %v6153_v58 = vmul.f32 %v9342_v42, %v11687_v47  ;;  %v6144_v21 = vadd.f32 1e-05, %v6136_v28  ;;  %v6177_v19 = vrot.slane %v11711_v14, %v11962_v62  ;;  %v6206_v11 = vrot.slane %v11722_v33, %v11962_v62  ;;  %v9301_v28 = vld [vmem:[#allocation15 + $0x1c0] ss:$8 sps:$4 sm:$0xff]  }
 0x5e4   : > { %v6187_v57 = vmul.f32 %v6169_v15, %v6158_v2  ;;  %v6212_v48 = vadd.f32 %v6198_v0, %v6183_v50  ;;  %v6157_v32 = vmul.f32 %v9344_v53, %v11689_v35  ;;  %v6120_v23 = vadd.f32 %v6119_v54, %v6118_v10  ;;  %v9279_v2 = vld [vmem:[#allocation15 + $0x144] ss:$8 sps:$4 sm:$0xff]  }
 0x5e5   : > { %v6182_v3 = vmul.f32 %v6165_v45, %v6153_v58  ;;  %v6132_v35 = vmul.f32 0.125, %v6104_v20  ;;  %v6139_v15 = vadd.f32 1e-05, %v6131_v25  ;;  %v11963_v10 = vld [vmem:[#allocation43_spill] sm:$0xff] }
 0x5e6   : > { %v6216_v5 = vadd.f32 %v6198_v0, %v6187_v57  ;;  %v6220_v52 = vmax.f32 %v6212_v48, 0.0  ;;  %v6186_v16 = vmul.f32 %v6165_v45, %v6157_v32  ;;  %v6121_v44 = vrot.slane %v6120_v23, 1  ;;  %v9274_v45 = vld [vmem:[#allocation15 + $0x130] ss:$8 sps:$4 sm:$0xff]   ;;  %v9282_v48 = vld [vmem:[#allocation15 + $0x154] ss:$8 sps:$4 sm:$0xff]  }
 0x5e7   : > { %v6211_v4 = vadd.f32 %v6194_v40, %v6182_v3  ;;  %v6140_v7 = vadd.f32 1e-05, %v6132_v35  ;;  %v6173_v42 = vrot.slane %v11711_v14, %v11963_v10  ;;  %v6202_v58 = vrot.slane %v11722_v33, %v11963_v10  ;;  %v9280_v3 = vld [vmem:[#allocation15 + $0x150] ss:$8 sps:$4 sm:$0xff]   ;;  %v9289_v20 = vld [vmem:[#allocation15 + $0x180] ss:$8 sps:$4 sm:$0xff]  }
 0x5e8   : > { %v6224_v30 = vmax.f32 %v6216_v5, 0.0  ;;  %v6215_v47 = vadd.f32 %v6194_v40, %v6186_v16  ;;  %v6122_v9 = vadd.f32 %v6121_v44, %v6120_v23  ;;  %v9288_v23 = vld [vmem:[#allocation15 + $0x174] ss:$8 sps:$4 sm:$0xff]   ;;  %v9295_v44 = vld [vmem:[#allocation15 + $0x1a0] ss:$8 sps:$4 sm:$0xff]  }
 0x5e9   : > { %v6219_v56 = vmax.f32 %v6211_v4, 0.0  ;;  %9345 = vrsqrt.f32 %v6140_v7  ;;  %v9291_v4 = vld [vmem:[#allocation15 + $0x184] ss:$8 sps:$4 sm:$0xff]   ;;  %v9312_v7 = vld [vmem:[#allocation15 + $0x1f4] ss:$8 sps:$4 sm:$0xff]  }
 0x5ea   : > { %v6228_v13 = vpack.c.bf16 %v6224_v30, %v6220_v52  ;;  %v6223_v37 = vmax.f32 %v6215_v47, 0.0  ;;  %v6135_v61 = vmul.f32 0.125, %v6122_v9  ;;  %9347 = vrsqrt.f32 %v6144_v21  ;;  %v9286_v30 = vld [vmem:[#allocation15 + $0x170] ss:$8 sps:$4 sm:$0xff]   ;;  %v9303_v35 = vld [vmem:[#allocation15 + $0x1c4] ss:$8 sps:$4 sm:$0xff]  }
 0x5eb   : > { %9349 = vrsqrt.f32 %v6139_v15  ;;  %v9292_v47 = vld [vmem:[#allocation15 + $0x190] ss:$8 sps:$4 sm:$0xff]   ;;  %v9309_v25 = vld [vmem:[#allocation15 + $0x1e4] ss:$8 sps:$4 sm:$0xff]  }
 0x5ec   : > { %6647 = vmatprep.mubr.bf16.mxu0 %v6228_v13  ;;  %v6227_v59 = vpack.c.bf16 %v6223_v37, %v6219_v56  ;;  %v6143_v18 = vadd.f32 1e-05, %v6135_v61  ;;  %v9300_v13 = vld [vmem:[#allocation15 + $0x1b4] ss:$8 sps:$4 sm:$0xff]   ;;  %v9298_v56 = vld [vmem:[#allocation15 + $0x1b0] ss:$8 sps:$4 sm:$0xff]  }
 0x5ed   : > { %v9306_v37 = vld [vmem:[#allocation15 + $0x1d4] ss:$8 sps:$4 sm:$0xff]   ;;  %v9304_v9 = vld [vmem:[#allocation15 + $0x1d0] ss:$8 sps:$4 sm:$0xff]   ;;  %v9322_v62 = vld [vmem:[#allocation20 + $0x20] sm:$0xff]  }
 0x5ee   : > { %6648 = vmatmul.mubr.bf16.vlgmr.msra.gmra.mrb[0].mxu0 %v6227_v59  ;;  %9351 = vrsqrt.f32 %v6143_v18  ;;  %v9310_v21 = vld [vmem:[#allocation15 + $0x1f0] ss:$8 sps:$4 sm:$0xff]   ;;  %v9313_v59 = vld [vmem:[#allocation20 + $0x40] sm:$0xff]  }
 0x5ef   : > { %6659 = vmatpush1.bf16.msra.mxu0 %v9265_v55  ;;  %v9307_v55 = vld [vmem:[#allocation15 + $0x1e0] ss:$8 sps:$4 sm:$0xff]   ;;  %8084 = vmatprep.subr.bf16.mxu1 %v9313_v59  ;;  %v9315_v61 = vld [vmem:[#allocation20 + $0x48] sm:$0xff]   ;;  %v9317_v18 = vld [vmem:[#allocation20 + $0x50] sm:$0xff]  }
 0x5f0   : > { %6660 = vmatprep.subr.bf16.mxu0 %v9270_v17  ;;  %v9314_v17 = vld [vmem:[#allocation20] sm:$0xff]   ;;  %v9316_v15 = vld [vmem:[#allocation20 + $0x8] sm:$0xff]  }
 0x5f1   : > { %8085 = vmatpush3.bf16.msra.mxu1 %v9314_v17 }
 0x5f2   : > { %8086 = vmatprep.subr.bf16.mxu1 %v9315_v61 }
 0x5f3   : > { %6661 = vmatpush1.bf16.msra.mxu0 %v9268_v31  ;;  %v9346_v0 = vpop.eup %9345  ;;  %v9318_v31 = vld [vmem:[#allocation20 + $0x10] sm:$0xff]  }
 0x5f4   : > { %6662 = vmatprep.subr.bf16.mxu0 %v9273_v51  ;;  %v9348_v46 = vpop.eup %9347  ;;  %v6156_v27 = vmul.f32 %v9346_v0, %v11714_v38  ;;  %v9319_v51 = vld [vmem:[#allocation20 + $0x58] sm:$0xff]   ;;  %v9324_v0 = vld [vmem:[#allocation20 + $0x28] sm:$0xff]  }
 0x5f5   : > { %v9350_v50 = vpop.eup %9349  ;;  %v6160_v40 = vmul.f32 %v9348_v46, %v11717_v8  ;;  %8087 = vmatpush3.bf16.msra.mxu1 %v9316_v15  ;;  %v9326_v46 = vld [vmem:[#allocation20 + $0x30] sm:$0xff]  }
 0x5f6   : > { %v6185_v53 = vmul.f32 %v6177_v19, %v6156_v27  ;;  %v6155_v57 = vmul.f32 %v9350_v50, %v11720_v49  ;;  %8088 = vmatprep.subr.bf16.mxu1 %v9317_v18  ;;  %v9328_v27 = vld [vmem:[#allocation20 + $0x38] sm:$0xff]  }
 0x5f7   : > { %6663 = vmatpush1.bf16.msra.mxu0 %v9271_v39  ;;  %v6189_v36 = vmul.f32 %v6177_v19, %v6160_v40  ;;  %v9320_v39 = vld [vmem:[#allocation20 + $0x18] sm:$0xff]   ;;  %v9323_v19 = vld [vmem:[#allocation20 + $0x68] sm:$0xff]  }
 0x5f8   : > { %6664 = vmatprep.subr.bf16.mxu0 %v9276_v6  ;;  %v9352_v63 = vpop.eup %9351  ;;  %v6214_v32 = vadd.f32 %v6206_v11, %v6185_v53  ;;  %v6184_v26 = vmul.f32 %v6173_v42, %v6155_v57  ;;  %v9321_v6 = vld [vmem:[#allocation20 + $0x60] sm:$0xff]  }
 0x5f9   : > { %v6159_v38 = vmul.f32 %v9352_v63, %v11729_v43  ;;  %v6218_v14 = vadd.f32 %v6206_v11, %v6189_v36  ;;  %8089 = vmatpush3.bf16.msra.mxu1 %v9318_v31 }
 0x5fa   : > { %v6222_v5 = vmax.f32 %v6214_v32, 0.0  ;;  %v6213_v8 = vadd.f32 %v6202_v58, %v6184_v26  ;;  %8090 = vmatprep.subr.bf16.mxu1 %v9319_v51 }
 0x5fb   : > { %6665 = vmatpush1.bf16.msra.mxu0 %v9274_v45  ;;  %v6188_v54 = vmul.f32 %v6173_v42, %v6159_v38  ;;  %v6226_v22 = vmax.f32 %v6218_v14, 0.0  ;;  %v9325_v45 = vld [vmem:[#allocation20 + $0x70] sm:$0xff]  }
 0x5fc   : > { %6666 = vmatprep.subr.bf16.mxu0 %v9279_v2  ;;  %v6221_v33 = vmax.f32 %v6213_v8, 0.0  ;;  %v9327_v2 = vld [vmem:[#allocation20 + $0x78] sm:$0xff]  }
 0x5fd   : > { %v6217_v49 = vadd.f32 %v6202_v58, %v6188_v54  ;;  %v6230_v52 = vpack.c.bf16 %v6226_v22, %v6222_v5  ;;  %8091 = vmatpush3.bf16.msra.mxu1 %v9320_v39 }
 0x5fe   : > { %8092 = vmatprep.subr.bf16.mxu1 %v9321_v6 }
 0x5ff   : > { %6667 = vmatpush1.bf16.msra.mxu0 %v9277_v34  ;;  %v6225_v16 = vmax.f32 %v6217_v49, 0.0  ;;  %6690 = vmatprep.mubr.bf16.mxu0 %v6230_v52 }
 0x600   : > { %6668 = vmatprep.subr.bf16.mxu0 %v9282_v48 }
 0x601   : > { %v6229_v43 = vpack.c.bf16 %v6225_v16, %v6221_v33  ;;  %8093 = vmatpush3.bf16.msra.mxu1 %v9322_v62 }
 0x602   : > { %8094 = vmatprep.subr.bf16.mxu1 %v9323_v19 }
 0x603   : > { %6669 = vmatpush1.bf16.msra.mxu0 %v9280_v3 }
 0x604   : > { %6670 = vmatprep.subr.bf16.mxu0 %v9285_v24 }
 0x605   : > { %8095 = vmatpush3.bf16.msra.mxu1 %v9324_v0 }
 0x606   : > { %8096 = vmatprep.subr.bf16.mxu1 %v9325_v45 }
 0x607   : > { %6671 = vmatpush1.bf16.msra.mxu0 %v9283_v60 }
 0x608   : > { %6672 = vmatprep.subr.bf16.mxu0 %v9288_v23 }
 0x609   : > { %8097 = vmatpush3.bf16.msra.mxu1 %v9326_v46 }
 0x60a   : > { %8098 = vmatprep.subr.bf16.mxu1 %v9327_v2 }
 0x60b   : > { %6673 = vmatpush1.bf16.msra.mxu0 %v9286_v30 }
 0x60c   : > { %6674 = vmatprep.subr.bf16.mxu0 %v9291_v4 }
 0x60d   : > { %8099 = vmatpush3.bf16.msra.mxu1 %v9328_v27 }
 0x60f   : > { %6675 = vmatpush1.bf16.msra.mxu0 %v9289_v20 }
 0x610   : > { %6676 = vmatprep.subr.bf16.mxu0 %v9294_v41 }
 0x613   : > { %6677 = vmatpush1.bf16.msra.mxu0 %v9292_v47 }
 0x614   : > { %6678 = vmatprep.subr.bf16.mxu0 %v9297_v1 }
 0x617   : > { %6679 = vmatpush1.bf16.msra.mxu0 %v9295_v44 }
 0x618   : > { %6680 = vmatprep.subr.bf16.mxu0 %v9300_v13 }
 0x61b   : > { %6681 = vmatpush1.bf16.msra.mxu0 %v9298_v56 }
 0x61c   : > { %6682 = vmatprep.subr.bf16.mxu0 %v9303_v35 }
 0x61f   : > { %6683 = vmatpush1.bf16.msra.mxu0 %v9301_v28 }
 0x620   : > { %6684 = vmatprep.subr.bf16.mxu0 %v9306_v37 }
 0x623   : > { %6685 = vmatpush1.bf16.msra.mxu0 %v9304_v9 }
 0x624   : > { %6686 = vmatprep.subr.bf16.mxu0 %v9309_v25 }
 0x627   : > { %6687 = vmatpush1.bf16.msra.mxu0 %v9307_v55 }
 0x628   : > { %6688 = vmatprep.subr.bf16.mxu0 %v9312_v7 }
 0x62b   : > { %6689 = vmatpush1.bf16.msra.mxu0 %v9310_v21 }
 0x62e   : > { %6691 = vmatmul.mubr.bf16.vlgmr.msra.gmra.mrb[0].mxu0 %v6229_v43 }
 0x701   : > { %v6692_v11 = vpop.f32.mrb[0].mxu0 }
 0x702   : > { %v6703_v10 = vrot.slane %v6692_v11, 4  ;;  %v6694_v42 = vpop.f32.mrb[1].mxu0 }
 0x703   : > { %v6709_v50 = vrot.slane %v6694_v42, 4  ;;  %v6696_v40 = vpop.f32.mrb[2].mxu0 }
 0x704   : > { %v6704_v63 = vadd.f32 %v6703_v10, %v6692_v11  ;;  %v6715_v53 = vrot.slane %v6696_v40, 4  ;;  %v6698_v57 = vpop.f32.mrb[3].mxu0 }
 0x705   : > { %v6710_v58 = vadd.f32 %v6709_v50, %v6694_v42  ;;  %v6721_v34 = vrot.slane %v6698_v57, 4 }
 0x706   : > { %v6705_v36 = vrot.slane %v6704_v63, 2  ;;  %v6716_v38 = vadd.f32 %v6715_v53, %v6696_v40 }
 0x707   : > { %v6711_v48 = vrot.slane %v6710_v58, 2  ;;  %v6722_v32 = vadd.f32 %v6721_v34, %v6698_v57 }
 0x708   : > { %v6706_v26 = vadd.f32 %v6705_v36, %v6704_v63  ;;  %v6717_v14 = vrot.slane %v6716_v38, 2  ;;  %v6701_v36 = vld [vmem:[#allocation17] sm:$0x3] }
 0x709   : > { %v6712_v54 = vadd.f32 %v6711_v48, %v6710_v58  ;;  %v6723_v5 = vrot.slane %v6722_v32, 2  ;;  %v6783_v48 = vrot.slane %v6701_v36, %v11961_v12 }
 0x70a   : > { %v6707_v8 = vrot.slane %v6706_v26, 1  ;;  %v6718_v3 = vadd.f32 %v6717_v14, %v6716_v38  ;;  %v6702_v38 = vld [vmem:[#allocation18] sm:$0x3] }
 0x70b   : > { %v6713_v22 = vrot.slane %v6712_v54, 1  ;;  %v6724_v49 = vadd.f32 %v6723_v5, %v6722_v32  ;;  %v6798_v5 = vrot.slane %v6702_v38, %v11961_v12 }
 0x70c   : > { %v6708_v24 = vadd.f32 %v6707_v8, %v6706_v26  ;;  %v6719_v33 = vrot.slane %v6718_v3, 1  ;;  %v6787_v26 = vrot.slane %v6701_v36, %v11960_v29 }
 0x70d   : > { %v6714_v52 = vadd.f32 %v6713_v22, %v6712_v54  ;;  %v6725_v16 = vrot.slane %v6724_v49, 1  ;;  %v6802_v22 = vrot.slane %v6702_v38, %v11960_v29  ;;  %v9329_v29 = vld [vmem:[#allocation24] sm:$0xff]  }
 0x70e   : > { %v6727_v60 = vmul.f32 0.125, %v6708_v24  ;;  %v6720_v43 = vadd.f32 %v6719_v33, %v6718_v3 }
 0x70f   : > { %v6728_v23 = vmul.f32 0.125, %v6714_v52  ;;  %v6726_v30 = vadd.f32 %v6725_v16, %v6724_v49 }
 0x710   : > { %v6731_v4 = vsub.f32 %v6692_v11, %v6727_v60  ;;  %v6729_v20 = vmul.f32 0.125, %v6720_v43 }
 0x711   : > { %v6732_v41 = vsub.f32 %v6694_v42, %v6728_v23  ;;  %v6730_v47 = vmul.f32 0.125, %v6726_v30 }
 0x712   : > { %v6735_v1 = vmul.f32 %v6731_v4, %v6731_v4  ;;  %v6733_v44 = vsub.f32 %v6696_v40, %v6729_v20 }
 0x713   : > { %v6736_v13 = vmul.f32 %v6732_v41, %v6732_v41  ;;  %v6734_v56 = vsub.f32 %v6698_v57, %v6730_v47 }
 0x714   : > { %v6739_v35 = vrot.slane %v6735_v1, 4  ;;  %v6737_v28 = vmul.f32 %v6733_v44, %v6733_v44 }
 0x715   : > { %v6745_v37 = vrot.slane %v6736_v13, 4  ;;  %v6738_v9 = vmul.f32 %v6734_v56, %v6734_v56 }
 0x716   : > { %v6740_v25 = vadd.f32 %v6739_v35, %v6735_v1  ;;  %v6751_v55 = vrot.slane %v6737_v28, 4 }
 0x717   : > { %v6746_v7 = vadd.f32 %v6745_v37, %v6736_v13  ;;  %v6757_v21 = vrot.slane %v6738_v9, 4  ;;  %v9332_v37 = vld [vmem:[#allocation24 + $0x18] sm:$0xff]  }
 0x718   : > { %v6741_v59 = vrot.slane %v6740_v25, 2  ;;  %v6752_v17 = vadd.f32 %v6751_v55, %v6737_v28  ;;  %v9335_v55 = vld [vmem:[#allocation24 + $0x30] sm:$0xff]  }
 0x719   : > { %v6747_v61 = vrot.slane %v6746_v7, 2  ;;  %v6758_v15 = vadd.f32 %v6757_v21, %v6738_v9  ;;  %v9333_v9 = vld [vmem:[#allocation24 + $0x20] sm:$0xff]  }
 0x71a   : > { %v6742_v18 = vadd.f32 %v6741_v59, %v6740_v25  ;;  %v6753_v31 = vrot.slane %v6752_v17, 2  ;;  %v9334_v25 = vld [vmem:[#allocation24 + $0x28] sm:$0xff]  }
 0x71b   : > { %v6748_v51 = vadd.f32 %v6747_v61, %v6746_v7  ;;  %v6759_v39 = vrot.slane %v6758_v15, 2  ;;  %v9336_v7 = vld [vmem:[#allocation24 + $0x38] sm:$0xff]  }
 0x71c   : > { %v6743_v6 = vrot.slane %v6742_v18, 1  ;;  %v6754_v62 = vadd.f32 %v6753_v31, %v6752_v17 }
 0x71d   : > { %v6749_v19 = vrot.slane %v6748_v51, 1  ;;  %v6760_v0 = vadd.f32 %v6759_v39, %v6758_v15 }
 0x71e   : > { %v6744_v45 = vadd.f32 %v6743_v6, %v6742_v18  ;;  %v6755_v46 = vrot.slane %v6754_v62, 1 }
 0x71f   : > { %v6750_v2 = vadd.f32 %v6749_v19, %v6748_v51  ;;  %v6761_v27 = vrot.slane %v6760_v0, 1 }
 0x720   : > { %v6763_v11 = vmul.f32 0.125, %v6744_v45  ;;  %v6756_v10 = vadd.f32 %v6755_v46, %v6754_v62 }
 0x721   : > { %v6764_v42 = vmul.f32 0.125, %v6750_v2  ;;  %v6762_v50 = vadd.f32 %v6761_v27, %v6760_v0 }
 0x722   : > { %v6767_v40 = vadd.f32 1e-05, %v6763_v11  ;;  %v6765_v63 = vmul.f32 0.125, %v6756_v10 }
 0x723   : > { %v6768_v53 = vadd.f32 1e-05, %v6764_v42  ;;  %v6766_v57 = vmul.f32 0.125, %v6762_v50 }
 0x724   : > { %9353 = vrsqrt.f32 %v6767_v40  ;;  %v6769_v58 = vadd.f32 1e-05, %v6765_v63 }
 0x725   : > { %9355 = vrsqrt.f32 %v6768_v53  ;;  %v6770_v34 = vadd.f32 1e-05, %v6766_v57 }
 0x726   : > { %9357 = vrsqrt.f32 %v6769_v58 }
 0x727   : > { %9359 = vrsqrt.f32 %v6770_v34 }
 0x72e   : > { %v9354_v32 = vpop.eup %9353 }
 0x72f   : > { %v9356_v14 = vpop.eup %9355  ;;  %v6775_v54 = vmul.f32 %v9354_v32, %v6731_v4 }
 0x730   : > { %v9358_v8 = vpop.eup %9357  ;;  %v6776_v3 = vmul.f32 %v9356_v14, %v6732_v41  ;;  %v9912_v41 = vmov 0.0  }
 0x731   : > { %v9360_v49 = vpop.eup %9359  ;;  %v6790_v24 = vmul.f32 %v6783_v48, %v6775_v54  ;;  %v6777_v33 = vmul.f32 %v9358_v8, %v6733_v44  ;;  %8115 = vmatprep.subr.bf16.mxu1 %v9912_v41  ;;  %v9330_v44 = vld [vmem:[#allocation24 + $0x8] sm:$0xff]  }
 0x732   : > { %v6778_v52 = vmul.f32 %v9360_v49, %v6734_v56  ;;  %v6791_v16 = vmul.f32 %v6787_v26, %v6776_v3  ;;  %v9331_v56 = vld [vmem:[#allocation24 + $0x10] sm:$0xff]  }
 0x733   : > { %v6792_v60 = vmul.f32 %v6783_v48, %v6777_v33  ;;  %v6805_v43 = vadd.f32 %v6798_v5, %v6790_v24 }
 0x734   : > { %v6793_v23 = vmul.f32 %v6787_v26, %v6778_v52  ;;  %v6806_v30 = vadd.f32 %v6802_v22, %v6791_v16  ;;  %v8064_v52 = vld [vmem:[#allocation21] ss:$0 sm:$0xff] }
 0x735   : > { %v6807_v20 = vadd.f32 %v6798_v5, %v6792_v60  ;;  %v6809_v1 = vmax.f32 %v6805_v43, 0.0  ;;  %v8065_v43 = vld [vmem:[#allocation23] ss:$0 sm:$0xff] }
 0x736   : > { %v6808_v47 = vadd.f32 %v6802_v22, %v6793_v23  ;;  %v6810_v4 = vmax.f32 %v6806_v30, 0.0 }
 0x737   : > { %v6811_v13 = vmax.f32 %v6807_v20, 0.0 }
 0x738   : > { %v6812_v35 = vmax.f32 %v6808_v47, 0.0 }
 0x739   : > { %v6813_v12 = vpack.c.bf16 %v6811_v13, %v6809_v1 }
 0x73a   : > { %v6814_v28 = vpack.c.bf16 %v6812_v35, %v6810_v4 }
 0x73c   : > { %6975 = vmatprep.mubr.bf16.mxu1 %v6814_v28 }
 0x73d   : > { %6976 = vmatmul.mubr.bf16.vlgmr.msra.gmra.mrb[0].mxu1 %v6813_v12  ;;  %v8066_v12 = vld [vmem:[#allocation26] ss:$0 sm:$0xff] }
 0x73e   : > { %8116 = vmatpush3.bf16.msra.mxu1 %v9329_v29  ;;  %8131 = vmatprep.mubr.msk.bf16.mxu1 %vm9913_vm1, %v9912_v41 }
 0x73f   : > { %8117 = vmatprep.subr.bf16.mxu1 %v9912_v41 }
 0x742   : > { %8118 = vmatpush3.bf16.msra.mxu1 %v9330_v44 }
 0x743   : > { %8119 = vmatprep.subr.bf16.mxu1 %v9912_v41 }
 0x746   : > { %8120 = vmatpush3.bf16.msra.mxu1 %v9331_v56 }
 0x747   : > { %8121 = vmatprep.subr.bf16.mxu1 %v9912_v41 }
 0x74a   : > { %8122 = vmatpush3.bf16.msra.mxu1 %v9332_v37 }
 0x74b   : > { %8123 = vmatprep.subr.bf16.mxu1 %v9912_v41 }
 0x74e   : > { %8124 = vmatpush3.bf16.msra.mxu1 %v9333_v9 }
 0x74f   : > { %8125 = vmatprep.subr.bf16.mxu1 %v9912_v41 }
 0x752   : > { %8126 = vmatpush3.bf16.msra.mxu1 %v9334_v25 }
 0x753   : > { %8127 = vmatprep.subr.bf16.mxu1 %v9912_v41 }
 0x756   : > { %8128 = vmatpush3.bf16.msra.mxu1 %v9335_v55 }
 0x757   : > { %8129 = vmatprep.subr.bf16.mxu1 %v9912_v41 }
 0x75a   : > { %8130 = vmatpush3.bf16.msra.mxu1 %v9336_v7 }
 0x810   : > { %v8100_v21 = vpop.f32.mrb[0].mxu1 }
 0x811   : > { %v8101_v59 = vpop.f32.mrb[1].mxu1 }
 0x812   : > { %v8102_v17 = vadd.f32 %v8101_v59, %v8100_v21  ;;  %v8103_v61 = vpop.f32.mrb[2].mxu1 }
 0x813   : > { %v8104_v15 = vpop.f32.mrb[3].mxu1 }
 0x814   : > { %v6986_v18 = vrot.slane %v8102_v17, 4  ;;  %v8105_v31 = vadd.f32 %v8104_v15, %v8103_v61 }
 0x816   : > { %v6987_v51 = vadd.f32 %v8102_v17, %v6986_v18  ;;  %v6992_v39 = vrot.slane %v8105_v31, 4 }
 0x818   : > { %v6988_v6 = vrot.slane %v6987_v51, 2  ;;  %v6993_v62 = vadd.f32 %v8105_v31, %v6992_v39 }
 0x81a   : > { %v6989_v19 = vadd.f32 %v6988_v6, %v6987_v51  ;;  %v6994_v0 = vrot.slane %v6993_v62, 2 }
 0x81c   : > { %v6990_v45 = vrot.slane %v6989_v19, 1  ;;  %v6995_v46 = vadd.f32 %v6994_v0, %v6993_v62 }
 0x81e   : > { %v6991_v2 = vadd.f32 %v6990_v45, %v6989_v19  ;;  %v6996_v27 = vrot.slane %v6995_v46, 1 }
 0x820   : > { %v6998_v11 = vmul.f32 0.125, %v6991_v2  ;;  %v6997_v10 = vadd.f32 %v6996_v27, %v6995_v46 }
 0x822   : > { %v7000_v42 = vsub.f32 %v8102_v17, %v6998_v11  ;;  %v6999_v50 = vmul.f32 0.125, %v6997_v10 }
 0x824   : > { %v7002_v40 = vmul.f32 %v7000_v42, %v7000_v42  ;;  %v7001_v63 = vsub.f32 %v8105_v31, %v6999_v50 }
 0x826   : > { %v7004_v53 = vrot.slane %v7002_v40, 4  ;;  %v7003_v57 = vmul.f32 %v7001_v63, %v7001_v63 }
 0x828   : > { %v7005_v58 = vadd.f32 %v7004_v53, %v7002_v40  ;;  %v7010_v34 = vrot.slane %v7003_v57, 4 }
 0x82a   : > { %v7006_v36 = vrot.slane %v7005_v58, 2  ;;  %v7011_v38 = vadd.f32 %v7010_v34, %v7003_v57 }
 0x82c   : > { %v7007_v48 = vadd.f32 %v7006_v36, %v7005_v58  ;;  %v7012_v32 = vrot.slane %v7011_v38, 2 }
 0x82e   : > { %v7008_v26 = vrot.slane %v7007_v48, 1  ;;  %v7013_v14 = vadd.f32 %v7012_v32, %v7011_v38 }
 0x830   : > { %v7009_v54 = vadd.f32 %v7008_v26, %v7007_v48  ;;  %v7014_v5 = vrot.slane %v7013_v14, 1 }
 0x832   : > { %v7016_v8 = vmul.f32 0.125, %v7009_v54  ;;  %v7015_v3 = vadd.f32 %v7014_v5, %v7013_v14 }
 0x834   : > { %v7018_v22 = vadd.f32 1e-05, %v7016_v8  ;;  %v7017_v49 = vmul.f32 0.125, %v7015_v3 }
 0x836   : > { %9361 = vrsqrt.f32 %v7018_v22  ;;  %v7019_v24 = vadd.f32 1e-05, %v7017_v49 }
 0x838   : > { %9363 = vrsqrt.f32 %v7019_v24 }
 0x840   : > { %v9362_v33 = vpop.eup %9361 }
 0x841   : > { %v7022_v16 = vmul.f32 %v9362_v33, %v7000_v42 }
 0x842   : > { %v9364_v60 = vpop.eup %9363 }
 0x843   : > { %v7030_v23 = vmul.f32 %v8064_v52, %v7022_v16  ;;  %v7023_v30 = vmul.f32 %v9364_v60, %v7001_v63 }
 0x845   : > { %v7031_v20 = vmul.f32 %v8064_v52, %v7023_v30  ;;  %v7038_v47 = vadd.f32 %v8065_v43, %v7030_v23 }
 0x847   : > { %v7039_v1 = vadd.f32 %v8065_v43, %v7031_v20  ;;  %v7040_v13 = vmax.f32 %v7038_v47, 0.0 }
 0x849   : > { %v7041_v4 = vmax.f32 %v7039_v1, 0.0 }
 0x84b   : > { %v7042_v35 = vpack.c.bf16 %v7041_v4, %v7040_v13 }
 0x84d   : > { %8132 = vmatmul.mubr.bf16.vlgmr.msra.gmra.mrb[4].mxu1 %v7042_v35 }
 0x920   : > { %v7148_v28 = vpop.f32.mrb[4].mxu1 }
 0x921   : > { %v7149_v29 = vadd.f32 %v8066_v12, %v7148_v28  ;;  %v8133_v41 = vpop.f32.mrb[5].mxu1 }
 0x922   : > { %v7151_v44 = vpop.f32.mrb[6].mxu1 }
 0x923   : > { %7155 = vst [vmem:[#allocation27] sm:$0xff] %v7149_v29  ;;  %v7152_v56 = vadd.f32 %v8066_v12, %v7151_v44  ;;  %v8134_v37 = vpop.f32.mrb[7].mxu1 }
 0x925   : > { %7156 = vst [vmem:[#allocation27 + $0x8] sm:$0xff] %v7152_v56 }
 0x926 PF: > { %p8321_p3 = scmp.eq.s32.totalorder %s10018_s24, 1  ;;  %s9914_s16 = smov [#allocation27]  }
 0x927   : > { %s7163_s1 = sshll.u32 %s9914_s16, 4  ;;  %s7164_s1 = int_to_ptr.vmem [resolvable:$true] %s7163_s1 }
 0x928   : > { %s9793_s21 = scalar_lea.vmem %s7164_s1, 256  ;;  %p9800_p1 = scmp.lt.s32.totalorder %s7164_s1, %s7164_s1 }
 0x929   : > { %p9794_p6 = scmp.ne.s32.totalorder %s7164_s1, %s9793_s21  ;;  %p9801_p11 = scmp.lt.s32.totalorder %s9793_s21, %s9793_s21 }
 0x92b   : > { %p9795_p12 = pnand %p9794_p6, %p8321_p3  ;;  %p9802_p4 = por %p9801_p11, %p9800_p1 }
 0x92d   : > { %p9796_p8 = pneg %p9795_p12 }
 0x92f   : > { %p9803_p10 = pnand %p9802_p4, %p9796_p8 }
 0x931   : > { %9806 = shalt.err (!%p9803_p10)
}
 0x932   : > { %s11964_s28 = sld [smem:[#allocation70_spill]] }
 0x938   : > { %s9807_s23 = scalar_lea.hbm %s11964_s28, 256 }
 0x939   : > { %p9808_p7 = scmp.ne.s32.totalorder %s11964_s28, %s9807_s23  ;;  %p9813_p13 = scmp.lt.u32.totalorder %s9807_s23, %s11964_s28 }
 0x93b   : > { %p9809_p0 = pnand %p9808_p7, %p8321_p3 }
 0x93d   : > { %p9810_p9 = pneg %p9809_p0 }
 0x93f   : > { %p9815_p2 = pnand %p9813_p13, %p9810_p9 }
 0x941   : > { %9818 = shalt.err (!%p9815_p2)
}
 0x942   : > { %s9915_s4 = smov 128   ;;  %s9916_s15 = smov 8  }
 0x943   : > { %8248 = dma.vmem_to_hbm [thread:$0]  (%p8321_p3), %s7164_s1, 256, %s11964_s28, [#allocation5], %s9915_s4, %s9915_s4, %s9916_s15  }
 0x944   : > { %9868 = dma.done.wait (%p8321_p3), [#allocation5], 256  }
 0x945   : > { %9870 = vsyncadd (%p8321_p3), [#allocation5], 4294967040 }
 0x946 PF: > { %s11965_s21 = sld [smem:[#allocation39_spill]]  ;;  %s11966_s30 = sld [smem:[#allocation37_spill]] }
 0x947   : > { %s11967_s20 = sld [smem:[#allocation40_spill]]  ;;  %s11968_s18 = smov %s9877_s19 }
 0x94c   : > { %p35_p5 = scmp.ge.s32.totalorder %s11965_s21, 4   ;;  %s11969_s19 = smov %s11966_s30 }
 0x94e   :  { %37 = sbr.rel (!%p35_p5) target bundleno = 27 (0x1b), region = 205 }
 0x955   :  { %7179 = vsyncpa [#allocation4], 1 }
 0x956   :  { %7181 = vsyncpa [#allocation4 + $0x1], 1 }
 0x957   :  { %7182 = vsyncpa [#allocation7], 1 }
 0x958   :  { %7184 = vsyncpa [#allocation7 + $0x1], 1 }
 0x959   :  { %7185 = vsyncpa [#allocation10], 1 }
 0x95a   :  { %7187 = vsyncpa [#allocation10 + $0x1], 1 }
 0x95b   :  { %7188 = vsyncpa [#allocation13], 1 }
 0x95c   :  { %7189 = vsyncpa [#allocation16], 1 }
 0x95d   :  { %7190 = vsyncpa [#allocation19], 1 }
 0x95e   :  { %7191 = vsyncpa [#allocation22], 1 }
 0x95f   :  { %7192 = vsyncpa [#allocation25], 1 }
 0x960   :  { %7193 = vsyncpa [#allocation5], 1 }
 0x961   :  { %7195 = vsyncpa [#allocation5 + $0x1], 1 }

</bundles_post_ra>
